<compile_context>
chip_gen: v6e
topology: v6e:2x2x1
jax: 0.10.0
libtpu: 0.0.40
codegen_flags: <defaults>
</compile_context>

<pallas_src>
import math

import jax
import jax.numpy as jnp
from jax.experimental import pallas as pl
from jax.experimental.pallas import tpu as pltpu

# ----------------- synthetic model configuration -----------------
VOCAB = 64
MAX_POS = 24
TYPE_VOCAB = 2
HIDDEN = 32
N_HEADS = 2
HEAD_DIM = HIDDEN // N_HEADS
INTERMEDIATE = 64
N_LAYERS = 2
P1, P2, P3 = 512, 256, 128          # BertLargeDSSM projection tower widths
PROJ = 64                           # proj_size (< 128 per the module assert)
N_DSSM_HEADS = 1                    # BertLargeDSSM default n_head
MH_OUT = N_DSSM_HEADS * PROJ
OUT_W = PROJ + MH_OUT               # 128-lane-dense fused output slab
PAD_TOKEN_ID = 1
LN_EPS = 1e-5                       # XLMRobertaConfig / nn.LayerNorm default
NORMALIZE_EPS = 1e-12               # F.normalize default eps
NEG_INF = -1e30
MASK_BIAS = -1e9

# TODO(synk): per-head slicing of the multihead output for n_head > 1 needs
# lane-unaligned slicing; only the module default n_head=1 is implemented.
assert N_DSSM_HEADS == 1

# --------- packed vector-parameter tables (row -> (index, width)) ---------
ENC_VEC_W = 128
ENC_ROWS = {
    "qkv_b":     (0, 3 * HIDDEN),
    "o_b":       (1, HIDDEN),
    "attn_ln_g": (2, HIDDEN),
    "attn_ln_b": (3, HIDDEN),
    "i_b":       (4, INTERMEDIATE),
    "fo_b":      (5, HIDDEN),
    "ffn_ln_g":  (6, HIDDEN),
    "ffn_ln_b":  (7, HIDDEN),
}
N_ENC_ROWS = 8

TOWER_VEC_W = 512
TOWER_ROWS = {
    "emb_ln_g": (0, HIDDEN),  "emb_ln_b": (1, HIDDEN),
    "p_ln0_g":  (2, HIDDEN),  "p_ln0_b":  (3, HIDDEN),
    "p_b1":     (4, P1),      "p_a1":     (5, P1),
    "p_ln1_g":  (6, P1),      "p_ln1_b":  (7, P1),
    "p_b2":     (8, P2),      "p_a2":     (9, P2),
    "p_ln2_g":  (10, P2),     "p_ln2_b":  (11, P2),
    "p_b3":     (12, P3),     "p_a3":     (13, P3),
    "p_ln3_g":  (14, P3),     "p_ln3_b":  (15, P3),
    "p_b4":     (16, PROJ),   "p_a4":     (17, PROJ),
    "mh_b":     (18, MH_OUT), "mh_a":     (19, MH_OUT),
}
N_TOWER_ROWS = 20

WEIGHT_NAMES = ("enc_vec", "qkv_w", "o_w", "i_w", "fo_w", "tower_vec",
                "p_w1", "p_w2", "p_w3", "p_w4", "mh_w")


# ----------------- in-kernel helpers -----------------
def _ln(x, g, b, eps=LN_EPS):
    mu = jnp.mean(x, axis=-1, keepdims=True)
    xc = x - mu
    var = jnp.mean(xc * xc, axis=-1, keepdims=True)
    return xc * jax.lax.rsqrt(var + eps) * g + b


def _prelu(x, a):
    # `a` is a [1, width] row broadcast along sublanes -> pure elementwise.
    return jnp.where(x >= 0.0, x, a * x)


def _l2_normalize(x, eps=NORMALIZE_EPS):
    # F.normalize: x / max(||x||, eps) == x * rsqrt(max(||x||^2, eps^2)).
    ss = jnp.sum(x * x, axis=-1, keepdims=True)
    return x * jax.lax.rsqrt(jnp.maximum(ss, jnp.float32(eps * eps)))


# --------- fused forward kernel: whole batch, single invocation ---------
def _make_kernel(batch, seq):
    f32 = jnp.float32
    scale = 1.0 / math.sqrt(HEAD_DIM)

    def kernel(emb_ref, attn_bias_ref, pool_bias_ref,
               enc_vec_ref, qkv_w_ref, o_w_ref, i_w_ref, fo_w_ref,
               tower_vec_ref, p_w1_ref, p_w2_ref, p_w3_ref, p_w4_ref, mh_w_ref,
               out_ref):
        tv = tower_vec_ref[...]                                   # [20, 512]

        def trow(name):
            r, w = TOWER_ROWS[name]
            return tv[r:r + 1, :w]                                # [1, w]

        # ---- embeddings + LayerNorm over the flattened [B*S, H] rows ----
        h = _ln(emb_ref[...].astype(f32), trow("emb_ln_g"), trow("emb_ln_b"))
        bias = attn_bias_ref[...]                                 # [BS, BS]

        # ---- transformer encoder layers (static unroll, VMEM-resident) ----
        for l in range(N_LAYERS):
            ev = enc_vec_ref[l]                                   # [8, 128]

            def erow(name, _ev=ev):
                r, w = ENC_ROWS[name]
                return _ev[r:r + 1, :w]                           # [1, w]

            # fused QKV projection: one [H, 3H] matmul per layer
            qkv = (jnp.dot(h, qkv_w_ref[l], preferred_element_type=f32)
                   + erow("qkv_b"))                               # [BS, 3H]
            ctx = []
            for hh in range(N_HEADS):
                q = qkv[:, hh * HEAD_DIM:(hh + 1) * HEAD_DIM]
                k = qkv[:, HIDDEN + hh * HEAD_DIM:HIDDEN + (hh + 1) * HEAD_DIM]
                v = qkv[:, 2 * HIDDEN + hh * HEAD_DIM:
                        2 * HIDDEN + (hh + 1) * HEAD_DIM]
                # [BS, BS] scores; cross-batch + padded columns carry -1e9
                s = jnp.dot(q, k.T, preferred_element_type=f32) * scale + bias
                s_max = jnp.max(s, axis=-1, keepdims=True)
                e = jnp.exp(s - s_max)
                denom = jnp.sum(e, axis=-1, keepdims=True)
                p = e * pl.reciprocal(denom, approx=True)         # EUP slot
                ctx.append(jnp.dot(p, v, preferred_element_type=f32))
            ctx = jnp.concatenate(ctx, axis=-1)                   # [BS, H]
            attn = (jnp.dot(ctx, o_w_ref[l], preferred_element_type=f32)
                    + erow("o_b"))
            h = _ln(h + attn, erow("attn_ln_g"), erow("attn_ln_b"))

            inter = (jnp.dot(h, i_w_ref[l], preferred_element_type=f32)
                     + erow("i_b"))
            # TODO(synk): HF XLM-Roberta uses erf-based GELU; tanh approximation
            # is used because lax.erf has no Mosaic lowering.
            inter = jax.nn.gelu(inter, approximate=True)
            ffn = (jnp.dot(inter, fo_w_ref[l], preferred_element_type=f32)
                   + erow("fo_b"))
            h = _ln(h + ffn, erow("ffn_ln_g"), erow("ffn_ln_b"))

        # ---- masked max-pool over the sequence -> [B, H] ----
        masked = h + pool_bias_ref[...]                           # pads -> -1e30
        pooled = jnp.concatenate(
            [jnp.max(masked[b * seq:(b + 1) * seq], axis=0, keepdims=True)
             for b in range(batch)], axis=0)                      # [B, H]

        # ---- BertLargeDSSM projection tower (batched, M = B) ----
        # GaussianNoise(0.1) layers are identity at inference time.
        x = _ln(pooled, trow("p_ln0_g"), trow("p_ln0_b"))
        x = _prelu(jnp.dot(x, p_w1_ref[...], preferred_element_type=f32)
                   + trow("p_b1"), trow("p_a1"))
        x = _ln(x, trow("p_ln1_g"), trow("p_ln1_b"))
        x = _prelu(jnp.dot(x, p_w2_ref[...], preferred_element_type=f32)
                   + trow("p_b2"), trow("p_a2"))
        x = _ln(x, trow("p_ln2_g"), trow("p_ln2_b"))
        x = _prelu(jnp.dot(x, p_w3_ref[...], preferred_element_type=f32)
                   + trow("p_b3"), trow("p_a3"))
        x = _ln(x, trow("p_ln3_g"), trow("p_ln3_b"))
        x = _prelu(jnp.dot(x, p_w4_ref[...], preferred_element_type=f32)
                   + trow("p_b4"), trow("p_a4"))

        xn = _l2_normalize(x)                                     # [B, PROJ]
        mh = _prelu(jnp.dot(xn, mh_w_ref[...], preferred_element_type=f32)
                    + trow("mh_b"), trow("mh_a"))
        # N_DSSM_HEADS == 1, so normalizing the whole multihead output equals
        # the per-head-slice normalization of the reference module.
        mh_n = _l2_normalize(mh)                                  # [B, MH_OUT]

        # single lane-dense [B, 128] store: xn in lanes 0:64, mh_n in 64:128
        out_ref[...] = jnp.concatenate([xn, mh_n], axis=-1)

    return kernel


# ----------------- wrapper (plain JAX glue) -----------------
def bert_large_dssm_forward(params, input_ids, is_query=True):
    """Mirrors BertLargeDSSM.forward; returns [x_norm] + per-head normalized."""
    B, S = input_ids.shape
    BS = B * S
    mask = input_ids != PAD_TOKEN_ID
    mask_f = mask.astype(jnp.float32)
    token_type_ids = (jnp.zeros_like(input_ids) if is_query
                      else jnp.ones_like(input_ids))

    # XLM-Roberta style position ids: cumsum(mask)*mask + padding_idx.
    mask_i = mask.astype(jnp.int32)
    position_ids = jnp.cumsum(mask_i, axis=1) * mask_i + PAD_TOKEN_ID

    # Embedding table gathers stay in plain JAX (no clean blocked Pallas
    # equivalent at these sizes); everything downstream is one fused kernel.
    emb = (params["word_emb"][input_ids]
           + params["pos_emb"][position_ids]
           + params["type_emb"][token_type_ids]).astype(jnp.float32)
    emb = emb.reshape(BS, HIDDEN)                                  # [B*S, H]

    # Additive attention bias over flattened rows/cols: padded columns AND
    # cross-batch blocks get -1e9 (=> ~0 softmax weight, exactly equivalent to
    # per-batch masked softmax).
    mflat = mask_f.reshape(BS)
    col_bias = (1.0 - mflat) * MASK_BIAS                           # [BS]
    batch_ids = jnp.repeat(jnp.arange(B), S)                       # [BS]
    cross = jnp.where(batch_ids[:, None] != batch_ids[None, :],
                      MASK_BIAS, 0.0)
    attn_bias = (col_bias[None, :] + cross).astype(jnp.float32)    # [BS, BS]

    # Additive pooling bias: padded rows get -1e30 so the per-batch max
    # ignores them (lane-dense, avoids a width-1 mask input).
    pool_bias = jnp.broadcast_to(((1.0 - mflat) * NEG_INF)[:, None],
                                 (BS, HIDDEN)).astype(jnp.float32)

    weights = [params[n] for n in WEIGHT_NAMES]

    # Advisory cost estimate so XLA overlaps the embedding gathers with the call.
    mm = N_LAYERS * (BS * HIDDEN * 3 * HIDDEN
                     + 2 * N_HEADS * BS * BS * HEAD_DIM
                     + BS * HIDDEN * HIDDEN
                     + 2 * BS * HIDDEN * INTERMEDIATE)
    mm += B * (HIDDEN * P1 + P1 * P2 + P2 * P3 + P3 * PROJ + PROJ * MH_OUT)
    flops = 2 * mm
    transcendentals = N_LAYERS * (N_HEADS * BS * BS + BS * INTERMEDIATE) + 8 * B
    bytes_accessed = 4 * (int(emb.size) + int(attn_bias.size)
                          + int(pool_bias.size)
                          + sum(int(w.size) for w in weights)
                          + B * OUT_W)

    out = pl.pallas_call(
        _make_kernel(B, S),
        out_shape=jax.ShapeDtypeStruct((B, OUT_W), jnp.float32),
        compiler_params=pltpu.CompilerParams(vmem_limit_bytes=32 * 1024 * 1024),
        cost_estimate=pl.CostEstimate(flops=flops,
                                      transcendentals=transcendentals,
                                      bytes_accessed=bytes_accessed),
    )(emb, attn_bias, pool_bias, *weights)

    xn = out[:, :PROJ]
    mh = out[:, PROJ:OUT_W]
    heads = [mh[:, i * PROJ:(i + 1) * PROJ] for i in range(N_DSSM_HEADS)]
    return [xn] + heads


# ----------------- deterministic parameter init -----------------
def init_params(key):
    keys = iter(jax.random.split(key, 16))

    def normal(shape, std=0.02):
        return (std * jax.random.normal(next(keys), shape)).astype(jnp.float32)

    # packed per-layer vector params: biases zero, LN gammas one
    enc_vec = jnp.zeros((N_LAYERS, N_ENC_ROWS, ENC_VEC_W), jnp.float32)
    for name in ("attn_ln_g", "ffn_ln_g"):
        r, w = ENC_ROWS[name]
        enc_vec = enc_vec.at[:, r, :w].set(1.0)

    # packed tower vector params: biases zero, LN gammas one, PReLU alphas 0.25
    tower_vec = jnp.zeros((N_TOWER_ROWS, TOWER_VEC_W), jnp.float32)
    for name in ("emb_ln_g", "p_ln0_g", "p_ln1_g", "p_ln2_g", "p_ln3_g"):
        r, w = TOWER_ROWS[name]
        tower_vec = tower_vec.at[r, :w].set(1.0)
    for name in ("p_a1", "p_a2", "p_a3", "p_a4", "mh_a"):
        r, w = TOWER_ROWS[name]
        tower_vec = tower_vec.at[r, :w].set(0.25)   # nn.PReLU() default

    return {
        # embedding tables (gathered in plain JAX)
        "word_emb": normal((VOCAB, HIDDEN)).at[PAD_TOKEN_ID].set(0.0),
        "pos_emb": normal((MAX_POS, HIDDEN)).at[PAD_TOKEN_ID].set(0.0),
        "type_emb": normal((TYPE_VOCAB, HIDDEN)),
        # packed encoder params
        "enc_vec": enc_vec,
        "qkv_w": normal((N_LAYERS, HIDDEN, 3 * HIDDEN)),   # [Q | K | V] columns
        "o_w": normal((N_LAYERS, HIDDEN, HIDDEN)),         # concat-head ctx -> H
        "i_w": normal((N_LAYERS, HIDDEN, INTERMEDIATE)),
        "fo_w": normal((N_LAYERS, INTERMEDIATE, HIDDEN)),
        # packed projection-tower params
        "tower_vec": tower_vec,
        "p_w1": normal((HIDDEN, P1)),
        "p_w2": normal((P1, P2)),
        "p_w3": normal((P2, P3)),
        "p_w4": normal((P3, PROJ)),
        "mh_w": normal((PROJ, MH_OUT)),
    }


if __name__ == "__main__":
    key = jax.random.PRNGKey(0)
    pkey, dkey = jax.random.split(key)
    params = init_params(pkey)

    B, S = 2, 8
    input_ids = jax.random.randint(dkey, (B, S), 2, VOCAB, dtype=jnp.int32)
    input_ids = input_ids.at[0, 6:].set(PAD_TOKEN_ID)   # pad tail of row 0
    input_ids = input_ids.at[1, 5:].set(PAD_TOKEN_ID)   # pad tail of row 1

    fwd = jax.jit(bert_large_dssm_forward, static_argnames=("is_query",))
    outs = fwd(params, input_ids, is_query=True)
    jax.block_until_ready(outs)

    assert len(outs) == 1 + N_DSSM_HEADS
    assert all(o.shape == (B, PROJ) for o in outs)
    print("KERNEL_OK")
</pallas_src>

<mosaic_0001>
module attributes {stable_mosaic.version = 11 : i64} {
  func.func @kernel(%arg0: memref<16x32xf32, #tpu.memory_space<vmem>>, %arg1: memref<16x16xf32, #tpu.memory_space<vmem>>, %arg2: memref<16x32xf32, #tpu.memory_space<vmem>>, %arg3: memref<2x8x128xf32, #tpu.memory_space<vmem>>, %arg4: memref<2x32x96xf32, #tpu.memory_space<vmem>>, %arg5: memref<2x32x32xf32, #tpu.memory_space<vmem>>, %arg6: memref<2x32x64xf32, #tpu.memory_space<vmem>>, %arg7: memref<2x64x32xf32, #tpu.memory_space<vmem>>, %arg8: memref<20x512xf32, #tpu.memory_space<vmem>>, %arg9: memref<32x512xf32, #tpu.memory_space<vmem>>, %arg10: memref<512x256xf32, #tpu.memory_space<vmem>>, %arg11: memref<256x128xf32, #tpu.memory_space<vmem>>, %arg12: memref<128x64xf32, #tpu.memory_space<vmem>>, %arg13: memref<64x64xf32, #tpu.memory_space<vmem>>, %arg14: memref<2x128xf32, #tpu.memory_space<vmem>>) attributes {dimension_semantics = [], scalar_prefetch = 0 : i64, scratch_operands = 0 : i64, tpu.core_type = #tpu.core_type<tc>} {
    %c0 = arith.constant 0 : index
    %c0_0 = arith.constant 0 : index
    %0 = vector.load %arg8[%c0, %c0_0] : memref<20x512xf32, #tpu.memory_space<vmem>>, vector<20x512xf32>
    %c0_1 = arith.constant 0 : index
    %c0_2 = arith.constant 0 : index
    %1 = vector.load %arg0[%c0_1, %c0_2] : memref<16x32xf32, #tpu.memory_space<vmem>>, vector<16x32xf32>
    %2 = vector.extract_strided_slice %0 {offsets = [0, 0], sizes = [1, 32], strides = [1, 1]} : vector<20x512xf32> to vector<1x32xf32>
    %3 = vector.extract_strided_slice %0 {offsets = [1, 0], sizes = [1, 32], strides = [1, 1]} : vector<20x512xf32> to vector<1x32xf32>
    %cst = arith.constant dense<0.000000e+00> : vector<16xf32>
    %4 = vector.multi_reduction <add>, %1, %cst [1] : vector<16x32xf32> to vector<16xf32>
    %5 = vector.shape_cast %4 : vector<16xf32> to vector<16x1xf32>
    %cst_3 = arith.constant 3.200000e+01 : f32
    %6 = vector.broadcast %cst_3 : f32 to vector<16x1xf32>
    %7 = arith.divf %5, %6 : vector<16x1xf32>
    %8 = vector.broadcast %7 : vector<16x1xf32> to vector<16x32xf32>
    %9 = arith.subf %1, %8 : vector<16x32xf32>
    %10 = arith.mulf %9, %9 : vector<16x32xf32>
    %cst_4 = arith.constant dense<0.000000e+00> : vector<16xf32>
    %11 = vector.multi_reduction <add>, %10, %cst_4 [1] : vector<16x32xf32> to vector<16xf32>
    %12 = vector.shape_cast %11 : vector<16xf32> to vector<16x1xf32>
    %cst_5 = arith.constant 3.200000e+01 : f32
    %13 = vector.broadcast %cst_5 : f32 to vector<16x1xf32>
    %14 = arith.divf %12, %13 : vector<16x1xf32>
    %cst_6 = arith.constant 9.99999974E-6 : f32
    %15 = vector.broadcast %cst_6 : f32 to vector<16x1xf32>
    %16 = arith.addf %14, %15 : vector<16x1xf32>
    %17 = math.rsqrt %16 : vector<16x1xf32>
    %18 = vector.broadcast %17 : vector<16x1xf32> to vector<16x32xf32>
    %19 = arith.mulf %9, %18 : vector<16x32xf32>
    %20 = vector.broadcast %2 : vector<1x32xf32> to vector<16x32xf32>
    %21 = arith.mulf %19, %20 : vector<16x32xf32>
    %22 = vector.broadcast %3 : vector<1x32xf32> to vector<16x32xf32>
    %23 = arith.addf %21, %22 : vector<16x32xf32>
    %c0_7 = arith.constant 0 : index
    %c0_8 = arith.constant 0 : index
    %24 = vector.load %arg1[%c0_7, %c0_8] : memref<16x16xf32, #tpu.memory_space<vmem>>, vector<16x16xf32>
    %c0_9 = arith.constant 0 : index
    %c0_10 = arith.constant 0 : index
    %c0_11 = arith.constant 0 : index
    %25 = vector.load %arg3[%c0_9, %c0_10, %c0_11] : memref<2x8x128xf32, #tpu.memory_space<vmem>>, vector<1x8x128xf32>
    %26 = vector.shape_cast %25 : vector<1x8x128xf32> to vector<8x128xf32>
    %c0_12 = arith.constant 0 : index
    %c0_13 = arith.constant 0 : index
    %c0_14 = arith.constant 0 : index
    %27 = vector.load %arg4[%c0_12, %c0_13, %c0_14] : memref<2x32x96xf32, #tpu.memory_space<vmem>>, vector<1x32x96xf32>
    %28 = vector.shape_cast %27 : vector<1x32x96xf32> to vector<32x96xf32>
    %cst_15 = arith.constant dense<0.000000e+00> : vector<16x96xf32>
    %29 = tpu.matmul %23, %28, %cst_15 {dimension_numbers = #tpu.dot_dimension_numbers<[1], [0], [0], [1], [0, 0, 1, 1], [], []>} : vector<16x32xf32>, vector<32x96xf32>, vector<16x96xf32> -> vector<16x96xf32>
    %30 = vector.extract_strided_slice %26 {offsets = [0, 0], sizes = [1, 96], strides = [1, 1]} : vector<8x128xf32> to vector<1x96xf32>
    %31 = vector.broadcast %30 : vector<1x96xf32> to vector<16x96xf32>
    %32 = arith.addf %29, %31 : vector<16x96xf32>
    %33 = vector.extract_strided_slice %32 {offsets = [0, 0], sizes = [16, 16], strides = [1, 1]} : vector<16x96xf32> to vector<16x16xf32>
    %34 = vector.extract_strided_slice %32 {offsets = [0, 32], sizes = [16, 16], strides = [1, 1]} : vector<16x96xf32> to vector<16x16xf32>
    %35 = vector.extract_strided_slice %32 {offsets = [0, 64], sizes = [16, 16], strides = [1, 1]} : vector<16x96xf32> to vector<16x16xf32>
    %36 = tpu.transpose %34, [1, 0] : vector<16x16xf32> -> vector<16x16xf32>
    %cst_16 = arith.constant dense<0.000000e+00> : vector<16x16xf32>
    %37 = tpu.matmul %33, %36, %cst_16 {dimension_numbers = #tpu.dot_dimension_numbers<[1], [0], [0], [1], [0, 0, 1, 1], [], []>} : vector<16x16xf32>, vector<16x16xf32>, vector<16x16xf32> -> vector<16x16xf32>
    %cst_17 = arith.constant 2.500000e-01 : f32
    %38 = vector.broadcast %cst_17 : f32 to vector<16x16xf32>
    %39 = arith.mulf %37, %38 : vector<16x16xf32>
    %40 = arith.addf %39, %24 : vector<16x16xf32>
    %cst_18 = arith.constant dense<0xFF800000> : vector<16xf32>
    %41 = vector.multi_reduction <maximumf>, %40, %cst_18 [1] : vector<16x16xf32> to vector<16xf32>
    %42 = vector.shape_cast %41 : vector<16xf32> to vector<16x1xf32>
    %43 = vector.broadcast %42 : vector<16x1xf32> to vector<16x16xf32>
    %44 = arith.subf %40, %43 : vector<16x16xf32>
    %45 = math.exp %44 : vector<16x16xf32>
    %cst_19 = arith.constant dense<0.000000e+00> : vector<16xf32>
    %46 = vector.multi_reduction <add>, %45, %cst_19 [1] : vector<16x16xf32> to vector<16xf32>
    %47 = vector.shape_cast %46 : vector<16xf32> to vector<16x1xf32>
    %48 = tpu.reciprocal %47 {approx = true} : vector<16x1xf32> -> vector<16x1xf32>
    %49 = vector.broadcast %48 : vector<16x1xf32> to vector<16x16xf32>
    %50 = arith.mulf %45, %49 : vector<16x16xf32>
    %cst_20 = arith.constant dense<0.000000e+00> : vector<16x16xf32>
    %51 = tpu.matmul %50, %35, %cst_20 {dimension_numbers = #tpu.dot_dimension_numbers<[1], [0], [0], [1], [0, 0, 1, 1], [], []>} : vector<16x16xf32>, vector<16x16xf32>, vector<16x16xf32> -> vector<16x16xf32>
    %52 = vector.extract_strided_slice %32 {offsets = [0, 16], sizes = [16, 16], strides = [1, 1]} : vector<16x96xf32> to vector<16x16xf32>
    %53 = vector.extract_strided_slice %32 {offsets = [0, 48], sizes = [16, 16], strides = [1, 1]} : vector<16x96xf32> to vector<16x16xf32>
    %54 = vector.extract_strided_slice %32 {offsets = [0, 80], sizes = [16, 16], strides = [1, 1]} : vector<16x96xf32> to vector<16x16xf32>
    %55 = tpu.transpose %53, [1, 0] : vector<16x16xf32> -> vector<16x16xf32>
    %cst_21 = arith.constant dense<0.000000e+00> : vector<16x16xf32>
    %56 = tpu.matmul %52, %55, %cst_21 {dimension_numbers = #tpu.dot_dimension_numbers<[1], [0], [0], [1], [0, 0, 1, 1], [], []>} : vector<16x16xf32>, vector<16x16xf32>, vector<16x16xf32> -> vector<16x16xf32>
    %cst_22 = arith.constant 2.500000e-01 : f32
    %57 = vector.broadcast %cst_22 : f32 to vector<16x16xf32>
    %58 = arith.mulf %56, %57 : vector<16x16xf32>
    %59 = arith.addf %58, %24 : vector<16x16xf32>
    %cst_23 = arith.constant dense<0xFF800000> : vector<16xf32>
    %60 = vector.multi_reduction <maximumf>, %59, %cst_23 [1] : vector<16x16xf32> to vector<16xf32>
    %61 = vector.shape_cast %60 : vector<16xf32> to vector<16x1xf32>
    %62 = vector.broadcast %61 : vector<16x1xf32> to vector<16x16xf32>
    %63 = arith.subf %59, %62 : vector<16x16xf32>
    %64 = math.exp %63 : vector<16x16xf32>
    %cst_24 = arith.constant dense<0.000000e+00> : vector<16xf32>
    %65 = vector.multi_reduction <add>, %64, %cst_24 [1] : vector<16x16xf32> to vector<16xf32>
    %66 = vector.shape_cast %65 : vector<16xf32> to vector<16x1xf32>
    %67 = tpu.reciprocal %66 {approx = true} : vector<16x1xf32> -> vector<16x1xf32>
    %68 = vector.broadcast %67 : vector<16x1xf32> to vector<16x16xf32>
    %69 = arith.mulf %64, %68 : vector<16x16xf32>
    %cst_25 = arith.constant dense<0.000000e+00> : vector<16x16xf32>
    %70 = tpu.matmul %69, %54, %cst_25 {dimension_numbers = #tpu.dot_dimension_numbers<[1], [0], [0], [1], [0, 0, 1, 1], [], []>} : vector<16x16xf32>, vector<16x16xf32>, vector<16x16xf32> -> vector<16x16xf32>
    %71 = tpu.concatenate %51, %70 in 1 : vector<16x16xf32>, vector<16x16xf32> -> vector<16x32xf32>
    %c0_26 = arith.constant 0 : index
    %c0_27 = arith.constant 0 : index
    %c0_28 = arith.constant 0 : index
    %72 = vector.load %arg5[%c0_26, %c0_27, %c0_28] : memref<2x32x32xf32, #tpu.memory_space<vmem>>, vector<1x32x32xf32>
    %73 = vector.shape_cast %72 : vector<1x32x32xf32> to vector<32x32xf32>
    %cst_29 = arith.constant dense<0.000000e+00> : vector<16x32xf32>
    %74 = tpu.matmul %71, %73, %cst_29 {dimension_numbers = #tpu.dot_dimension_numbers<[1], [0], [0], [1], [0, 0, 1, 1], [], []>} : vector<16x32xf32>, vector<32x32xf32>, vector<16x32xf32> -> vector<16x32xf32>
    %75 = vector.extract_strided_slice %26 {offsets = [1, 0], sizes = [1, 32], strides = [1, 1]} : vector<8x128xf32> to vector<1x32xf32>
    %76 = vector.broadcast %75 : vector<1x32xf32> to vector<16x32xf32>
    %77 = arith.addf %74, %76 : vector<16x32xf32>
    %78 = arith.addf %23, %77 : vector<16x32xf32>
    %79 = vector.extract_strided_slice %26 {offsets = [2, 0], sizes = [1, 32], strides = [1, 1]} : vector<8x128xf32> to vector<1x32xf32>
    %80 = vector.extract_strided_slice %26 {offsets = [3, 0], sizes = [1, 32], strides = [1, 1]} : vector<8x128xf32> to vector<1x32xf32>
    %cst_30 = arith.constant dense<0.000000e+00> : vector<16xf32>
    %81 = vector.multi_reduction <add>, %78, %cst_30 [1] : vector<16x32xf32> to vector<16xf32>
    %82 = vector.shape_cast %81 : vector<16xf32> to vector<16x1xf32>
    %cst_31 = arith.constant 3.200000e+01 : f32
    %83 = vector.broadcast %cst_31 : f32 to vector<16x1xf32>
    %84 = arith.divf %82, %83 : vector<16x1xf32>
    %85 = vector.broadcast %84 : vector<16x1xf32> to vector<16x32xf32>
    %86 = arith.subf %78, %85 : vector<16x32xf32>
    %87 = arith.mulf %86, %86 : vector<16x32xf32>
    %cst_32 = arith.constant dense<0.000000e+00> : vector<16xf32>
    %88 = vector.multi_reduction <add>, %87, %cst_32 [1] : vector<16x32xf32> to vector<16xf32>
    %89 = vector.shape_cast %88 : vector<16xf32> to vector<16x1xf32>
    %cst_33 = arith.constant 3.200000e+01 : f32
    %90 = vector.broadcast %cst_33 : f32 to vector<16x1xf32>
    %91 = arith.divf %89, %90 : vector<16x1xf32>
    %cst_34 = arith.constant 9.99999974E-6 : f32
    %92 = vector.broadcast %cst_34 : f32 to vector<16x1xf32>
    %93 = arith.addf %91, %92 : vector<16x1xf32>
    %94 = math.rsqrt %93 : vector<16x1xf32>
    %95 = vector.broadcast %94 : vector<16x1xf32> to vector<16x32xf32>
    %96 = arith.mulf %86, %95 : vector<16x32xf32>
    %97 = vector.broadcast %79 : vector<1x32xf32> to vector<16x32xf32>
    %98 = arith.mulf %96, %97 : vector<16x32xf32>
    %99 = vector.broadcast %80 : vector<1x32xf32> to vector<16x32xf32>
    %100 = arith.addf %98, %99 : vector<16x32xf32>
    %c0_35 = arith.constant 0 : index
    %c0_36 = arith.constant 0 : index
    %c0_37 = arith.constant 0 : index
    %101 = vector.load %arg6[%c0_35, %c0_36, %c0_37] : memref<2x32x64xf32, #tpu.memory_space<vmem>>, vector<1x32x64xf32>
    %102 = vector.shape_cast %101 : vector<1x32x64xf32> to vector<32x64xf32>
    %cst_38 = arith.constant dense<0.000000e+00> : vector<16x64xf32>
    %103 = tpu.matmul %100, %102, %cst_38 {dimension_numbers = #tpu.dot_dimension_numbers<[1], [0], [0], [1], [0, 0, 1, 1], [], []>} : vector<16x32xf32>, vector<32x64xf32>, vector<16x64xf32> -> vector<16x64xf32>
    %104 = vector.extract_strided_slice %26 {offsets = [4, 0], sizes = [1, 64], strides = [1, 1]} : vector<8x128xf32> to vector<1x64xf32>
    %105 = vector.broadcast %104 : vector<1x64xf32> to vector<16x64xf32>
    %106 = arith.addf %103, %105 : vector<16x64xf32>
    %107 = arith.mulf %106, %106 : vector<16x64xf32>
    %108 = arith.mulf %106, %107 : vector<16x64xf32>
    %cst_39 = arith.constant 4.471500e-02 : f32
    %109 = vector.broadcast %cst_39 : f32 to vector<16x64xf32>
    %110 = arith.mulf %109, %108 : vector<16x64xf32>
    %111 = arith.addf %106, %110 : vector<16x64xf32>
    %cst_40 = arith.constant 0.797884583 : f32
    %112 = vector.broadcast %cst_40 : f32 to vector<16x64xf32>
    %113 = arith.mulf %112, %111 : vector<16x64xf32>
    %114 = math.tanh %113 : vector<16x64xf32>
    %cst_41 = arith.constant 1.000000e+00 : f32
    %115 = vector.broadcast %cst_41 : f32 to vector<16x64xf32>
    %116 = arith.addf %115, %114 : vector<16x64xf32>
    %cst_42 = arith.constant 5.000000e-01 : f32
    %117 = vector.broadcast %cst_42 : f32 to vector<16x64xf32>
    %118 = arith.mulf %117, %116 : vector<16x64xf32>
    %119 = arith.mulf %106, %118 : vector<16x64xf32>
    %c0_43 = arith.constant 0 : index
    %c0_44 = arith.constant 0 : index
    %c0_45 = arith.constant 0 : index
    %120 = vector.load %arg7[%c0_43, %c0_44, %c0_45] : memref<2x64x32xf32, #tpu.memory_space<vmem>>, vector<1x64x32xf32>
    %121 = vector.shape_cast %120 : vector<1x64x32xf32> to vector<64x32xf32>
    %cst_46 = arith.constant dense<0.000000e+00> : vector<16x32xf32>
    %122 = tpu.matmul %119, %121, %cst_46 {dimension_numbers = #tpu.dot_dimension_numbers<[1], [0], [0], [1], [0, 0, 1, 1], [], []>} : vector<16x64xf32>, vector<64x32xf32>, vector<16x32xf32> -> vector<16x32xf32>
    %123 = vector.extract_strided_slice %26 {offsets = [5, 0], sizes = [1, 32], strides = [1, 1]} : vector<8x128xf32> to vector<1x32xf32>
    %124 = vector.broadcast %123 : vector<1x32xf32> to vector<16x32xf32>
    %125 = arith.addf %122, %124 : vector<16x32xf32>
    %126 = arith.addf %100, %125 : vector<16x32xf32>
    %127 = vector.extract_strided_slice %26 {offsets = [6, 0], sizes = [1, 32], strides = [1, 1]} : vector<8x128xf32> to vector<1x32xf32>
    %128 = vector.extract_strided_slice %26 {offsets = [7, 0], sizes = [1, 32], strides = [1, 1]} : vector<8x128xf32> to vector<1x32xf32>
    %cst_47 = arith.constant dense<0.000000e+00> : vector<16xf32>
    %129 = vector.multi_reduction <add>, %126, %cst_47 [1] : vector<16x32xf32> to vector<16xf32>
    %130 = vector.shape_cast %129 : vector<16xf32> to vector<16x1xf32>
    %cst_48 = arith.constant 3.200000e+01 : f32
    %131 = vector.broadcast %cst_48 : f32 to vector<16x1xf32>
    %132 = arith.divf %130, %131 : vector<16x1xf32>
    %133 = vector.broadcast %132 : vector<16x1xf32> to vector<16x32xf32>
    %134 = arith.subf %126, %133 : vector<16x32xf32>
    %135 = arith.mulf %134, %134 : vector<16x32xf32>
    %cst_49 = arith.constant dense<0.000000e+00> : vector<16xf32>
    %136 = vector.multi_reduction <add>, %135, %cst_49 [1] : vector<16x32xf32> to vector<16xf32>
    %137 = vector.shape_cast %136 : vector<16xf32> to vector<16x1xf32>
    %cst_50 = arith.constant 3.200000e+01 : f32
    %138 = vector.broadcast %cst_50 : f32 to vector<16x1xf32>
    %139 = arith.divf %137, %138 : vector<16x1xf32>
    %cst_51 = arith.constant 9.99999974E-6 : f32
    %140 = vector.broadcast %cst_51 : f32 to vector<16x1xf32>
    %141 = arith.addf %139, %140 : vector<16x1xf32>
    %142 = math.rsqrt %141 : vector<16x1xf32>
    %143 = vector.broadcast %142 : vector<16x1xf32> to vector<16x32xf32>
    %144 = arith.mulf %134, %143 : vector<16x32xf32>
    %145 = vector.broadcast %127 : vector<1x32xf32> to vector<16x32xf32>
    %146 = arith.mulf %144, %145 : vector<16x32xf32>
    %147 = vector.broadcast %128 : vector<1x32xf32> to vector<16x32xf32>
    %148 = arith.addf %146, %147 : vector<16x32xf32>
    %c1 = arith.constant 1 : index
    %c0_52 = arith.constant 0 : index
    %c0_53 = arith.constant 0 : index
    %149 = vector.load %arg3[%c1, %c0_52, %c0_53] : memref<2x8x128xf32, #tpu.memory_space<vmem>>, vector<1x8x128xf32>
    %150 = vector.shape_cast %149 : vector<1x8x128xf32> to vector<8x128xf32>
    %c1_54 = arith.constant 1 : index
    %c0_55 = arith.constant 0 : index
    %c0_56 = arith.constant 0 : index
    %151 = vector.load %arg4[%c1_54, %c0_55, %c0_56] : memref<2x32x96xf32, #tpu.memory_space<vmem>>, vector<1x32x96xf32>
    %152 = vector.shape_cast %151 : vector<1x32x96xf32> to vector<32x96xf32>
    %cst_57 = arith.constant dense<0.000000e+00> : vector<16x96xf32>
    %153 = tpu.matmul %148, %152, %cst_57 {dimension_numbers = #tpu.dot_dimension_numbers<[1], [0], [0], [1], [0, 0, 1, 1], [], []>} : vector<16x32xf32>, vector<32x96xf32>, vector<16x96xf32> -> vector<16x96xf32>
    %154 = vector.extract_strided_slice %150 {offsets = [0, 0], sizes = [1, 96], strides = [1, 1]} : vector<8x128xf32> to vector<1x96xf32>
    %155 = vector.broadcast %154 : vector<1x96xf32> to vector<16x96xf32>
    %156 = arith.addf %153, %155 : vector<16x96xf32>
    %157 = vector.extract_strided_slice %156 {offsets = [0, 0], sizes = [16, 16], strides = [1, 1]} : vector<16x96xf32> to vector<16x16xf32>
    %158 = vector.extract_strided_slice %156 {offsets = [0, 32], sizes = [16, 16], strides = [1, 1]} : vector<16x96xf32> to vector<16x16xf32>
    %159 = vector.extract_strided_slice %156 {offsets = [0, 64], sizes = [16, 16], strides = [1, 1]} : vector<16x96xf32> to vector<16x16xf32>
    %160 = tpu.transpose %158, [1, 0] : vector<16x16xf32> -> vector<16x16xf32>
    %cst_58 = arith.constant dense<0.000000e+00> : vector<16x16xf32>
    %161 = tpu.matmul %157, %160, %cst_58 {dimension_numbers = #tpu.dot_dimension_numbers<[1], [0], [0], [1], [0, 0, 1, 1], [], []>} : vector<16x16xf32>, vector<16x16xf32>, vector<16x16xf32> -> vector<16x16xf32>
    %cst_59 = arith.constant 2.500000e-01 : f32
    %162 = vector.broadcast %cst_59 : f32 to vector<16x16xf32>
    %163 = arith.mulf %161, %162 : vector<16x16xf32>
    %164 = arith.addf %163, %24 : vector<16x16xf32>
    %cst_60 = arith.constant dense<0xFF800000> : vector<16xf32>
    %165 = vector.multi_reduction <maximumf>, %164, %cst_60 [1] : vector<16x16xf32> to vector<16xf32>
    %166 = vector.shape_cast %165 : vector<16xf32> to vector<16x1xf32>
    %167 = vector.broadcast %166 : vector<16x1xf32> to vector<16x16xf32>
    %168 = arith.subf %164, %167 : vector<16x16xf32>
    %169 = math.exp %168 : vector<16x16xf32>
    %cst_61 = arith.constant dense<0.000000e+00> : vector<16xf32>
    %170 = vector.multi_reduction <add>, %169, %cst_61 [1] : vector<16x16xf32> to vector<16xf32>
    %171 = vector.shape_cast %170 : vector<16xf32> to vector<16x1xf32>
    %172 = tpu.reciprocal %171 {approx = true} : vector<16x1xf32> -> vector<16x1xf32>
    %173 = vector.broadcast %172 : vector<16x1xf32> to vector<16x16xf32>
    %174 = arith.mulf %169, %173 : vector<16x16xf32>
    %cst_62 = arith.constant dense<0.000000e+00> : vector<16x16xf32>
    %175 = tpu.matmul %174, %159, %cst_62 {dimension_numbers = #tpu.dot_dimension_numbers<[1], [0], [0], [1], [0, 0, 1, 1], [], []>} : vector<16x16xf32>, vector<16x16xf32>, vector<16x16xf32> -> vector<16x16xf32>
    %176 = vector.extract_strided_slice %156 {offsets = [0, 16], sizes = [16, 16], strides = [1, 1]} : vector<16x96xf32> to vector<16x16xf32>
    %177 = vector.extract_strided_slice %156 {offsets = [0, 48], sizes = [16, 16], strides = [1, 1]} : vector<16x96xf32> to vector<16x16xf32>
    %178 = vector.extract_strided_slice %156 {offsets = [0, 80], sizes = [16, 16], strides = [1, 1]} : vector<16x96xf32> to vector<16x16xf32>
    %179 = tpu.transpose %177, [1, 0] : vector<16x16xf32> -> vector<16x16xf32>
    %cst_63 = arith.constant dense<0.000000e+00> : vector<16x16xf32>
    %180 = tpu.matmul %176, %179, %cst_63 {dimension_numbers = #tpu.dot_dimension_numbers<[1], [0], [0], [1], [0, 0, 1, 1], [], []>} : vector<16x16xf32>, vector<16x16xf32>, vector<16x16xf32> -> vector<16x16xf32>
    %cst_64 = arith.constant 2.500000e-01 : f32
    %181 = vector.broadcast %cst_64 : f32 to vector<16x16xf32>
    %182 = arith.mulf %180, %181 : vector<16x16xf32>
    %183 = arith.addf %182, %24 : vector<16x16xf32>
    %cst_65 = arith.constant dense<0xFF800000> : vector<16xf32>
    %184 = vector.multi_reduction <maximumf>, %183, %cst_65 [1] : vector<16x16xf32> to vector<16xf32>
    %185 = vector.shape_cast %184 : vector<16xf32> to vector<16x1xf32>
    %186 = vector.broadcast %185 : vector<16x1xf32> to vector<16x16xf32>
    %187 = arith.subf %183, %186 : vector<16x16xf32>
    %188 = math.exp %187 : vector<16x16xf32>
    %cst_66 = arith.constant dense<0.000000e+00> : vector<16xf32>
    %189 = vector.multi_reduction <add>, %188, %cst_66 [1] : vector<16x16xf32> to vector<16xf32>
    %190 = vector.shape_cast %189 : vector<16xf32> to vector<16x1xf32>
    %191 = tpu.reciprocal %190 {approx = true} : vector<16x1xf32> -> vector<16x1xf32>
    %192 = vector.broadcast %191 : vector<16x1xf32> to vector<16x16xf32>
    %193 = arith.mulf %188, %192 : vector<16x16xf32>
    %cst_67 = arith.constant dense<0.000000e+00> : vector<16x16xf32>
    %194 = tpu.matmul %193, %178, %cst_67 {dimension_numbers = #tpu.dot_dimension_numbers<[1], [0], [0], [1], [0, 0, 1, 1], [], []>} : vector<16x16xf32>, vector<16x16xf32>, vector<16x16xf32> -> vector<16x16xf32>
    %195 = tpu.concatenate %175, %194 in 1 : vector<16x16xf32>, vector<16x16xf32> -> vector<16x32xf32>
    %c1_68 = arith.constant 1 : index
    %c0_69 = arith.constant 0 : index
    %c0_70 = arith.constant 0 : index
    %196 = vector.load %arg5[%c1_68, %c0_69, %c0_70] : memref<2x32x32xf32, #tpu.memory_space<vmem>>, vector<1x32x32xf32>
    %197 = vector.shape_cast %196 : vector<1x32x32xf32> to vector<32x32xf32>
    %cst_71 = arith.constant dense<0.000000e+00> : vector<16x32xf32>
    %198 = tpu.matmul %195, %197, %cst_71 {dimension_numbers = #tpu.dot_dimension_numbers<[1], [0], [0], [1], [0, 0, 1, 1], [], []>} : vector<16x32xf32>, vector<32x32xf32>, vector<16x32xf32> -> vector<16x32xf32>
    %199 = vector.extract_strided_slice %150 {offsets = [1, 0], sizes = [1, 32], strides = [1, 1]} : vector<8x128xf32> to vector<1x32xf32>
    %200 = vector.broadcast %199 : vector<1x32xf32> to vector<16x32xf32>
    %201 = arith.addf %198, %200 : vector<16x32xf32>
    %202 = arith.addf %148, %201 : vector<16x32xf32>
    %203 = vector.extract_strided_slice %150 {offsets = [2, 0], sizes = [1, 32], strides = [1, 1]} : vector<8x128xf32> to vector<1x32xf32>
    %204 = vector.extract_strided_slice %150 {offsets = [3, 0], sizes = [1, 32], strides = [1, 1]} : vector<8x128xf32> to vector<1x32xf32>
    %cst_72 = arith.constant dense<0.000000e+00> : vector<16xf32>
    %205 = vector.multi_reduction <add>, %202, %cst_72 [1] : vector<16x32xf32> to vector<16xf32>
    %206 = vector.shape_cast %205 : vector<16xf32> to vector<16x1xf32>
    %cst_73 = arith.constant 3.200000e+01 : f32
    %207 = vector.broadcast %cst_73 : f32 to vector<16x1xf32>
    %208 = arith.divf %206, %207 : vector<16x1xf32>
    %209 = vector.broadcast %208 : vector<16x1xf32> to vector<16x32xf32>
    %210 = arith.subf %202, %209 : vector<16x32xf32>
    %211 = arith.mulf %210, %210 : vector<16x32xf32>
    %cst_74 = arith.constant dense<0.000000e+00> : vector<16xf32>
    %212 = vector.multi_reduction <add>, %211, %cst_74 [1] : vector<16x32xf32> to vector<16xf32>
    %213 = vector.shape_cast %212 : vector<16xf32> to vector<16x1xf32>
    %cst_75 = arith.constant 3.200000e+01 : f32
    %214 = vector.broadcast %cst_75 : f32 to vector<16x1xf32>
    %215 = arith.divf %213, %214 : vector<16x1xf32>
    %cst_76 = arith.constant 9.99999974E-6 : f32
    %216 = vector.broadcast %cst_76 : f32 to vector<16x1xf32>
    %217 = arith.addf %215, %216 : vector<16x1xf32>
    %218 = math.rsqrt %217 : vector<16x1xf32>
    %219 = vector.broadcast %218 : vector<16x1xf32> to vector<16x32xf32>
    %220 = arith.mulf %210, %219 : vector<16x32xf32>
    %221 = vector.broadcast %203 : vector<1x32xf32> to vector<16x32xf32>
    %222 = arith.mulf %220, %221 : vector<16x32xf32>
    %223 = vector.broadcast %204 : vector<1x32xf32> to vector<16x32xf32>
    %224 = arith.addf %222, %223 : vector<16x32xf32>
    %c1_77 = arith.constant 1 : index
    %c0_78 = arith.constant 0 : index
    %c0_79 = arith.constant 0 : index
    %225 = vector.load %arg6[%c1_77, %c0_78, %c0_79] : memref<2x32x64xf32, #tpu.memory_space<vmem>>, vector<1x32x64xf32>
    %226 = vector.shape_cast %225 : vector<1x32x64xf32> to vector<32x64xf32>
    %cst_80 = arith.constant dense<0.000000e+00> : vector<16x64xf32>
    %227 = tpu.matmul %224, %226, %cst_80 {dimension_numbers = #tpu.dot_dimension_numbers<[1], [0], [0], [1], [0, 0, 1, 1], [], []>} : vector<16x32xf32>, vector<32x64xf32>, vector<16x64xf32> -> vector<16x64xf32>
    %228 = vector.extract_strided_slice %150 {offsets = [4, 0], sizes = [1, 64], strides = [1, 1]} : vector<8x128xf32> to vector<1x64xf32>
    %229 = vector.broadcast %228 : vector<1x64xf32> to vector<16x64xf32>
    %230 = arith.addf %227, %229 : vector<16x64xf32>
    %231 = arith.mulf %230, %230 : vector<16x64xf32>
    %232 = arith.mulf %230, %231 : vector<16x64xf32>
    %cst_81 = arith.constant 4.471500e-02 : f32
    %233 = vector.broadcast %cst_81 : f32 to vector<16x64xf32>
    %234 = arith.mulf %233, %232 : vector<16x64xf32>
    %235 = arith.addf %230, %234 : vector<16x64xf32>
    %cst_82 = arith.constant 0.797884583 : f32
    %236 = vector.broadcast %cst_82 : f32 to vector<16x64xf32>
    %237 = arith.mulf %236, %235 : vector<16x64xf32>
    %238 = math.tanh %237 : vector<16x64xf32>
    %cst_83 = arith.constant 1.000000e+00 : f32
    %239 = vector.broadcast %cst_83 : f32 to vector<16x64xf32>
    %240 = arith.addf %239, %238 : vector<16x64xf32>
    %cst_84 = arith.constant 5.000000e-01 : f32
    %241 = vector.broadcast %cst_84 : f32 to vector<16x64xf32>
    %242 = arith.mulf %241, %240 : vector<16x64xf32>
    %243 = arith.mulf %230, %242 : vector<16x64xf32>
    %c1_85 = arith.constant 1 : index
    %c0_86 = arith.constant 0 : index
    %c0_87 = arith.constant 0 : index
    %244 = vector.load %arg7[%c1_85, %c0_86, %c0_87] : memref<2x64x32xf32, #tpu.memory_space<vmem>>, vector<1x64x32xf32>
    %245 = vector.shape_cast %244 : vector<1x64x32xf32> to vector<64x32xf32>
    %cst_88 = arith.constant dense<0.000000e+00> : vector<16x32xf32>
    %246 = tpu.matmul %243, %245, %cst_88 {dimension_numbers = #tpu.dot_dimension_numbers<[1], [0], [0], [1], [0, 0, 1, 1], [], []>} : vector<16x64xf32>, vector<64x32xf32>, vector<16x32xf32> -> vector<16x32xf32>
    %247 = vector.extract_strided_slice %150 {offsets = [5, 0], sizes = [1, 32], strides = [1, 1]} : vector<8x128xf32> to vector<1x32xf32>
    %248 = vector.broadcast %247 : vector<1x32xf32> to vector<16x32xf32>
    %249 = arith.addf %246, %248 : vector<16x32xf32>
    %250 = arith.addf %224, %249 : vector<16x32xf32>
    %251 = vector.extract_strided_slice %150 {offsets = [6, 0], sizes = [1, 32], strides = [1, 1]} : vector<8x128xf32> to vector<1x32xf32>
    %252 = vector.extract_strided_slice %150 {offsets = [7, 0], sizes = [1, 32], strides = [1, 1]} : vector<8x128xf32> to vector<1x32xf32>
    %cst_89 = arith.constant dense<0.000000e+00> : vector<16xf32>
    %253 = vector.multi_reduction <add>, %250, %cst_89 [1] : vector<16x32xf32> to vector<16xf32>
    %254 = vector.shape_cast %253 : vector<16xf32> to vector<16x1xf32>
    %cst_90 = arith.constant 3.200000e+01 : f32
    %255 = vector.broadcast %cst_90 : f32 to vector<16x1xf32>
    %256 = arith.divf %254, %255 : vector<16x1xf32>
    %257 = vector.broadcast %256 : vector<16x1xf32> to vector<16x32xf32>
    %258 = arith.subf %250, %257 : vector<16x32xf32>
    %259 = arith.mulf %258, %258 : vector<16x32xf32>
    %cst_91 = arith.constant dense<0.000000e+00> : vector<16xf32>
    %260 = vector.multi_reduction <add>, %259, %cst_91 [1] : vector<16x32xf32> to vector<16xf32>
    %261 = vector.shape_cast %260 : vector<16xf32> to vector<16x1xf32>
    %cst_92 = arith.constant 3.200000e+01 : f32
    %262 = vector.broadcast %cst_92 : f32 to vector<16x1xf32>
    %263 = arith.divf %261, %262 : vector<16x1xf32>
    %cst_93 = arith.constant 9.99999974E-6 : f32
    %264 = vector.broadcast %cst_93 : f32 to vector<16x1xf32>
    %265 = arith.addf %263, %264 : vector<16x1xf32>
    %266 = math.rsqrt %265 : vector<16x1xf32>
    %267 = vector.broadcast %266 : vector<16x1xf32> to vector<16x32xf32>
    %268 = arith.mulf %258, %267 : vector<16x32xf32>
    %269 = vector.broadcast %251 : vector<1x32xf32> to vector<16x32xf32>
    %270 = arith.mulf %268, %269 : vector<16x32xf32>
    %271 = vector.broadcast %252 : vector<1x32xf32> to vector<16x32xf32>
    %272 = arith.addf %270, %271 : vector<16x32xf32>
    %c0_94 = arith.constant 0 : index
    %c0_95 = arith.constant 0 : index
    %273 = vector.load %arg2[%c0_94, %c0_95] : memref<16x32xf32, #tpu.memory_space<vmem>>, vector<16x32xf32>
    %274 = arith.addf %272, %273 : vector<16x32xf32>
    %275 = vector.extract_strided_slice %274 {offsets = [0, 0], sizes = [8, 32], strides = [1, 1]} : vector<16x32xf32> to vector<8x32xf32>
    %cst_96 = arith.constant dense<0xFF800000> : vector<32xf32>
    %276 = vector.multi_reduction <maximumf>, %275, %cst_96 [0] : vector<8x32xf32> to vector<32xf32>
    %277 = vector.shape_cast %276 : vector<32xf32> to vector<1x32xf32>
    %278 = vector.extract_strided_slice %274 {offsets = [8, 0], sizes = [8, 32], strides = [1, 1]} : vector<16x32xf32> to vector<8x32xf32>
    %cst_97 = arith.constant dense<0xFF800000> : vector<32xf32>
    %279 = vector.multi_reduction <maximumf>, %278, %cst_97 [0] : vector<8x32xf32> to vector<32xf32>
    %280 = vector.shape_cast %279 : vector<32xf32> to vector<1x32xf32>
    %281 = tpu.concatenate %277, %280 in 0 : vector<1x32xf32>, vector<1x32xf32> -> vector<2x32xf32>
    %282 = vector.extract_strided_slice %0 {offsets = [2, 0], sizes = [1, 32], strides = [1, 1]} : vector<20x512xf32> to vector<1x32xf32>
    %283 = vector.extract_strided_slice %0 {offsets = [3, 0], sizes = [1, 32], strides = [1, 1]} : vector<20x512xf32> to vector<1x32xf32>
    %cst_98 = arith.constant dense<0.000000e+00> : vector<2xf32>
    %284 = vector.multi_reduction <add>, %281, %cst_98 [1] : vector<2x32xf32> to vector<2xf32>
    %285 = vector.shape_cast %284 : vector<2xf32> to vector<2x1xf32>
    %cst_99 = arith.constant 3.200000e+01 : f32
    %286 = vector.broadcast %cst_99 : f32 to vector<2x1xf32>
    %287 = arith.divf %285, %286 : vector<2x1xf32>
    %288 = vector.broadcast %287 : vector<2x1xf32> to vector<2x32xf32>
    %289 = arith.subf %281, %288 : vector<2x32xf32>
    %290 = arith.mulf %289, %289 : vector<2x32xf32>
    %cst_100 = arith.constant dense<0.000000e+00> : vector<2xf32>
    %291 = vector.multi_reduction <add>, %290, %cst_100 [1] : vector<2x32xf32> to vector<2xf32>
    %292 = vector.shape_cast %291 : vector<2xf32> to vector<2x1xf32>
    %cst_101 = arith.constant 3.200000e+01 : f32
    %293 = vector.broadcast %cst_101 : f32 to vector<2x1xf32>
    %294 = arith.divf %292, %293 : vector<2x1xf32>
    %cst_102 = arith.constant 9.99999974E-6 : f32
    %295 = vector.broadcast %cst_102 : f32 to vector<2x1xf32>
    %296 = arith.addf %294, %295 : vector<2x1xf32>
    %297 = math.rsqrt %296 : vector<2x1xf32>
    %298 = vector.broadcast %297 : vector<2x1xf32> to vector<2x32xf32>
    %299 = arith.mulf %289, %298 : vector<2x32xf32>
    %300 = vector.broadcast %282 : vector<1x32xf32> to vector<2x32xf32>
    %301 = arith.mulf %299, %300 : vector<2x32xf32>
    %302 = vector.broadcast %283 : vector<1x32xf32> to vector<2x32xf32>
    %303 = arith.addf %301, %302 : vector<2x32xf32>
    %c0_103 = arith.constant 0 : index
    %c0_104 = arith.constant 0 : index
    %304 = vector.load %arg9[%c0_103, %c0_104] : memref<32x512xf32, #tpu.memory_space<vmem>>, vector<32x512xf32>
    %cst_105 = arith.constant dense<0.000000e+00> : vector<2x512xf32>
    %305 = tpu.matmul %303, %304, %cst_105 {dimension_numbers = #tpu.dot_dimension_numbers<[1], [0], [0], [1], [0, 0, 1, 1], [], []>} : vector<2x32xf32>, vector<32x512xf32>, vector<2x512xf32> -> vector<2x512xf32>
    %306 = vector.extract_strided_slice %0 {offsets = [4, 0], sizes = [1, 512], strides = [1, 1]} : vector<20x512xf32> to vector<1x512xf32>
    %307 = vector.broadcast %306 : vector<1x512xf32> to vector<2x512xf32>
    %308 = arith.addf %305, %307 : vector<2x512xf32>
    %309 = vector.extract_strided_slice %0 {offsets = [5, 0], sizes = [1, 512], strides = [1, 1]} : vector<20x512xf32> to vector<1x512xf32>
    %cst_106 = arith.constant 0.000000e+00 : f32
    %310 = vector.broadcast %cst_106 : f32 to vector<2x512xf32>
    %311 = arith.cmpf oge, %308, %310 : vector<2x512xf32>
    %312 = vector.broadcast %309 : vector<1x512xf32> to vector<2x512xf32>
    %313 = arith.mulf %312, %308 : vector<2x512xf32>
    %314 = arith.select %311, %308, %313 : vector<2x512xi1>, vector<2x512xf32>
    %315 = vector.extract_strided_slice %0 {offsets = [6, 0], sizes = [1, 512], strides = [1, 1]} : vector<20x512xf32> to vector<1x512xf32>
    %316 = vector.extract_strided_slice %0 {offsets = [7, 0], sizes = [1, 512], strides = [1, 1]} : vector<20x512xf32> to vector<1x512xf32>
    %cst_107 = arith.constant dense<0.000000e+00> : vector<2xf32>
    %317 = vector.multi_reduction <add>, %314, %cst_107 [1] : vector<2x512xf32> to vector<2xf32>
    %318 = vector.shape_cast %317 : vector<2xf32> to vector<2x1xf32>
    %cst_108 = arith.constant 5.120000e+02 : f32
    %319 = vector.broadcast %cst_108 : f32 to vector<2x1xf32>
    %320 = arith.divf %318, %319 : vector<2x1xf32>
    %321 = vector.broadcast %320 : vector<2x1xf32> to vector<2x512xf32>
    %322 = arith.subf %314, %321 : vector<2x512xf32>
    %323 = arith.mulf %322, %322 : vector<2x512xf32>
    %cst_109 = arith.constant dense<0.000000e+00> : vector<2xf32>
    %324 = vector.multi_reduction <add>, %323, %cst_109 [1] : vector<2x512xf32> to vector<2xf32>
    %325 = vector.shape_cast %324 : vector<2xf32> to vector<2x1xf32>
    %cst_110 = arith.constant 5.120000e+02 : f32
    %326 = vector.broadcast %cst_110 : f32 to vector<2x1xf32>
    %327 = arith.divf %325, %326 : vector<2x1xf32>
    %cst_111 = arith.constant 9.99999974E-6 : f32
    %328 = vector.broadcast %cst_111 : f32 to vector<2x1xf32>
    %329 = arith.addf %327, %328 : vector<2x1xf32>
    %330 = math.rsqrt %329 : vector<2x1xf32>
    %331 = vector.broadcast %330 : vector<2x1xf32> to vector<2x512xf32>
    %332 = arith.mulf %322, %331 : vector<2x512xf32>
    %333 = vector.broadcast %315 : vector<1x512xf32> to vector<2x512xf32>
    %334 = arith.mulf %332, %333 : vector<2x512xf32>
    %335 = vector.broadcast %316 : vector<1x512xf32> to vector<2x512xf32>
    %336 = arith.addf %334, %335 : vector<2x512xf32>
    %c0_112 = arith.constant 0 : index
    %c0_113 = arith.constant 0 : index
    %337 = vector.load %arg10[%c0_112, %c0_113] : memref<512x256xf32, #tpu.memory_space<vmem>>, vector<512x256xf32>
    %cst_114 = arith.constant dense<0.000000e+00> : vector<2x256xf32>
    %338 = tpu.matmul %336, %337, %cst_114 {dimension_numbers = #tpu.dot_dimension_numbers<[1], [0], [0], [1], [0, 0, 1, 1], [], []>} : vector<2x512xf32>, vector<512x256xf32>, vector<2x256xf32> -> vector<2x256xf32>
    %339 = vector.extract_strided_slice %0 {offsets = [8, 0], sizes = [1, 256], strides = [1, 1]} : vector<20x512xf32> to vector<1x256xf32>
    %340 = vector.broadcast %339 : vector<1x256xf32> to vector<2x256xf32>
    %341 = arith.addf %338, %340 : vector<2x256xf32>
    %342 = vector.extract_strided_slice %0 {offsets = [9, 0], sizes = [1, 256], strides = [1, 1]} : vector<20x512xf32> to vector<1x256xf32>
    %cst_115 = arith.constant 0.000000e+00 : f32
    %343 = vector.broadcast %cst_115 : f32 to vector<2x256xf32>
    %344 = arith.cmpf oge, %341, %343 : vector<2x256xf32>
    %345 = vector.broadcast %342 : vector<1x256xf32> to vector<2x256xf32>
    %346 = arith.mulf %345, %341 : vector<2x256xf32>
    %347 = arith.select %344, %341, %346 : vector<2x256xi1>, vector<2x256xf32>
    %348 = vector.extract_strided_slice %0 {offsets = [10, 0], sizes = [1, 256], strides = [1, 1]} : vector<20x512xf32> to vector<1x256xf32>
    %349 = vector.extract_strided_slice %0 {offsets = [11, 0], sizes = [1, 256], strides = [1, 1]} : vector<20x512xf32> to vector<1x256xf32>
    %cst_116 = arith.constant dense<0.000000e+00> : vector<2xf32>
    %350 = vector.multi_reduction <add>, %347, %cst_116 [1] : vector<2x256xf32> to vector<2xf32>
    %351 = vector.shape_cast %350 : vector<2xf32> to vector<2x1xf32>
    %cst_117 = arith.constant 2.560000e+02 : f32
    %352 = vector.broadcast %cst_117 : f32 to vector<2x1xf32>
    %353 = arith.divf %351, %352 : vector<2x1xf32>
    %354 = vector.broadcast %353 : vector<2x1xf32> to vector<2x256xf32>
    %355 = arith.subf %347, %354 : vector<2x256xf32>
    %356 = arith.mulf %355, %355 : vector<2x256xf32>
    %cst_118 = arith.constant dense<0.000000e+00> : vector<2xf32>
    %357 = vector.multi_reduction <add>, %356, %cst_118 [1] : vector<2x256xf32> to vector<2xf32>
    %358 = vector.shape_cast %357 : vector<2xf32> to vector<2x1xf32>
    %cst_119 = arith.constant 2.560000e+02 : f32
    %359 = vector.broadcast %cst_119 : f32 to vector<2x1xf32>
    %360 = arith.divf %358, %359 : vector<2x1xf32>
    %cst_120 = arith.constant 9.99999974E-6 : f32
    %361 = vector.broadcast %cst_120 : f32 to vector<2x1xf32>
    %362 = arith.addf %360, %361 : vector<2x1xf32>
    %363 = math.rsqrt %362 : vector<2x1xf32>
    %364 = vector.broadcast %363 : vector<2x1xf32> to vector<2x256xf32>
    %365 = arith.mulf %355, %364 : vector<2x256xf32>
    %366 = vector.broadcast %348 : vector<1x256xf32> to vector<2x256xf32>
    %367 = arith.mulf %365, %366 : vector<2x256xf32>
    %368 = vector.broadcast %349 : vector<1x256xf32> to vector<2x256xf32>
    %369 = arith.addf %367, %368 : vector<2x256xf32>
    %c0_121 = arith.constant 0 : index
    %c0_122 = arith.constant 0 : index
    %370 = vector.load %arg11[%c0_121, %c0_122] : memref<256x128xf32, #tpu.memory_space<vmem>>, vector<256x128xf32>
    %cst_123 = arith.constant dense<0.000000e+00> : vector<2x128xf32>
    %371 = tpu.matmul %369, %370, %cst_123 {dimension_numbers = #tpu.dot_dimension_numbers<[1], [0], [0], [1], [0, 0, 1, 1], [], []>} : vector<2x256xf32>, vector<256x128xf32>, vector<2x128xf32> -> vector<2x128xf32>
    %372 = vector.extract_strided_slice %0 {offsets = [12, 0], sizes = [1, 128], strides = [1, 1]} : vector<20x512xf32> to vector<1x128xf32>
    %373 = vector.broadcast %372 : vector<1x128xf32> to vector<2x128xf32>
    %374 = arith.addf %371, %373 : vector<2x128xf32>
    %375 = vector.extract_strided_slice %0 {offsets = [13, 0], sizes = [1, 128], strides = [1, 1]} : vector<20x512xf32> to vector<1x128xf32>
    %cst_124 = arith.constant 0.000000e+00 : f32
    %376 = vector.broadcast %cst_124 : f32 to vector<2x128xf32>
    %377 = arith.cmpf oge, %374, %376 : vector<2x128xf32>
    %378 = vector.broadcast %375 : vector<1x128xf32> to vector<2x128xf32>
    %379 = arith.mulf %378, %374 : vector<2x128xf32>
    %380 = arith.select %377, %374, %379 : vector<2x128xi1>, vector<2x128xf32>
    %381 = vector.extract_strided_slice %0 {offsets = [14, 0], sizes = [1, 128], strides = [1, 1]} : vector<20x512xf32> to vector<1x128xf32>
    %382 = vector.extract_strided_slice %0 {offsets = [15, 0], sizes = [1, 128], strides = [1, 1]} : vector<20x512xf32> to vector<1x128xf32>
    %cst_125 = arith.constant dense<0.000000e+00> : vector<2xf32>
    %383 = vector.multi_reduction <add>, %380, %cst_125 [1] : vector<2x128xf32> to vector<2xf32>
    %384 = vector.shape_cast %383 : vector<2xf32> to vector<2x1xf32>
    %cst_126 = arith.constant 1.280000e+02 : f32
    %385 = vector.broadcast %cst_126 : f32 to vector<2x1xf32>
    %386 = arith.divf %384, %385 : vector<2x1xf32>
    %387 = vector.broadcast %386 : vector<2x1xf32> to vector<2x128xf32>
    %388 = arith.subf %380, %387 : vector<2x128xf32>
    %389 = arith.mulf %388, %388 : vector<2x128xf32>
    %cst_127 = arith.constant dense<0.000000e+00> : vector<2xf32>
    %390 = vector.multi_reduction <add>, %389, %cst_127 [1] : vector<2x128xf32> to vector<2xf32>
    %391 = vector.shape_cast %390 : vector<2xf32> to vector<2x1xf32>
    %cst_128 = arith.constant 1.280000e+02 : f32
    %392 = vector.broadcast %cst_128 : f32 to vector<2x1xf32>
    %393 = arith.divf %391, %392 : vector<2x1xf32>
    %cst_129 = arith.constant 9.99999974E-6 : f32
    %394 = vector.broadcast %cst_129 : f32 to vector<2x1xf32>
    %395 = arith.addf %393, %394 : vector<2x1xf32>
    %396 = math.rsqrt %395 : vector<2x1xf32>
    %397 = vector.broadcast %396 : vector<2x1xf32> to vector<2x128xf32>
    %398 = arith.mulf %388, %397 : vector<2x128xf32>
    %399 = vector.broadcast %381 : vector<1x128xf32> to vector<2x128xf32>
    %400 = arith.mulf %398, %399 : vector<2x128xf32>
    %401 = vector.broadcast %382 : vector<1x128xf32> to vector<2x128xf32>
    %402 = arith.addf %400, %401 : vector<2x128xf32>
    %c0_130 = arith.constant 0 : index
    %c0_131 = arith.constant 0 : index
    %403 = vector.load %arg12[%c0_130, %c0_131] : memref<128x64xf32, #tpu.memory_space<vmem>>, vector<128x64xf32>
    %cst_132 = arith.constant dense<0.000000e+00> : vector<2x64xf32>
    %404 = tpu.matmul %402, %403, %cst_132 {dimension_numbers = #tpu.dot_dimension_numbers<[1], [0], [0], [1], [0, 0, 1, 1], [], []>} : vector<2x128xf32>, vector<128x64xf32>, vector<2x64xf32> -> vector<2x64xf32>
    %405 = vector.extract_strided_slice %0 {offsets = [16, 0], sizes = [1, 64], strides = [1, 1]} : vector<20x512xf32> to vector<1x64xf32>
    %406 = vector.broadcast %405 : vector<1x64xf32> to vector<2x64xf32>
    %407 = arith.addf %404, %406 : vector<2x64xf32>
    %408 = vector.extract_strided_slice %0 {offsets = [17, 0], sizes = [1, 64], strides = [1, 1]} : vector<20x512xf32> to vector<1x64xf32>
    %cst_133 = arith.constant 0.000000e+00 : f32
    %409 = vector.broadcast %cst_133 : f32 to vector<2x64xf32>
    %410 = arith.cmpf oge, %407, %409 : vector<2x64xf32>
    %411 = vector.broadcast %408 : vector<1x64xf32> to vector<2x64xf32>
    %412 = arith.mulf %411, %407 : vector<2x64xf32>
    %413 = arith.select %410, %407, %412 : vector<2x64xi1>, vector<2x64xf32>
    %414 = arith.mulf %413, %413 : vector<2x64xf32>
    %cst_134 = arith.constant dense<0.000000e+00> : vector<2xf32>
    %415 = vector.multi_reduction <add>, %414, %cst_134 [1] : vector<2x64xf32> to vector<2xf32>
    %416 = vector.shape_cast %415 : vector<2xf32> to vector<2x1xf32>
    %cst_135 = arith.constant 1.000000e-24 : f32
    %417 = vector.broadcast %cst_135 : f32 to vector<2x1xf32>
    %418 = arith.maximumf %416, %417 : vector<2x1xf32>
    %419 = math.rsqrt %418 : vector<2x1xf32>
    %420 = vector.broadcast %419 : vector<2x1xf32> to vector<2x64xf32>
    %421 = arith.mulf %413, %420 : vector<2x64xf32>
    %c0_136 = arith.constant 0 : index
    %c0_137 = arith.constant 0 : index
    %422 = vector.load %arg13[%c0_136, %c0_137] : memref<64x64xf32, #tpu.memory_space<vmem>>, vector<64x64xf32>
    %cst_138 = arith.constant dense<0.000000e+00> : vector<2x64xf32>
    %423 = tpu.matmul %421, %422, %cst_138 {dimension_numbers = #tpu.dot_dimension_numbers<[1], [0], [0], [1], [0, 0, 1, 1], [], []>} : vector<2x64xf32>, vector<64x64xf32>, vector<2x64xf32> -> vector<2x64xf32>
    %424 = vector.extract_strided_slice %0 {offsets = [18, 0], sizes = [1, 64], strides = [1, 1]} : vector<20x512xf32> to vector<1x64xf32>
    %425 = vector.broadcast %424 : vector<1x64xf32> to vector<2x64xf32>
    %426 = arith.addf %423, %425 : vector<2x64xf32>
    %427 = vector.extract_strided_slice %0 {offsets = [19, 0], sizes = [1, 64], strides = [1, 1]} : vector<20x512xf32> to vector<1x64xf32>
    %cst_139 = arith.constant 0.000000e+00 : f32
    %428 = vector.broadcast %cst_139 : f32 to vector<2x64xf32>
    %429 = arith.cmpf oge, %426, %428 : vector<2x64xf32>
    %430 = vector.broadcast %427 : vector<1x64xf32> to vector<2x64xf32>
    %431 = arith.mulf %430, %426 : vector<2x64xf32>
    %432 = arith.select %429, %426, %431 : vector<2x64xi1>, vector<2x64xf32>
    %433 = arith.mulf %432, %432 : vector<2x64xf32>
    %cst_140 = arith.constant dense<0.000000e+00> : vector<2xf32>
    %434 = vector.multi_reduction <add>, %433, %cst_140 [1] : vector<2x64xf32> to vector<2xf32>
    %435 = vector.shape_cast %434 : vector<2xf32> to vector<2x1xf32>
    %cst_141 = arith.constant 1.000000e-24 : f32
    %436 = vector.broadcast %cst_141 : f32 to vector<2x1xf32>
    %437 = arith.maximumf %435, %436 : vector<2x1xf32>
    %438 = math.rsqrt %437 : vector<2x1xf32>
    %439 = vector.broadcast %438 : vector<2x1xf32> to vector<2x64xf32>
    %440 = arith.mulf %432, %439 : vector<2x64xf32>
    %441 = tpu.concatenate %421, %440 in 1 : vector<2x64xf32>, vector<2x64xf32> -> vector<2x128xf32>
    %c0_142 = arith.constant 0 : index
    %c0_143 = arith.constant 0 : index
    %442 = vector.load %arg14[%c0_142, %c0_143] : memref<2x128xf32, #tpu.memory_space<vmem>>, vector<2x128xf32>
    tpu.vector_store %arg14[%c0_142, %c0_143], %441 {strides = array<i32>} : memref<2x128xf32, #tpu.memory_space<vmem>>, vector<2x128xf32>,
    return
  }
}

</mosaic_0001>

<bundles_post_ra>
// kernel: bert_large_dssm_forward.1
= control target key start
LH: loop header
LB: loop body
LE: loop exit
PB: predicated region body
PF: predicated region fallthrough
CT: control target
= control target key end

     0   :  { %19 = vsyncpa [#allocation3], 0  ;;  %s4716_s0 = inlined_call_operand.vmem [shape: f32[16,32], index: 0, kind: input, shape index: {}]   ;;  %s4717_s1 = inlined_call_operand.vmem [shape: f32[16,16], index: 1, kind: input, shape index: {}]   ;;  %s4718_s2 = inlined_call_operand.vmem [shape: f32[16,32], index: 2, kind: input, shape index: {}]   ;;  %s4719_s3 = inlined_call_operand.hbm [shape: f32[2,8,128], index: 3, kind: input, shape index: {}]   ;;  %s4720_s4 = inlined_call_operand.hbm [shape: f32[2,32,96], index: 4, kind: input, shape index: {}]   ;;  %s4721_s5 = inlined_call_operand.hbm [shape: f32[2,32,32], index: 5, kind: input, shape index: {}]   ;;  %s4722_s6 = inlined_call_operand.hbm [shape: f32[2,32,64], index: 6, kind: input, shape index: {}]   ;;  %s4723_s7 = inlined_call_operand.vmem [shape: f32[2,64,32], index: 7, kind: input, shape index: {}]   ;;  %s4724_s8 = inlined_call_operand.hbm [shape: f32[20,512], index: 8, kind: input, shape index: {}]   ;;  %s4725_s9 = inlined_call_operand.hbm [shape: f32[32,512], index: 9, kind: input, shape index: {}]   ;;  %s4726_s10 = inlined_call_operand.vmem [shape: f32[512,256], index: 10, kind: input, shape index: {}]   ;;  %s4727_s11 = inlined_call_operand.hbm [shape: f32[256,128], index: 11, kind: input, shape index: {}]   ;;  %s4728_s12 = inlined_call_operand.vmem [shape: f32[128,64], index: 12, kind: input, shape index: {}]   ;;  %s4729_s13 = inlined_call_operand.hbm [shape: f32[64,64], index: 13, kind: input, shape index: {}]   ;;  %s4730_s14 = inlined_call_operand.vmem [shape: f32[2,128], index: 14, kind: output, shape index: {}]  }
   0x1   :  { %20 = vsyncpa [#allocation5], 0 }
   0x2   :  { %21 = vsyncpa [#allocation8], 0 }
   0x3   :  { %22 = vsyncpa [#allocation11], 0 }
   0x4   :  { %23 = vsyncpa [#allocation14], 0  ;;  %s3655_s29 = smov [#allocation4]   ;;  %s3656_s15 = smov [#allocation7]  }
   0x5   :  { %s47_s30 = sshll.u32 %s3655_s29, 4  ;;  %s71_s16 = sshll.u32 %s3656_s15, 4  ;;  %s48_s30 = int_to_ptr.vmem [resolvable:$true] %s47_s30  ;;  %s72_s16 = int_to_ptr.vmem [resolvable:$true] %s71_s16 }
   0x6   :  { %s3493_s17 = scalar_lea.vmem %s48_s30, 1024  ;;  %p3498_p1 = scmp.lt.s32.totalorder %s48_s30, %s48_s30 }
   0x7   :  { %p3494_p0 = scmp.ne.s32.totalorder %s48_s30, %s3493_s17  ;;  %p3499_p2 = scmp.lt.s32.totalorder %s3493_s17, %s3493_s17 }
   0x9   :  { %p3500_p3 = por %p3499_p2, %p3498_p1 }
   0xb   :  { %p3501_p4 = pnand %p3500_p3, %p3494_p0 }
   0xd   :  { %3504 = shalt.err (!%p3501_p4)
}
   0xe   :  { %s3657_s18 = smov 128   ;;  %s3658_s19 = smov 8  }
   0xf   :  { %53 = dma.hbm_to_vmem [thread:$0]  %s4720_s4, 1024, %s48_s30, [#allocation5], %s3657_s18, %s3657_s18, %s3658_s19  }
  0x10   :  { %s3513_s22 = scalar_lea.vmem %s72_s16, 1024  ;;  %p3518_p6 = scmp.lt.s32.totalorder %s72_s16, %s72_s16 }
  0x11   :  { %p3514_p5 = scmp.ne.s32.totalorder %s72_s16, %s3513_s22  ;;  %p3519_p7 = scmp.lt.s32.totalorder %s3513_s22, %s3513_s22 }
  0x13   :  { %p3520_p8 = por %p3519_p7, %p3518_p6 }
  0x15   :  { %p3521_p9 = pnand %p3520_p8, %p3514_p5 }
  0x17   :  { %3524 = shalt.err (!%p3521_p9)
}
  0x18   :  { %77 = dma.hbm_to_vmem [thread:$0]  %s4722_s6, 1024, %s72_s16, [#allocation8], %s3657_s18, %s3657_s18, %s3658_s19  }
  0x19   :  { %s3659_s25 = smov [#allocation10]   ;;  %s3660_s27 = smov [#allocation2]  }
  0x1a   :  { %s97_s26 = sshll.u32 %s3659_s25, 4  ;;  %s35_s28 = sshll.u32 %s3660_s27, 4  ;;  %s98_s26 = int_to_ptr.vmem [resolvable:$true] %s97_s26  ;;  %s36_s28 = int_to_ptr.vmem [resolvable:$true] %s35_s28 }
  0x1b   :  { %s3533_s4 = scalar_lea.vmem %s98_s26, 2048  ;;  %p3538_p11 = scmp.lt.s32.totalorder %s98_s26, %s98_s26 }
  0x1c   :  { %p3534_p10 = scmp.ne.s32.totalorder %s98_s26, %s3533_s4  ;;  %p3539_p12 = scmp.lt.s32.totalorder %s3533_s4, %s3533_s4 }
  0x1e   :  { %p3540_p13 = por %p3539_p12, %p3538_p11 }
  0x20   :  { %p3541_p0 = pnand %p3540_p13, %p3534_p10 }
  0x22   :  { %3544 = shalt.err (!%p3541_p0)
}
  0x23   :  { %s3661_s29 = smov 512   ;;  %s3662_s30 = smov 32  }
  0x24   :  { %103 = dma.hbm_to_vmem [thread:$0]  %s4725_s9, 2048, %s98_s26, [#allocation11], %s3661_s29, %s3661_s29, %s3662_s30  }
  0x25   :  { %s3553_s16 = scalar_lea.vmem %s36_s28, 256  ;;  %p3558_p2 = scmp.lt.s32.totalorder %s36_s28, %s36_s28 }
  0x26   :  { %p3554_p1 = scmp.ne.s32.totalorder %s36_s28, %s3553_s16  ;;  %p3559_p3 = scmp.lt.s32.totalorder %s3553_s16, %s3553_s16 }
  0x28   :  { %p3560_p4 = por %p3559_p3, %p3558_p2 }
  0x2a   :  { %p3561_p5 = pnand %p3560_p4, %p3554_p1 }
  0x2c   :  { %3564 = shalt.err (!%p3561_p5)
}
  0x2d   :  { %41 = dma.hbm_to_vmem [thread:$0]  %s4719_s3, 256, %s36_s28, [#allocation3], %s3657_s18, %s3657_s18, %s3658_s19  }
  0x2e   :  { %s3663_s21 = smov [#allocation6]   ;;  %s3664_s23 = smov [#allocation9]  }
  0x2f   :  { %s59_s22 = sshll.u32 %s3663_s21, 4  ;;  %s85_s24 = sshll.u32 %s3664_s23, 4  ;;  %s60_s22 = int_to_ptr.vmem [resolvable:$true] %s59_s22  ;;  %s86_s24 = int_to_ptr.vmem [resolvable:$true] %s85_s24 }
  0x30   :  { %s3573_s9 = scalar_lea.vmem %s60_s22, 1024  ;;  %p3578_p7 = scmp.lt.s32.totalorder %s60_s22, %s60_s22 }
  0x31   :  { %p3574_p6 = scmp.ne.s32.totalorder %s60_s22, %s3573_s9  ;;  %p3579_p8 = scmp.lt.s32.totalorder %s3573_s9, %s3573_s9 }
  0x33   :  { %p3580_p9 = por %p3579_p8, %p3578_p7 }
  0x35   :  { %p3581_p10 = pnand %p3580_p9, %p3574_p6 }
  0x37   :  { %3584 = shalt.err (!%p3581_p10)
}
  0x38   :  { %65 = dma.hbm_to_vmem [thread:$0]  %s4721_s5, 1024, %s60_s22, [#allocation5], %s3657_s18, %s3657_s18, %s3658_s19  }
  0x39   :  { %s3593_s3 = scalar_lea.vmem %s86_s24, 1536  ;;  %p3598_p12 = scmp.lt.s32.totalorder %s86_s24, %s86_s24 }
  0x3a   :  { %p3594_p11 = scmp.ne.s32.totalorder %s86_s24, %s3593_s3  ;;  %p3599_p13 = scmp.lt.s32.totalorder %s3593_s3, %s3593_s3 }
  0x3c   :  { %p3600_p0 = por %p3599_p13, %p3598_p12 }
  0x3e   :  { %p3601_p1 = pnand %p3600_p0, %p3594_p11 }
  0x40   :  { %3604 = shalt.err (!%p3601_p1)
}
  0x41   :  { %91 = dma.hbm_to_vmem [thread:$0]  %s4724_s8, 1536, %s86_s24, [#allocation8], %s3661_s29, %s3661_s29, %s3662_s30  }
  0x42   :  { %s3665_s4 = smov [#allocation12]   ;;  %s3666_s6 = smov [#allocation13]  }
  0x43   :  { %s111_s15 = sshll.u32 %s3665_s4, 4  ;;  %s125_s16 = sshll.u32 %s3666_s6, 4  ;;  %s112_s15 = int_to_ptr.vmem [resolvable:$true] %s111_s15  ;;  %s126_s16 = int_to_ptr.vmem [resolvable:$true] %s125_s16 }
  0x44   :  { %s3613_s5 = scalar_lea.vmem %s112_s15, 4096  ;;  %p3618_p3 = scmp.lt.s32.totalorder %s112_s15, %s112_s15 }
  0x45   :  { %p3614_p2 = scmp.ne.s32.totalorder %s112_s15, %s3613_s5  ;;  %p3619_p4 = scmp.lt.s32.totalorder %s3613_s5, %s3613_s5 }
  0x47   :  { %p3620_p5 = por %p3619_p4, %p3618_p3 }
  0x49   :  { %p3621_p6 = pnand %p3620_p5, %p3614_p2 }
  0x4b   :  { %3624 = shalt.err (!%p3621_p6)
}
  0x4c   :  { %117 = dma.hbm_to_vmem [thread:$0]  %s4727_s11, 4096, %s112_s15, [#allocation11], %s3657_s18, %s3657_s18, %s3658_s19  }
  0x4d   :  { %s3633_s8 = scalar_lea.vmem %s126_s16, 1024  ;;  %p3638_p8 = scmp.lt.s32.totalorder %s126_s16, %s126_s16 }
  0x4e   :  { %p3634_p7 = scmp.ne.s32.totalorder %s126_s16, %s3633_s8  ;;  %p3639_p9 = scmp.lt.s32.totalorder %s3633_s8, %s3633_s8 }
  0x50   :  { %p3640_p10 = por %p3639_p9, %p3638_p8 }
  0x52   :  { %p3641_p11 = pnand %p3640_p10, %p3634_p7 }
  0x54   :  { %3644 = shalt.err (!%p3641_p11)
}
  0x55   :  { %131 = dma.hbm_to_vmem [thread:$0]  %s4729_s13, 1024, %s126_s16, [#allocation14], %s3657_s18, %s3657_s18, %s3658_s19  }
  0x56   :  { %3645 = dma.done.wait [#allocation3], 256  }
  0x57   :  { %3646 = vsyncadd [#allocation3], 4294967040 }
  0x58   :  { %3647 = dma.done.wait [#allocation5], 2048  }
  0x59   :  { %3648 = vsyncadd [#allocation5], 4294965248 }
  0x5a   :  { %3649 = dma.done.wait [#allocation8], 2560  }
  0x5b   :  { %3650 = vsyncadd [#allocation8], 4294964736 }
  0x5c   :  { %3651 = dma.done.wait [#allocation11], 6144  }
  0x5d   :  { %3652 = vsyncadd [#allocation11], 4294961152 }
  0x5e   :  { %3653 = dma.done.wait [#allocation14], 1024  }
  0x5f   :  { %3654 = vsyncadd [#allocation14], 4294966272  ;;  %vm165_vm0 = vcmask 261120   ;;  %v163_v0 = vld [vmem:[%s4716_s0] sm:$0xff]  ;;  %v164_v1 = vld [vmem:[%s4716_s0 + $0x8] sm:$0xff]  ;;  %v193_v23 = vlaneseq  ;;  %vm303_vm1 = vcmask 130048  }
  0x60   :  { %v166_v2 = vsel %vm165_vm0, %v163_v0, 0.0  ;;  %v169_v3 = vsel %vm165_vm0, %v164_v1, 0.0  ;;  %v211_v14 = vld [vmem:[#allocation4 + $0x18] sm:$0xff]  ;;  %v210_v15 = vld [vmem:[#allocation4 + $0x10] sm:$0xff]  ;;  %v209_v16 = vld [vmem:[#allocation4 + $0x8] sm:$0xff]  ;;  %s3667_s0 = smov 96  }
  0x61   :  { %167 = vadd.xlane.f32.xlu0 %v166_v2  ;;  %3178 = vmatprep.subr.mxu1 %v211_v14  ;;  %v208_v17 = vld [vmem:[#allocation4] sm:$0xff]  ;;  %v3808_v25 = vshrl.u32 %v193_v23, 7  ;;  %v3826_v39 = vld [vmem:[#allocation2] sm:$0xff]  ;;  %s3668_s13 = smov 112   ;;  %s3669_s18 = smov 80   ;;  %v3863_v52 = vld [vmem:[%s4717_s1 + $0x8] sm:$0xff] }
  0x62   :  { %3179 = vmatpush3.msra.mxu1 %v211_v14  ;;  %v156_v27 = vld [vmem:[#allocation9] sm:$0xff]  ;;  %v3868_v55 = vld [vmem:[%s4717_s1] sm:$0xff]  ;;  %s3670_s1 = smov 64   ;;  %s3671_s26 = smov 48   ;;  %vm962_vm2 = vcmask 523264   ;;  %vm1982_vm3 = vcmask 1040384  }
  0x63   :  { %3180 = vmatprep.subr.mxu1 %v210_v15  ;;  %v3811_v26 = vsub.s32 0, %v3808_v25  ;;  %v3814_v28 = vsub.s32 1, %v3808_v25  ;;  %s3672_s3 = smov 16   ;;  %vm1984_vm4 = vcmask 254976   ;;  %vm2213_vm7 = vcmask 1041408  }
  0x64   :  { %3181 = vmatpush3.msra.mxu1 %v210_v15  ;;  %vm3674_vm13 = vmmov 0   ;;  %vm2857_vm15 = vcmask 517120  }
  0x65   :  { %170 = vadd.xlane.f32.xlu0 %v169_v3  ;;  %3182 = vmatprep.subr.mxu1 %v209_v16  ;;  %v196_v29 = vrot.slane %v156_v27, %v3811_v26  ;;  %v202_v32 = vrot.slane %v156_v27, %v3814_v28  ;;  %v215_v40 = vrot.slane %v3826_v39, %v3811_v26 }
  0x66   :  { %3183 = vmatpush3.msra.mxu1 %v209_v16 }
  0x67   :  { %3184 = vmatprep.subr.mxu1 %v208_v17 }
  0x68   :  { %3185 = vmatpush3.msra.mxu1 %v208_v17 }
  0xea   :  { %v168_v4 = vpop.xlane.xlu0 %167 }
  0xeb   :  { %v173_v5 = vmul.f32 0.03125, %v168_v4 }
  0xed   :  { %v175_v6 = vsub.f32 %v163_v0, %v173_v5 }
  0xee   :  { %v171_v7 = vpop.xlane.xlu0 %170 }
  0xef   :  { %v174_v8 = vmul.f32 0.03125, %v171_v7  ;;  %v177_v9 = vmul.f32 %v175_v6, %v175_v6 }
  0xf1   :  { %v176_v10 = vsub.f32 %v164_v1, %v174_v8  ;;  %v179_v11 = vsel %vm165_vm0, %v177_v9, 0.0 }
  0xf2   :  { %180 = vadd.xlane.f32.xlu1 %v179_v11 }
  0xf3   :  { %v178_v12 = vmul.f32 %v176_v10, %v176_v10 }
  0xf5   :  { %v182_v13 = vsel %vm165_vm0, %v178_v12, 0.0 }
  0xf6   :  { %183 = vadd.xlane.f32.xlu1 %v182_v13 }
 0x17b   :  { %v181_v18 = vpop.xlane.xlu1 %180 }
 0x17c   :  { %v185_v19 = vmul.f32 0.03125, %v181_v18 }
 0x17e   :  { %v187_v20 = vadd.f32 1e-05, %v185_v19 }
 0x17f   :  { %v184_v21 = vpop.xlane.xlu1 %183 }
 0x180   :  { %3412 = vrsqrt.f32 %v187_v20  ;;  %v186_v22 = vmul.f32 0.03125, %v184_v21 }
 0x182   :  { %v188_v24 = vadd.f32 1e-05, %v186_v22 }
 0x184   :  { %3414 = vrsqrt.f32 %v188_v24 }
 0x18d   :  { %v3413_v30 = vpop.eup %3412 }
 0x18e   :  { %v191_v31 = vmul.f32 %v3413_v30, %v175_v6 }
 0x190   :  { %v197_v33 = vmul.f32 %v196_v29, %v191_v31 }
 0x191   :  { %v3415_v34 = vpop.eup %3414 }
 0x192   :  { %v192_v35 = vmul.f32 %v3415_v34, %v176_v10  ;;  %v3818_v36 = vadd.f32 %v202_v32, %v197_v33 }
 0x194   :  { %v198_v37 = vmul.f32 %v196_v29, %v192_v35  ;;  %3186 = vmatprep.mubr.msk.f32.mxu1 %vm165_vm0, %v3818_v36 }
 0x196   :  { %v3822_v38 = vadd.f32 %v202_v32, %v198_v37 }
 0x198   :  { %3187 = vmatmul.mubr.msk.f32.vlgmr.msra.gmra.mxu1 %vm165_vm0, %v3822_v38 }
 0x258   :  { %v3188_v41 = vpop.f32.mrf.mxu1 }
 0x259   :  { %v3830_v42 = vadd.f32 %v3188_v41, %v215_v40 }
 0x25a   :  { %v288_v43 = vpop.f32.mrf.mxu1 }
 0x25b   :  { %v3832_v44 = vadd.f32 %v288_v43, %v215_v40  ;;  %301 = vrot.lane.b32.xlu0 %v3830_v42, %s3667_s0 }
 0x25d   :  { %299 = vrot.lane.b32.xlu1 %v3832_v44, %s3667_s0  ;;  %3193 = vmatprep.mubr.msk.f32.mxu1 %vm303_vm1, %v3832_v44 }
 0x25f   :  { %500 = vrot.lane.b32.xlu0 %v3832_v44, %s3668_s13 }
 0x261   :  { %506 = vrot.lane.b32.xlu1 %v3830_v42, %s3669_s18 }
 0x265   :  { %504 = vrot.lane.b32.xlu1 %v3832_v44, %s3669_s18 }
 0x269   :  { %502 = vrot.lane.b32.xlu1 %v3830_v42, %s3668_s13 }
 0x2cd   :  { %v302_v45 = vpop.permute.xlu0 %301 }
 0x2ce   :  { %3189 = vmatprep.subr.msk.mxu1 %vm303_vm1, %v302_v45 }
 0x2cf   :  { %3190 = vmatpush3.xpose.msk.msra.mxu1 %vm303_vm1, %v302_v45  ;;  %v300_v46 = vpop.permute.xlu1 %299 }
 0x2d0   :  { %3191 = vmatprep.subr.msk.mxu1 %vm303_vm1, %v300_v46 }
 0x2d1   :  { %v501_v48 = vpop.permute.xlu0 %500 }
 0x2d3   :  { %3192 = vmatpush3.xpose.msk.msra.mxu1 %vm303_vm1, %v300_v46  ;;  %v507_v47 = vpop.permute.xlu1 %506 }
 0x2d4   :  { %3203 = vmatprep.subr.msk.mxu1 %vm303_vm1, %v507_v47 }
 0x2d6   :  { %3194 = vmatmul.mubr.msk.f32.vlgmr.msra.gmra.mxu1 %vm303_vm1, %v3830_v42 }
 0x2d7   :  { %v505_v49 = vpop.permute.xlu1 %504  ;;  %3204 = vmatpush3.xpose.msk.msra.mxu1 %vm303_vm1, %v507_v47  ;;  %3207 = vmatprep.mubr.msk.f32.mxu1 %vm303_vm1, %v501_v48  ;;  %v717_v47 = vld [vmem:[#allocation6 + $0x18] sm:$0xff]  ;;  %v716_v48 = vld [vmem:[#allocation6 + $0x10] sm:$0xff] }
 0x2d8   :  { %3205 = vmatprep.subr.msk.mxu1 %vm303_vm1, %v505_v49 }
 0x2db   :  { %3206 = vmatpush3.xpose.msk.msra.mxu1 %vm303_vm1, %v505_v49  ;;  %v503_v50 = vpop.permute.xlu1 %502  ;;  %v715_v49 = vld [vmem:[#allocation6 + $0x8] sm:$0xff] }
 0x2de   :  { %3208 = vmatmul.mubr.msk.f32.vlgmr.msra.gmra.mxu1 %vm303_vm1, %v503_v50  ;;  %v714_v50 = vld [vmem:[#allocation6] sm:$0xff] }
 0x396   :  { %v3195_v51 = vpop.f32.mrf.mxu1 }
 0x397   :  { %v388_v53 = vmul.f32 0.25, %v3195_v51 }
 0x398   :  { %v378_v54 = vpop.f32.mrf.mxu1 }
 0x399   :  { %v387_v56 = vmul.f32 0.25, %v378_v54  ;;  %v390_v57 = vadd.f32 %v388_v53, %v3863_v52 }
 0x39b   :  { %v394_v58 = vsel %vm303_vm1, %v390_v57, -inf  ;;  %v389_v59 = vadd.f32 %v387_v56, %v3868_v55 }
 0x39c   :  { %395 = vmax.xlane.f32.xlu1 %v394_v58 }
 0x39d   :  { %v391_v60 = vsel %vm303_vm1, %v389_v59, -inf }
 0x39e   :  { %v3209_v61 = vpop.f32.mrf.mxu1  ;;  %392 = vmax.xlane.f32.xlu0 %v391_v60 }
 0x39f   :  { %v592_v63 = vmul.f32 0.25, %v3209_v61  ;;  %v721_v61 = vrot.slane %v3826_v39, %v3814_v28 }
 0x3a0   :  { %v582_v62 = vpop.f32.mrf.mxu1 }
 0x3a1   :  { %v591_v0 = vmul.f32 0.25, %v582_v62  ;;  %v594_v3 = vadd.f32 %v592_v63, %v3863_v52 }
 0x3a3   :  { %v593_v1 = vadd.f32 %v591_v0, %v3868_v55  ;;  %v598_v4 = vsel %vm303_vm1, %v594_v3, -inf }
 0x3a5   :  { %v595_v2 = vsel %vm303_vm1, %v593_v1, -inf }
 0x3a6   :  { %596 = vmax.xlane.f32.xlu0 %v595_v2 }
 0x3aa   :  { %599 = vmax.xlane.f32.xlu0 %v598_v4 }
 0x425   :  { %v396_v5 = vpop.xlane.xlu1 %395 }
 0x426   :  { %v398_v6 = vsub.f32 %v390_v57, %v396_v5 }
 0x427   :  { %v393_v7 = vpop.xlane.xlu0 %392 }
 0x428   :  { %v401_v8 = vmul.f32 1.442695, %v398_v6  ;;  %v397_v9 = vsub.f32 %v389_v59, %v393_v7 }
 0x42a   :  { %3416 = vpow2.f32 %v401_v8  ;;  %v399_v10 = vmul.f32 1.442695, %v397_v9 }
 0x42c   :  { %3418 = vpow2.f32 %v399_v10 }
 0x42f   :  { %v597_v11 = vpop.xlane.xlu0 %596 }
 0x430   :  { %v601_v12 = vsub.f32 %v593_v1, %v597_v11 }
 0x432   :  { %v603_v13 = vmul.f32 1.442695, %v601_v12 }
 0x433   :  { %v600_v14 = vpop.xlane.xlu0 %599 }
 0x434   :  { %3420 = vpow2.f32 %v603_v13  ;;  %v602_v15 = vsub.f32 %v594_v3, %v600_v14 }
 0x436   :  { %v605_v16 = vmul.f32 1.442695, %v602_v15  ;;  %v846_v15 = vld [vmem:[#allocation7 + $0x18] sm:$0xff] }
 0x437   :  { %v3417_v17 = vpop.eup %3416  ;;  %3228 = vmatprep.subr.mxu1 %v846_v15 }
 0x438   :  { %3422 = vpow2.f32 %v605_v16  ;;  %v406_v18 = vsel %vm303_vm1, %v3417_v17, 0.0  ;;  %3229 = vmatpush3.msra.mxu1 %v846_v15  ;;  %v844_v16 = vld [vmem:[#allocation7 + $0x8] sm:$0xff] }
 0x439   :  { %v3419_v19 = vpop.eup %3418  ;;  %407 = vadd.xlane.f32.xlu1 %v406_v18 }
 0x43a   :  { %v403_v20 = vsel %vm303_vm1, %v3419_v19, 0.0 }
 0x43b   :  { %404 = vadd.xlane.f32.xlu0 %v403_v20 }
 0x441   :  { %v3421_v21 = vpop.eup %3420 }
 0x442   :  { %v607_v22 = vsel %vm303_vm1, %v3421_v21, 0.0 }
 0x443   :  { %608 = vadd.xlane.f32.xlu0 %v607_v22 }
 0x445   :  { %v3423_v23 = vpop.eup %3422 }
 0x446   :  { %v610_v24 = vsel %vm303_vm1, %v3423_v23, 0.0 }
 0x447   :  { %611 = vadd.xlane.f32.xlu1 %v610_v24  ;;  %v3909_v24 = vsub.s32 2, %v3808_v25 }
 0x458   :  { %413 = vrot.lane.b32.xlu1 %v3832_v44, %s3670_s1 }
 0x459   :  { %415 = vrot.lane.b32.xlu0 %v3830_v42, %s3670_s1 }
 0x45c   :  { %619 = vrot.lane.b32.xlu1 %v3830_v42, %s3671_s26 }
 0x460   :  { %617 = vrot.lane.b32.xlu1 %v3832_v44, %s3671_s26 }
 0x4c2   :  { %v408_v27 = vpop.xlane.xlu1 %407 }
 0x4c3   :  { %3424 = vrcp.f32 %v408_v27  ;;  %v3912_v27 = vsub.s32 3, %v3808_v25 }
 0x4c4   :  { %v405_v29 = vpop.xlane.xlu0 %404 }
 0x4c5   :  { %3426 = vrcp.f32 %v405_v29  ;;  %v834_v29 = vrot.slane %v3826_v39, %v3909_v24 }
 0x4cc   :  { %v609_v30 = vpop.xlane.xlu0 %608 }
 0x4cd   :  { %3428 = vrcp.f32 %v609_v30 }
 0x4d0   :  { %v612_v31 = vpop.xlane.xlu1 %611  ;;  %v416_v32 = vpop.permute.xlu0 %415 }
 0x4d1   :  { %v3425_v33 = vpop.eup %3424  ;;  %3430 = vrcp.f32 %v612_v31  ;;  %3196 = vmatprep.subr.mxu0 %v416_v32 }
 0x4d2   :  { %v3427_v34 = vpop.eup %3426  ;;  %3197 = vmatpush3.msra.mxu0 %v416_v32  ;;  %v412_v40 = vmul.f32 %v3425_v33, %v3417_v17  ;;  %v843_v17 = vld [vmem:[#allocation7] sm:$0xff]  ;;  %v840_v32 = vrot.slane %v3826_v39, %v3912_v27 }
 0x4d3   :  { %v411_v35 = vmul.f32 %v3427_v34, %v3419_v19 }
 0x4d4   :  { %v414_v37 = vpop.permute.xlu1 %413 }
 0x4d5   :  { %3198 = vmatprep.subr.mxu0 %v414_v37  ;;  %3200 = vmatprep.mubr.msk.f32.mxu0 %vm303_vm1, %v411_v35 }
 0x4d6   :  { %3199 = vmatpush3.msra.mxu0 %v414_v37 }
 0x4d7   :  { %3201 = vmatmul.mubr.msk.f32.vlgmr.msra.gmra.mxu0 %vm303_vm1, %v412_v40 }
 0x4d8   :  { %v620_v41 = vpop.permute.xlu1 %619 }
 0x4d9   :  { %3210 = vmatprep.subr.mxu0 %v620_v41 }
 0x4da   :  { %v3429_v42 = vpop.eup %3428  ;;  %3211 = vmatpush3.msra.mxu0 %v620_v41 }
 0x4db   :  { %v615_v43 = vmul.f32 %v3429_v42, %v3421_v21  ;;  %v957_v42 = vld [vmem:[%s4723_s7 + $0x38] sm:$0xff] }
 0x4dc   :  { %v618_v44 = vpop.permute.xlu1 %617 }
 0x4dd   :  { %3212 = vmatprep.subr.mxu0 %v618_v44  ;;  %3214 = vmatprep.mubr.msk.f32.mxu0 %vm303_vm1, %v615_v43  ;;  %v956_v43 = vld [vmem:[%s4723_s7 + $0x30] sm:$0xff] }
 0x4de   :  { %v3431_v45 = vpop.eup %3430  ;;  %3213 = vmatpush3.msra.mxu0 %v618_v44  ;;  %v955_v44 = vld [vmem:[%s4723_s7 + $0x28] sm:$0xff] }
 0x4df   :  { %v616_v46 = vmul.f32 %v3431_v45, %v3423_v23  ;;  %3217 = vmatprep.subr.mxu0 %v717_v47  ;;  %v954_v45 = vld [vmem:[%s4723_s7 + $0x20] sm:$0xff] }
 0x4e1   :  { %3215 = vmatmul.mubr.msk.f32.vlgmr.msra.gmra.mxu0 %vm303_vm1, %v616_v46  ;;  %v953_v46 = vld [vmem:[%s4723_s7 + $0x18] sm:$0xff] }
 0x4e2   :  { %3218 = vmatpush3.msra.mxu0 %v717_v47  ;;  %v952_v47 = vld [vmem:[%s4723_s7 + $0x10] sm:$0xff] }
 0x4e3   :  { %3219 = vmatprep.subr.mxu0 %v716_v48 }
 0x4e4   :  { %3220 = vmatpush3.msra.mxu0 %v716_v48  ;;  %v951_v48 = vld [vmem:[%s4723_s7 + $0x8] sm:$0xff] }
 0x4e5   :  { %3221 = vmatprep.subr.mxu0 %v715_v49 }
 0x4e6   :  { %3222 = vmatpush3.msra.mxu0 %v715_v49  ;;  %v950_v49 = vld [vmem:[%s4723_s7] sm:$0xff] }
 0x4e7   :  { %3223 = vmatprep.subr.mxu0 %v714_v50 }
 0x4e8   :  { %3224 = vmatpush3.msra.mxu0 %v714_v50  ;;  %v3948_v50 = vsub.s32 4, %v3808_v25 }
 0x4e9   :  { %3239 = vmatprep.subr.mxu0 %v957_v42 }
 0x597   :  { %v3202_v51 = vpop.f32.mrf.mxu0 }
 0x599   :  { %v491_v53 = vpop.f32.mrf.mxu0 }
 0x5a1   :  { %v3216_v54 = vpop.f32.mrf.mxu0 }
 0x5a2   :  { %708 = vrot.lane.b32.xlu1 %v3216_v54, %s3672_s3 }
 0x5a3   :  { %v695_v56 = vpop.f32.mrf.mxu0 }
 0x5a4   :  { %706 = vrot.lane.b32.xlu0 %v695_v56, %s3672_s3 }
 0x614   :  { %v709_v57 = vpop.permute.xlu1 %708 }
 0x615   :  { %v713_v60 = vsel %vm303_vm1, %v3202_v51, %v709_v57  ;;  %v850_v51 = vrot.slane %v3826_v39, %v3948_v50 }
 0x616   :  { %v707_v58 = vpop.permute.xlu0 %706 }
 0x617   :  { %v712_v59 = vsel %vm303_vm1, %v491_v53, %v707_v58 }
 0x618   :  { %3225 = vmatprep.mubr.msk.f32.mxu0 %vm165_vm0, %v712_v59 }
 0x619   :  { %3226 = vmatmul.mubr.msk.f32.vlgmr.msra.gmra.mxu0 %vm165_vm0, %v713_v60 }
 0x61a   :  { %3240 = vmatpush3.msra.mxu0 %v957_v42 }
 0x61b   :  { %3241 = vmatprep.subr.mxu0 %v956_v43 }
 0x61c   :  { %3242 = vmatpush3.msra.mxu0 %v956_v43 }
 0x61d   :  { %3243 = vmatprep.subr.mxu0 %v955_v44 }
 0x61e   :  { %3244 = vmatpush3.msra.mxu0 %v955_v44 }
 0x61f   :  { %3245 = vmatprep.subr.mxu0 %v954_v45 }
 0x620   :  { %3246 = vmatpush3.msra.mxu0 %v954_v45 }
 0x621   :  { %3247 = vmatprep.subr.mxu0 %v953_v46 }
 0x622   :  { %3248 = vmatpush3.msra.mxu0 %v953_v46 }
 0x623   :  { %3249 = vmatprep.subr.mxu0 %v952_v47 }
 0x624   :  { %3250 = vmatpush3.msra.mxu0 %v952_v47 }
 0x625   :  { %3251 = vmatprep.subr.mxu0 %v951_v48 }
 0x626   :  { %3252 = vmatpush3.msra.mxu0 %v951_v48  ;;  %v3965_v48 = vsub.s32 6, %v3808_v25 }
 0x627   :  { %3253 = vmatprep.subr.mxu0 %v950_v49 }
 0x628   :  { %3254 = vmatpush3.msra.mxu0 %v950_v49 }
 0x6d9   :  { %v3227_v62 = vpop.f32.mrf.mxu0 }
 0x6da   :  { %v800_v63 = vadd.f32 %v3227_v62, %v721_v61 }
 0x6db   :  { %v794_v0 = vpop.f32.mrf.mxu0 }
 0x6dc   :  { %v795_v1 = vadd.f32 %v794_v0, %v721_v61  ;;  %v804_v2 = vadd.f32 %v800_v63, %v3822_v38 }
 0x6de   :  { %v808_v3 = vsel %vm165_vm0, %v804_v2, 0.0  ;;  %v803_v4 = vadd.f32 %v795_v1, %v3818_v36  ;;  %v845_v36 = vld [vmem:[#allocation7 + $0x10] sm:$0xff] }
 0x6df   :  { %809 = vadd.xlane.f32.xlu1 %v808_v3  ;;  %3230 = vmatprep.subr.mxu1 %v845_v36 }
 0x6e0   :  { %v805_v5 = vsel %vm165_vm0, %v803_v4, 0.0  ;;  %3231 = vmatpush3.msra.mxu1 %v845_v36 }
 0x6e1   :  { %806 = vadd.xlane.f32.xlu0 %v805_v5  ;;  %3232 = vmatprep.subr.mxu1 %v844_v16 }
 0x6e2   :  { %3233 = vmatpush3.msra.mxu1 %v844_v16 }
 0x6e3   :  { %3234 = vmatprep.subr.mxu1 %v843_v17 }
 0x6e4   :  { %3235 = vmatpush3.msra.mxu1 %v843_v17 }
 0x768   :  { %v810_v6 = vpop.xlane.xlu1 %809 }
 0x769   :  { %v812_v7 = vmul.f32 0.03125, %v810_v6 }
 0x76a   :  { %v807_v8 = vpop.xlane.xlu0 %806 }
 0x76b   :  { %v811_v9 = vmul.f32 0.03125, %v807_v8  ;;  %v814_v10 = vsub.f32 %v804_v2, %v812_v7 }
 0x76d   :  { %v813_v11 = vsub.f32 %v803_v4, %v811_v9  ;;  %v816_v14 = vmul.f32 %v814_v10, %v814_v10 }
 0x76f   :  { %v815_v12 = vmul.f32 %v813_v11, %v813_v11  ;;  %v820_v38 = vsel %vm165_vm0, %v816_v14, 0.0 }
 0x771   :  { %v817_v13 = vsel %vm165_vm0, %v815_v12, 0.0  ;;  %v3955_v12 = vsub.s32 5, %v3808_v25 }
 0x772   :  { %818 = vadd.xlane.f32.xlu0 %v817_v13 }
 0x773   :  { %v961_v13 = vrot.slane %v3826_v39, %v3955_v12 }
 0x776   :  { %821 = vadd.xlane.f32.xlu0 %v820_v38 }
 0x7fb   :  { %v819_v18 = vpop.xlane.xlu0 %818 }
 0x7fc   :  { %v823_v19 = vmul.f32 0.03125, %v819_v18 }
 0x7fe   :  { %v825_v20 = vadd.f32 1e-05, %v823_v19 }
 0x7ff   :  { %v822_v21 = vpop.xlane.xlu0 %821 }
 0x800   :  { %3432 = vrsqrt.f32 %v825_v20  ;;  %v824_v22 = vmul.f32 0.03125, %v822_v21 }
 0x802   :  { %v826_v23 = vadd.f32 1e-05, %v824_v22 }
 0x804   :  { %3434 = vrsqrt.f32 %v826_v23 }
 0x80d   :  { %v3433_v30 = vpop.eup %3432 }
 0x80e   :  { %v829_v31 = vmul.f32 %v3433_v30, %v813_v11 }
 0x810   :  { %v835_v33 = vmul.f32 %v834_v29, %v829_v31 }
 0x811   :  { %v3435_v34 = vpop.eup %3434 }
 0x812   :  { %v830_v35 = vmul.f32 %v3435_v34, %v814_v10  ;;  %v3918_v37 = vadd.f32 %v840_v32, %v835_v33 }
 0x814   :  { %v836_v40 = vmul.f32 %v834_v29, %v830_v35  ;;  %3236 = vmatprep.mubr.msk.f32.mxu1 %vm165_vm0, %v3918_v37  ;;  %v1090_v35 = vld [vmem:[#allocation4 + $0x38] sm:$0xff] }
 0x815   :  { %3258 = vmatprep.subr.mxu1 %v1090_v35 }
 0x816   :  { %v842_v41 = vadd.f32 %v840_v32, %v836_v40  ;;  %v1088_v40 = vld [vmem:[#allocation4 + $0x28] sm:$0xff] }
 0x818   :  { %3237 = vmatmul.mubr.msk.f32.vlgmr.msra.gmra.mxu1 %vm165_vm0, %v842_v41 }
 0x819   :  { %3259 = vmatpush3.msra.mxu1 %v1090_v35 }
 0x8d8   :  { %v3238_v53 = vpop.f32.mrf.mxu1 }
 0x8d9   :  { %v929_v54 = vadd.f32 %v3238_v53, %v850_v51  ;;  %v3970_v53 = vsub.s32 7, %v3808_v25  ;;  %v3982_v25 = vld [vmem:[#allocation2 + $0x8] sm:$0xff] }
 0x8da   :  { %v923_v56 = vpop.f32.mrf.mxu1 }
 0x8db   :  { %v933_v57 = vmul.f32 %v929_v54, %v929_v54  ;;  %v924_v58 = vadd.f32 %v923_v56, %v850_v51  ;;  %v1075_v51 = vrot.slane %v3826_v39, %v3965_v48 }
 0x8dd   :  { %v935_v59 = vmul.f32 %v933_v57, %v929_v54  ;;  %v932_v60 = vmul.f32 %v924_v58, %v924_v58 }
 0x8df   :  { %v937_v61 = vmul.f32 0.044715, %v935_v59  ;;  %v934_v62 = vmul.f32 %v932_v60, %v924_v58  ;;  %v1081_v59 = vrot.slane %v3826_v39, %v3970_v53 }
 0x8e1   :  { %v939_v63 = vadd.f32 %v937_v61, %v929_v54  ;;  %v936_v0 = vmul.f32 0.044715, %v934_v62 }
 0x8e3   :  { %v941_v1 = vmul.f32 0.7978846, %v939_v63  ;;  %v938_v2 = vadd.f32 %v936_v0, %v924_v58  ;;  %v1094_v63 = vrot.slane %v3982_v25, %v3811_v26 }
 0x8e5   :  { %3436 = vtanh.f32 %v941_v1  ;;  %v940_v3 = vmul.f32 0.7978846, %v938_v2 }
 0x8e7   :  { %3438 = vtanh.f32 %v940_v3 }
 0x8f2   :  { %v3437_v4 = vpop.eup %3436 }
 0x8f3   :  { %v945_v5 = vadd.f32 1.0, %v3437_v4 }
 0x8f4   :  { %v3439_v6 = vpop.eup %3438 }
 0x8f5   :  { %v944_v7 = vadd.f32 1.0, %v3439_v6  ;;  %v947_v8 = vmul.f32 0.5, %v945_v5 }
 0x8f7   :  { %v946_v9 = vmul.f32 0.5, %v944_v7  ;;  %v949_v11 = vmul.f32 %v947_v8, %v929_v54 }
 0x8f9   :  { %v948_v10 = vmul.f32 %v946_v9, %v924_v58 }
 0x8fb   :  { %3255 = vmatprep.mubr.msk.f32.mxu0 %vm962_vm2, %v948_v10 }
 0x8fc   :  { %3256 = vmatmul.mubr.msk.f32.vlgmr.msra.gmra.mxu0 %vm962_vm2, %v949_v11 }
 0x9bc   :  { %v3257_v14 = vpop.f32.mrf.mxu0 }
 0x9bd   :  { %v1041_v38 = vadd.f32 %v3257_v14, %v961_v13 }
 0x9be   :  { %v1035_v15 = vpop.f32.mrf.mxu0 }
 0x9bf   :  { %v1036_v36 = vadd.f32 %v1035_v15, %v961_v13  ;;  %v1045_v16 = vadd.f32 %v1041_v38, %v842_v41  ;;  %v1087_v41 = vld [vmem:[#allocation4 + $0x20] sm:$0xff] }
 0x9c1   :  { %v1049_v17 = vsel %vm165_vm0, %v1045_v16, 0.0  ;;  %v1044_v18 = vadd.f32 %v1036_v36, %v3918_v37  ;;  %v1089_v37 = vld [vmem:[#allocation4 + $0x30] sm:$0xff] }
 0x9c2   :  { %1050 = vadd.xlane.f32.xlu1 %v1049_v17  ;;  %3260 = vmatprep.subr.mxu1 %v1089_v37 }
 0x9c3   :  { %v1046_v19 = vsel %vm165_vm0, %v1044_v18, 0.0  ;;  %3261 = vmatpush3.msra.mxu1 %v1089_v37 }
 0x9c4   :  { %1047 = vadd.xlane.f32.xlu0 %v1046_v19  ;;  %3262 = vmatprep.subr.mxu1 %v1088_v40 }
 0x9c5   :  { %3263 = vmatpush3.msra.mxu1 %v1088_v40 }
 0x9c6   :  { %3264 = vmatprep.subr.mxu1 %v1087_v41 }
 0x9c7   :  { %3265 = vmatpush3.msra.mxu1 %v1087_v41 }
 0xa4b   :  { %v1051_v20 = vpop.xlane.xlu1 %1050 }
 0xa4c   :  { %v1053_v21 = vmul.f32 0.03125, %v1051_v20 }
 0xa4d   :  { %v1048_v22 = vpop.xlane.xlu0 %1047 }
 0xa4e   :  { %v1055_v23 = vsub.f32 %v1045_v16, %v1053_v21  ;;  %v1052_v29 = vmul.f32 0.03125, %v1048_v22 }
 0xa50   :  { %v1054_v30 = vsub.f32 %v1044_v18, %v1052_v29  ;;  %v1057_v31 = vmul.f32 %v1055_v23, %v1055_v23 }
 0xa52   :  { %v1061_v32 = vsel %vm165_vm0, %v1057_v31, 0.0  ;;  %v1056_v33 = vmul.f32 %v1054_v30, %v1054_v30 }
 0xa53   :  { %1062 = vadd.xlane.f32.xlu1 %v1061_v32 }
 0xa54   :  { %v1058_v34 = vsel %vm165_vm0, %v1056_v33, 0.0 }
 0xa55   :  { %1059 = vadd.xlane.f32.xlu0 %v1058_v34 }
 0xadc   :  { %v1063_v42 = vpop.xlane.xlu1 %1062 }
 0xadd   :  { %v1065_v43 = vmul.f32 0.03125, %v1063_v42 }
 0xade   :  { %v1060_v44 = vpop.xlane.xlu0 %1059 }
 0xadf   :  { %v1067_v45 = vadd.f32 1e-05, %v1065_v43  ;;  %v1064_v46 = vmul.f32 0.03125, %v1060_v44 }
 0xae1   :  { %3440 = vrsqrt.f32 %v1067_v45  ;;  %v1066_v47 = vadd.f32 1e-05, %v1064_v46 }
 0xae3   :  { %3442 = vrsqrt.f32 %v1066_v47 }
 0xaee   :  { %v3441_v49 = vpop.eup %3440 }
 0xaef   :  { %v1071_v54 = vmul.f32 %v3441_v49, %v1055_v23 }
 0xaf0   :  { %v3443_v56 = vpop.eup %3442 }
 0xaf1   :  { %v1070_v57 = vmul.f32 %v3443_v56, %v1054_v30  ;;  %v1077_v58 = vmul.f32 %v1075_v51, %v1071_v54 }
 0xaf3   :  { %v1076_v60 = vmul.f32 %v1075_v51, %v1070_v57  ;;  %v3976_v62 = vadd.f32 %v1081_v59, %v1077_v58 }
 0xaf5   :  { %v3974_v61 = vadd.f32 %v1081_v59, %v1076_v60 }
 0xaf7   :  { %3266 = vmatprep.mubr.msk.f32.mxu1 %vm165_vm0, %v3974_v61 }
 0xaf8   :  { %3267 = vmatmul.mubr.msk.f32.vlgmr.msra.gmra.mxu1 %vm165_vm0, %v3976_v62 }
 0xbb8   :  { %v3268_v0 = vpop.f32.mrf.mxu1 }
 0xbb9   :  { %v3986_v1 = vadd.f32 %v3268_v0, %v1094_v63 }
 0xbba   :  { %v1167_v39 = vpop.f32.mrf.mxu1 }
 0xbbb   :  { %v3988_v2 = vadd.f32 %v1167_v39, %v1094_v63  ;;  %1180 = vrot.lane.b32.xlu0 %v3986_v1, %s3667_s0 }
 0xbbd   :  { %1178 = vrot.lane.b32.xlu1 %v3988_v2, %s3667_s0  ;;  %3273 = vmatprep.mubr.msk.f32.mxu1 %vm303_vm1, %v3988_v2 }
 0xbbf   :  { %1378 = vrot.lane.b32.xlu0 %v3988_v2, %s3668_s13 }
 0xbc1   :  { %1384 = vrot.lane.b32.xlu1 %v3986_v1, %s3669_s18 }
 0xbc5   :  { %1382 = vrot.lane.b32.xlu1 %v3988_v2, %s3669_s18 }
 0xbc9   :  { %1380 = vrot.lane.b32.xlu1 %v3986_v1, %s3668_s13 }
 0xc2d   :  { %v1181_v3 = vpop.permute.xlu0 %1180 }
 0xc2e   :  { %3269 = vmatprep.subr.msk.mxu1 %vm303_vm1, %v1181_v3 }
 0xc2f   :  { %3270 = vmatpush3.xpose.msk.msra.mxu1 %vm303_vm1, %v1181_v3  ;;  %v1179_v4 = vpop.permute.xlu1 %1178 }
 0xc30   :  { %3271 = vmatprep.subr.msk.mxu1 %vm303_vm1, %v1179_v4 }
 0xc31   :  { %v1379_v6 = vpop.permute.xlu0 %1378 }
 0xc33   :  { %3272 = vmatpush3.xpose.msk.msra.mxu1 %vm303_vm1, %v1179_v4  ;;  %v1385_v5 = vpop.permute.xlu1 %1384 }
 0xc34   :  { %3283 = vmatprep.subr.msk.mxu1 %vm303_vm1, %v1385_v5 }
 0xc36   :  { %3274 = vmatmul.mubr.msk.f32.vlgmr.msra.gmra.mxu1 %vm303_vm1, %v3986_v1 }
 0xc37   :  { %v1383_v7 = vpop.permute.xlu1 %1382  ;;  %3284 = vmatpush3.xpose.msk.msra.mxu1 %vm303_vm1, %v1385_v5  ;;  %3287 = vmatprep.mubr.msk.f32.mxu1 %vm303_vm1, %v1379_v6 }
 0xc38   :  { %3285 = vmatprep.subr.msk.mxu1 %vm303_vm1, %v1383_v7 }
 0xc3b   :  { %3286 = vmatpush3.xpose.msk.msra.mxu1 %vm303_vm1, %v1383_v7  ;;  %v1381_v8 = vpop.permute.xlu1 %1380 }
 0xc3e   :  { %3288 = vmatmul.mubr.msk.f32.vlgmr.msra.gmra.mxu1 %vm303_vm1, %v1381_v8  ;;  %v1596_v8 = vld [vmem:[#allocation6 + $0x38] sm:$0xff] }
 0xcf6   :  { %v3275_v9 = vpop.f32.mrf.mxu1 }
 0xcf7   :  { %v1266_v10 = vmul.f32 0.25, %v3275_v9  ;;  %v1595_v9 = vld [vmem:[#allocation6 + $0x30] sm:$0xff] }
 0xcf8   :  { %v1256_v11 = vpop.f32.mrf.mxu1 }
 0xcf9   :  { %v1265_v13 = vmul.f32 0.25, %v1256_v11  ;;  %v1268_v14 = vadd.f32 %v1266_v10, %v3863_v52  ;;  %v1594_v10 = vld [vmem:[#allocation6 + $0x28] sm:$0xff]  ;;  %v1593_v11 = vld [vmem:[#allocation6 + $0x20] sm:$0xff] }
 0xcfb   :  { %v1272_v38 = vsel %vm303_vm1, %v1268_v14, -inf  ;;  %v1267_v15 = vadd.f32 %v1265_v13, %v3868_v55 }
 0xcfc   :  { %1273 = vmax.xlane.f32.xlu1 %v1272_v38 }
 0xcfd   :  { %v1269_v36 = vsel %vm303_vm1, %v1267_v15, -inf }
 0xcfe   :  { %v3289_v16 = vpop.f32.mrf.mxu1  ;;  %1270 = vmax.xlane.f32.xlu0 %v1269_v36 }
 0xcff   :  { %v1470_v18 = vmul.f32 0.25, %v3289_v16 }
 0xd00   :  { %v1460_v17 = vpop.f32.mrf.mxu1 }
 0xd01   :  { %v1469_v19 = vmul.f32 0.25, %v1460_v17  ;;  %v1472_v22 = vadd.f32 %v1470_v18, %v3863_v52 }
 0xd03   :  { %v1471_v20 = vadd.f32 %v1469_v19, %v3868_v55  ;;  %v1476_v23 = vsel %vm303_vm1, %v1472_v22, -inf  ;;  %v1600_v19 = vrot.slane %v3982_v25, %v3814_v28 }
 0xd05   :  { %v1473_v21 = vsel %vm303_vm1, %v1471_v20, -inf }
 0xd06   :  { %1474 = vmax.xlane.f32.xlu0 %v1473_v21 }
 0xd0a   :  { %1477 = vmax.xlane.f32.xlu0 %v1476_v23 }
 0xd85   :  { %v1274_v29 = vpop.xlane.xlu1 %1273 }
 0xd86   :  { %v1276_v30 = vsub.f32 %v1268_v14, %v1274_v29 }
 0xd87   :  { %v1271_v31 = vpop.xlane.xlu0 %1270 }
 0xd88   :  { %v1279_v32 = vmul.f32 1.442695, %v1276_v30  ;;  %v1275_v33 = vsub.f32 %v1267_v15, %v1271_v31 }
 0xd8a   :  { %3444 = vpow2.f32 %v1279_v32  ;;  %v1277_v34 = vmul.f32 1.442695, %v1275_v33 }
 0xd8c   :  { %3446 = vpow2.f32 %v1277_v34 }
 0xd8f   :  { %v1475_v35 = vpop.xlane.xlu0 %1474 }
 0xd90   :  { %v1479_v37 = vsub.f32 %v1471_v20, %v1475_v35 }
 0xd92   :  { %v1481_v40 = vmul.f32 1.442695, %v1479_v37 }
 0xd93   :  { %v1478_v55 = vpop.xlane.xlu0 %1477 }
 0xd94   :  { %3448 = vpow2.f32 %v1481_v40  ;;  %v1480_v41 = vsub.f32 %v1472_v22, %v1478_v55 }
 0xd96   :  { %v1483_v42 = vmul.f32 1.442695, %v1480_v41 }
 0xd97   :  { %v3445_v52 = vpop.eup %3444 }
 0xd98   :  { %3450 = vpow2.f32 %v1483_v42  ;;  %v1284_v43 = vsel %vm303_vm1, %v3445_v52, 0.0 }
 0xd99   :  { %v3447_v44 = vpop.eup %3446  ;;  %1285 = vadd.xlane.f32.xlu1 %v1284_v43  ;;  %v1726_v43 = vld [vmem:[#allocation7 + $0x38] sm:$0xff] }
 0xd9a   :  { %v1281_v45 = vsel %vm303_vm1, %v3447_v44, 0.0  ;;  %3308 = vmatprep.subr.mxu1 %v1726_v43 }
 0xd9b   :  { %1282 = vadd.xlane.f32.xlu0 %v1281_v45  ;;  %3309 = vmatpush3.msra.mxu1 %v1726_v43  ;;  %v1723_v45 = vld [vmem:[#allocation7 + $0x20] sm:$0xff] }
 0xda1   :  { %v3449_v46 = vpop.eup %3448 }
 0xda2   :  { %v1485_v47 = vsel %vm303_vm1, %v3449_v46, 0.0 }
 0xda3   :  { %1486 = vadd.xlane.f32.xlu0 %v1485_v47 }
 0xda5   :  { %v3451_v49 = vpop.eup %3450 }
 0xda6   :  { %v1488_v51 = vsel %vm303_vm1, %v3451_v49, 0.0 }
 0xda7   :  { %1489 = vadd.xlane.f32.xlu1 %v1488_v51 }
 0xdb8   :  { %1291 = vrot.lane.b32.xlu1 %v3988_v2, %s3670_s1 }
 0xdb9   :  { %1293 = vrot.lane.b32.xlu0 %v3986_v1, %s3670_s1 }
 0xdbc   :  { %1497 = vrot.lane.b32.xlu1 %v3986_v1, %s3671_s26 }
 0xdc0   :  { %1495 = vrot.lane.b32.xlu1 %v3988_v2, %s3671_s26 }
 0xe22   :  { %v1286_v54 = vpop.xlane.xlu1 %1285 }
 0xe23   :  { %3452 = vrcp.f32 %v1286_v54 }
 0xe24   :  { %v1283_v56 = vpop.xlane.xlu0 %1282 }
 0xe25   :  { %3454 = vrcp.f32 %v1283_v56 }
 0xe2c   :  { %v1487_v57 = vpop.xlane.xlu0 %1486 }
 0xe2d   :  { %3456 = vrcp.f32 %v1487_v57  ;;  %v1713_v57 = vrot.slane %v3982_v25, %v3909_v24 }
 0xe30   :  { %v1490_v58 = vpop.xlane.xlu1 %1489  ;;  %v1294_v59 = vpop.permute.xlu0 %1293 }
 0xe31   :  { %v3453_v60 = vpop.eup %3452  ;;  %3458 = vrcp.f32 %v1490_v58  ;;  %3276 = vmatprep.subr.mxu0 %v1294_v59 }
 0xe32   :  { %v3455_v63 = vpop.eup %3454  ;;  %3277 = vmatpush3.msra.mxu0 %v1294_v59  ;;  %v1290_v1 = vmul.f32 %v3453_v60, %v3445_v52  ;;  %v1719_v60 = vrot.slane %v3982_v25, %v3912_v27 }
 0xe33   :  { %v1289_v0 = vmul.f32 %v3455_v63, %v3447_v44  ;;  %v1724_v44 = vld [vmem:[#allocation7 + $0x28] sm:$0xff] }
 0xe34   :  { %v1292_v39 = vpop.permute.xlu1 %1291 }
 0xe35   :  { %3278 = vmatprep.subr.mxu0 %v1292_v39  ;;  %3280 = vmatprep.mubr.msk.f32.mxu0 %vm303_vm1, %v1289_v0 }
 0xe36   :  { %3279 = vmatpush3.msra.mxu0 %v1292_v39 }
 0xe37   :  { %3281 = vmatmul.mubr.msk.f32.vlgmr.msra.gmra.mxu0 %vm303_vm1, %v1290_v1 }
 0xe38   :  { %v1498_v2 = vpop.permute.xlu1 %1497 }
 0xe39   :  { %3290 = vmatprep.subr.mxu0 %v1498_v2 }
 0xe3a   :  { %v3457_v3 = vpop.eup %3456  ;;  %3291 = vmatpush3.msra.mxu0 %v1498_v2 }
 0xe3b   :  { %v1493_v4 = vmul.f32 %v3457_v3, %v3449_v46 }
 0xe3c   :  { %v1496_v5 = vpop.permute.xlu1 %1495 }
 0xe3d   :  { %3292 = vmatprep.subr.mxu0 %v1496_v5  ;;  %3294 = vmatprep.mubr.msk.f32.mxu0 %vm303_vm1, %v1493_v4  ;;  %v3023_v4 = vld [vmem:[%s4723_s7 + $0x78] sm:$0xff] }
 0xe3e   :  { %v3459_v6 = vpop.eup %3458  ;;  %3293 = vmatpush3.msra.mxu0 %v1496_v5  ;;  %v3022_v5 = vld [vmem:[%s4723_s7 + $0x70] sm:$0xff] }
 0xe3f   :  { %v1494_v7 = vmul.f32 %v3459_v6, %v3451_v49  ;;  %3297 = vmatprep.subr.mxu0 %v1596_v8  ;;  %v3021_v6 = vld [vmem:[%s4723_s7 + $0x68] sm:$0xff] }
 0xe41   :  { %3295 = vmatmul.mubr.msk.f32.vlgmr.msra.gmra.mxu0 %vm303_vm1, %v1494_v7  ;;  %v3020_v7 = vld [vmem:[%s4723_s7 + $0x60] sm:$0xff] }
 0xe42   :  { %3298 = vmatpush3.msra.mxu0 %v1596_v8  ;;  %v3019_v8 = vld [vmem:[%s4723_s7 + $0x58] sm:$0xff] }
 0xe43   :  { %3299 = vmatprep.subr.mxu0 %v1595_v9 }
 0xe44   :  { %3300 = vmatpush3.msra.mxu0 %v1595_v9  ;;  %v3018_v9 = vld [vmem:[%s4723_s7 + $0x50] sm:$0xff] }
 0xe45   :  { %3301 = vmatprep.subr.mxu0 %v1594_v10 }
 0xe46   :  { %3302 = vmatpush3.msra.mxu0 %v1594_v10  ;;  %v3017_v10 = vld [vmem:[%s4723_s7 + $0x48] sm:$0xff] }
 0xe47   :  { %3303 = vmatprep.subr.mxu0 %v1593_v11 }
 0xe48   :  { %3304 = vmatpush3.msra.mxu0 %v1593_v11  ;;  %v3016_v11 = vld [vmem:[%s4723_s7 + $0x40] sm:$0xff] }
 0xe49   :  { %3319 = vmatprep.subr.mxu0 %v3023_v4 }
 0xef7   :  { %v3282_v13 = vpop.f32.mrf.mxu0 }
 0xef9   :  { %v1369_v14 = vpop.f32.mrf.mxu0 }
 0xf01   :  { %v3296_v38 = vpop.f32.mrf.mxu0 }
 0xf02   :  { %1586 = vrot.lane.b32.xlu1 %v3296_v38, %s3672_s3 }
 0xf03   :  { %v1573_v15 = vpop.f32.mrf.mxu0 }
 0xf04   :  { %1584 = vrot.lane.b32.xlu0 %v1573_v15, %s3672_s3 }
 0xf74   :  { %v1587_v36 = vpop.permute.xlu1 %1586 }
 0xf75   :  { %v1591_v18 = vsel %vm303_vm1, %v3282_v13, %v1587_v36  ;;  %v1730_v13 = vrot.slane %v3982_v25, %v3948_v50 }
 0xf76   :  { %v1585_v16 = vpop.permute.xlu0 %1584 }
 0xf77   :  { %v1590_v17 = vsel %vm303_vm1, %v1369_v14, %v1585_v16 }
 0xf78   :  { %3305 = vmatprep.mubr.msk.f32.mxu0 %vm165_vm0, %v1590_v17 }
 0xf79   :  { %3306 = vmatmul.mubr.msk.f32.vlgmr.msra.gmra.mxu0 %vm165_vm0, %v1591_v18 }
 0xf7a   :  { %3320 = vmatpush3.msra.mxu0 %v3023_v4 }
 0xf7b   :  { %3321 = vmatprep.subr.mxu0 %v3022_v5 }
 0xf7c   :  { %3322 = vmatpush3.msra.mxu0 %v3022_v5  ;;  %v1955_v5 = vrot.slane %v3982_v25, %v3965_v48 }
 0xf7d   :  { %3323 = vmatprep.subr.mxu0 %v3021_v6 }
 0xf7e   :  { %3324 = vmatpush3.msra.mxu0 %v3021_v6 }
 0xf7f   :  { %3325 = vmatprep.subr.mxu0 %v3020_v7 }
 0xf80   :  { %3326 = vmatpush3.msra.mxu0 %v3020_v7 }
 0xf81   :  { %3327 = vmatprep.subr.mxu0 %v3019_v8 }
 0xf82   :  { %3328 = vmatpush3.msra.mxu0 %v3019_v8  ;;  %v1961_v8 = vrot.slane %v3982_v25, %v3970_v53 }
 0xf83   :  { %3329 = vmatprep.subr.mxu0 %v3018_v9 }
 0xf84   :  { %3330 = vmatpush3.msra.mxu0 %v3018_v9 }
 0xf85   :  { %3331 = vmatprep.subr.mxu0 %v3017_v10 }
 0xf86   :  { %3332 = vmatpush3.msra.mxu0 %v3017_v10 }
 0xf87   :  { %3333 = vmatprep.subr.mxu0 %v3016_v11 }
 0xf88   :  { %3334 = vmatpush3.msra.mxu0 %v3016_v11 }
0x1039   :  { %v3307_v20 = vpop.f32.mrf.mxu0 }
0x103a   :  { %v1679_v21 = vadd.f32 %v3307_v20, %v1600_v19 }
0x103b   :  { %v1673_v22 = vpop.f32.mrf.mxu0 }
0x103c   :  { %v1674_v23 = vadd.f32 %v1673_v22, %v1600_v19  ;;  %v1683_v29 = vadd.f32 %v1679_v21, %v3976_v62 }
0x103e   :  { %v1687_v30 = vsel %vm165_vm0, %v1683_v29, 0.0  ;;  %v1682_v31 = vadd.f32 %v1674_v23, %v3974_v61  ;;  %v1725_v61 = vld [vmem:[#allocation7 + $0x30] sm:$0xff] }
0x103f   :  { %1688 = vadd.xlane.f32.xlu1 %v1687_v30  ;;  %3310 = vmatprep.subr.mxu1 %v1725_v61 }
0x1040   :  { %v1684_v32 = vsel %vm165_vm0, %v1682_v31, 0.0  ;;  %3311 = vmatpush3.msra.mxu1 %v1725_v61 }
0x1041   :  { %1685 = vadd.xlane.f32.xlu0 %v1684_v32  ;;  %3312 = vmatprep.subr.mxu1 %v1724_v44 }
0x1042   :  { %3313 = vmatpush3.msra.mxu1 %v1724_v44 }
0x1043   :  { %3314 = vmatprep.subr.mxu1 %v1723_v45 }
0x1044   :  { %3315 = vmatpush3.msra.mxu1 %v1723_v45 }
0x10c8   :  { %v1689_v33 = vpop.xlane.xlu1 %1688 }
0x10c9   :  { %v1691_v34 = vmul.f32 0.03125, %v1689_v33 }
0x10ca   :  { %v1686_v35 = vpop.xlane.xlu0 %1685 }
0x10cb   :  { %v1690_v37 = vmul.f32 0.03125, %v1686_v35  ;;  %v1693_v40 = vsub.f32 %v1683_v29, %v1691_v34 }
0x10cd   :  { %v1692_v55 = vsub.f32 %v1682_v31, %v1690_v37  ;;  %v1695_v52 = vmul.f32 %v1693_v40, %v1693_v40 }
0x10cf   :  { %v1694_v41 = vmul.f32 %v1692_v55, %v1692_v55  ;;  %v1699_v62 = vsel %vm165_vm0, %v1695_v52, 0.0 }
0x10d1   :  { %v1696_v42 = vsel %vm165_vm0, %v1694_v41, 0.0  ;;  %v1842_v41 = vrot.slane %v3982_v25, %v3955_v12 }
0x10d2   :  { %1697 = vadd.xlane.f32.xlu0 %v1696_v42 }
0x10d6   :  { %1700 = vadd.xlane.f32.xlu0 %v1699_v62 }
0x115b   :  { %v1698_v46 = vpop.xlane.xlu0 %1697 }
0x115c   :  { %v1702_v47 = vmul.f32 0.03125, %v1698_v46 }
0x115e   :  { %v1704_v49 = vadd.f32 1e-05, %v1702_v47 }
0x115f   :  { %v1701_v51 = vpop.xlane.xlu0 %1700 }
0x1160   :  { %3460 = vrsqrt.f32 %v1704_v49  ;;  %v1703_v54 = vmul.f32 0.03125, %v1701_v51 }
0x1162   :  { %v1705_v56 = vadd.f32 1e-05, %v1703_v54 }
0x1164   :  { %3462 = vrsqrt.f32 %v1705_v56 }
0x116d   :  { %v3461_v58 = vpop.eup %3460 }
0x116e   :  { %v1708_v59 = vmul.f32 %v3461_v58, %v1692_v55 }
0x1170   :  { %v1714_v63 = vmul.f32 %v1713_v57, %v1708_v59 }
0x1171   :  { %v3463_v0 = vpop.eup %3462 }
0x1172   :  { %v1709_v39 = vmul.f32 %v3463_v0, %v1693_v40  ;;  %v4058_v1 = vadd.f32 %v1719_v60, %v1714_v63 }
0x1174   :  { %v1715_v2 = vmul.f32 %v1713_v57, %v1709_v39  ;;  %3316 = vmatprep.mubr.msk.f32.mxu1 %vm165_vm0, %v4058_v1 }
0x1176   :  { %v1721_v3 = vadd.f32 %v1719_v60, %v1715_v2 }
0x1178   :  { %3317 = vmatmul.mubr.msk.f32.vlgmr.msra.gmra.mxu1 %vm165_vm0, %v1721_v3 }
0x1238   :  { %v3318_v14 = vpop.f32.mrf.mxu1 }
0x1239   :  { %v1809_v38 = vadd.f32 %v3318_v14, %v1730_v13 }
0x123a   :  { %v1803_v15 = vpop.f32.mrf.mxu1 }
0x123b   :  { %v1813_v36 = vmul.f32 %v1809_v38, %v1809_v38  ;;  %v1804_v16 = vadd.f32 %v1803_v15, %v1730_v13  ;;  %v1965_v13 = vld [vmem:[%s4718_s2 + $0x8] sm:$0xff]  ;;  %v1964_v15 = vld [vmem:[%s4718_s2] sm:$0xff] }
0x123d   :  { %v1815_v17 = vmul.f32 %v1813_v36, %v1809_v38  ;;  %v1812_v18 = vmul.f32 %v1804_v16, %v1804_v16 }
0x123f   :  { %v1817_v19 = vmul.f32 0.044715, %v1815_v17  ;;  %v1814_v20 = vmul.f32 %v1812_v18, %v1804_v16 }
0x1241   :  { %v1819_v21 = vadd.f32 %v1817_v19, %v1809_v38  ;;  %v1816_v22 = vmul.f32 0.044715, %v1814_v20 }
0x1243   :  { %v1821_v23 = vmul.f32 0.7978846, %v1819_v21  ;;  %v1818_v29 = vadd.f32 %v1816_v22, %v1804_v16 }
0x1245   :  { %3464 = vtanh.f32 %v1821_v23  ;;  %v1820_v30 = vmul.f32 0.7978846, %v1818_v29 }
0x1247   :  { %3466 = vtanh.f32 %v1820_v30 }
0x1252   :  { %v3465_v31 = vpop.eup %3464 }
0x1253   :  { %v1825_v32 = vadd.f32 1.0, %v3465_v31 }
0x1254   :  { %v3467_v33 = vpop.eup %3466 }
0x1255   :  { %v1824_v34 = vadd.f32 1.0, %v3467_v33  ;;  %v1827_v35 = vmul.f32 0.5, %v1825_v32 }
0x1257   :  { %v1826_v37 = vmul.f32 0.5, %v1824_v34  ;;  %v1829_v55 = vmul.f32 %v1827_v35, %v1809_v38 }
0x1259   :  { %v1828_v40 = vmul.f32 %v1826_v37, %v1804_v16 }
0x125b   :  { %3335 = vmatprep.mubr.msk.f32.mxu0 %vm962_vm2, %v1828_v40 }
0x125c   :  { %3336 = vmatmul.mubr.msk.f32.vlgmr.msra.gmra.mxu0 %vm962_vm2, %v1829_v55 }
0x131c   :  { %v3337_v42 = vpop.f32.mrf.mxu0 }
0x131d   :  { %v1921_v52 = vadd.f32 %v3337_v42, %v1842_v41 }
0x131e   :  { %v1915_v62 = vpop.f32.mrf.mxu0 }
0x131f   :  { %v1916_v43 = vadd.f32 %v1915_v62, %v1842_v41  ;;  %v1925_v61 = vadd.f32 %v1921_v52, %v1721_v3 }
0x1321   :  { %v1929_v44 = vsel %vm165_vm0, %v1925_v61, 0.0  ;;  %v1924_v45 = vadd.f32 %v1916_v43, %v4058_v1  ;;  %v2021_v43 = vld [vmem:[#allocation10 + $0x68] sm:$0xff] }
0x1322   :  { %1930 = vadd.xlane.f32.xlu1 %v1929_v44  ;;  %2067 = vmatprep.subr.mxu1 %v2021_v43  ;;  %v2017_v44 = vld [vmem:[#allocation10 + $0x48] sm:$0xff] }
0x1323   :  { %v1926_v46 = vsel %vm165_vm0, %v1924_v45, 0.0 }
0x1324   :  { %1927 = vadd.xlane.f32.xlu0 %v1926_v46  ;;  %v2013_v46 = vld [vmem:[#allocation10 + $0x28] sm:$0xff] }
0x13ab   :  { %v1931_v47 = vpop.xlane.xlu1 %1930 }
0x13ac   :  { %v1933_v49 = vmul.f32 0.03125, %v1931_v47  ;;  %v2012_v47 = vld [vmem:[#allocation10 + $0x20] sm:$0xff] }
0x13ad   :  { %v1928_v51 = vpop.xlane.xlu0 %1927 }
0x13ae   :  { %v1935_v54 = vsub.f32 %v1925_v61, %v1933_v49  ;;  %v1932_v56 = vmul.f32 0.03125, %v1928_v51  ;;  %v2020_v61 = vld [vmem:[#allocation10 + $0x60] sm:$0xff]  ;;  %v2009_v49 = vld [vmem:[#allocation10 + $0x8] sm:$0xff] }
0x13af   :  { %2068 = vmatpush1.msra.mxu1 %v2020_v61  ;;  %v2008_v51 = vld [vmem:[#allocation10] sm:$0xff] }
0x13b0   :  { %v1934_v57 = vsub.f32 %v1924_v45, %v1932_v56  ;;  %v1937_v58 = vmul.f32 %v1935_v54, %v1935_v54  ;;  %2069 = vmatprep.subr.mxu1 %v2017_v44  ;;  %v2016_v45 = vld [vmem:[#allocation10 + $0x40] sm:$0xff]  ;;  %v2023_v56 = vld [vmem:[#allocation10 + $0x78] sm:$0xff] }
0x13b1   :  { %2070 = vmatpush1.msra.mxu1 %v2016_v45 }
0x13b2   :  { %v1941_v59 = vsel %vm165_vm0, %v1937_v58, 0.0  ;;  %v1936_v60 = vmul.f32 %v1934_v57, %v1934_v57  ;;  %2071 = vmatprep.subr.mxu1 %v2013_v46 }
0x13b3   :  { %1942 = vadd.xlane.f32.xlu1 %v1941_v59  ;;  %2072 = vmatpush1.msra.mxu1 %v2012_v47  ;;  %v2320_v47 = vld [vmem:[%s4726_s10 + $0xf8] sm:$0xff] }
0x13b4   :  { %v1938_v63 = vsel %vm165_vm0, %v1936_v60, 0.0  ;;  %2073 = vmatprep.subr.mxu1 %v2009_v49  ;;  %v4111_v60 = vld [vmem:[#allocation9] sm:$0xff]  ;;  %v2384_v49 = vld [vmem:[%s4726_s10 + $0x2f8] sm:$0xff]  ;;  %2425 = vmatprep.subr.mxu0 %v2320_v47  ;;  %v2361_v47 = vld [vmem:[%s4726_s10 + $0x240] sm:$0xff] }
0x13b5   :  { %1939 = vadd.xlane.f32.xlu0 %v1938_v63  ;;  %2074 = vmatpush1.msra.mxu1 %v2008_v51  ;;  %v2001_v63 = vrot.slane %v4111_v60, %v3909_v24  ;;  %v2319_v51 = vld [vmem:[%s4726_s10 + $0xf0] sm:$0xff] }
0x13b6   :  { %2138 = vmatprep.subr.mxu1 %v2023_v56  ;;  %v2383_v56 = vld [vmem:[%s4726_s10 + $0x2f0] sm:$0xff]  ;;  %2426 = vmatpush1.msra.mxu0 %v2319_v51  ;;  %v2360_v51 = vld [vmem:[%s4726_s10 + $0x238] sm:$0xff] }
0x143c   :  { %v1943_v0 = vpop.xlane.xlu1 %1942 }
0x143d   :  { %v1945_v39 = vmul.f32 0.03125, %v1943_v0 }
0x143e   :  { %v1940_v1 = vpop.xlane.xlu0 %1939 }
0x143f   :  { %v1947_v2 = vadd.f32 1e-05, %v1945_v39  ;;  %v1944_v3 = vmul.f32 0.03125, %v1940_v1  ;;  %v2006_v1 = vrot.slane %v4111_v60, %v3912_v27 }
0x1441   :  { %3468 = vrsqrt.f32 %v1947_v2  ;;  %v1946_v4 = vadd.f32 1e-05, %v1944_v3 }
0x1443   :  { %3470 = vrsqrt.f32 %v1946_v4  ;;  %v2022_v4 = vld [vmem:[#allocation10 + $0x70] sm:$0xff] }
0x144e   :  { %v3469_v6 = vpop.eup %3468 }
0x144f   :  { %v1951_v7 = vmul.f32 %v3469_v6, %v1935_v54  ;;  %v3673_v54 = vmov 0.0   ;;  %v2018_v6 = vld [vmem:[#allocation10 + $0x50] sm:$0xff] }
0x1450   :  { %v3471_v9 = vpop.eup %3470  ;;  %2107 = vmatprep.mubr.f32.mxu1 %v3673_v54 }
0x1451   :  { %v1950_v10 = vmul.f32 %v3471_v9, %v1934_v57  ;;  %v1957_v11 = vmul.f32 %v1955_v5, %v1951_v7  ;;  %v2015_v7 = vld [vmem:[#allocation10 + $0x38] sm:$0xff] }
0x1452   :  { %v2011_v9 = vld [vmem:[#allocation10 + $0x18] sm:$0xff] }
0x1453   :  { %v1956_v14 = vmul.f32 %v1955_v5, %v1950_v10  ;;  %v1963_v38 = vadd.f32 %v1961_v8, %v1957_v11  ;;  %v2019_v5 = vld [vmem:[#allocation10 + $0x58] sm:$0xff]  ;;  %v2010_v10 = vld [vmem:[#allocation10 + $0x10] sm:$0xff]  ;;  %v4120_v11 = vld [vmem:[#allocation9 + $0x8] sm:$0xff] }
0x1455   :  { %v1962_v36 = vadd.f32 %v1961_v8, %v1956_v14  ;;  %v1967_v16 = vadd.f32 %v1965_v13, %v1963_v38  ;;  %v2014_v8 = vld [vmem:[#allocation10 + $0x30] sm:$0xff]  ;;  %v2027_v13 = vrot.slane %v4111_v60, %v3948_v50  ;;  %v2031_v14 = vrot.slane %v4120_v11, %v3948_v50 }
0x1457   :  { %v1966_v17 = vadd.f32 %v1964_v15, %v1962_v36  ;;  %v1975_v18 = vsel %vm165_vm0, %v1967_v16, -inf  ;;  %v2192_v36 = vrot.slane %v4111_v60, %v3955_v12  ;;  %v2196_v16 = vrot.slane %v4120_v11, %v3955_v12 }
0x1458   :  { %v1976_v19 = vrot.slane %v1975_v18, 4 }
0x1459   :  { %v1968_v25 = vsel %vm165_vm0, %v1966_v17, -inf }
0x145a   :  { %v1969_v20 = vrot.slane %v1968_v25, 4  ;;  %v1977_v21 = vmax.f32 %v1975_v18, %v1976_v19  ;;  %v4130_v18 = vld [vmem:[#allocation9 + $0x10] sm:$0xff] }
0x145c   :  { %v1970_v22 = vmax.f32 %v1968_v25, %v1969_v20  ;;  %v1978_v23 = vrot.slane %v1977_v21, 2  ;;  %v4132_v25 = vld [vmem:[#allocation9 + $0x18] sm:$0xff] }
0x145e   :  { %v1971_v29 = vrot.slane %v1970_v22, 2  ;;  %v1979_v30 = vmax.f32 %v1977_v21, %v1978_v23 }
0x1460   :  { %v1972_v31 = vmax.f32 %v1970_v22, %v1971_v29  ;;  %v1980_v32 = vrot.slane %v1979_v30, 1  ;;  %v2035_v22 = vrot.slane %v4130_v18, %v3948_v50  ;;  %v2200_v29 = vrot.slane %v4130_v18, %v3955_v12 }
0x1462   :  { %v1973_v33 = vrot.slane %v1972_v31, 1  ;;  %v1981_v35 = vmax.f32 %v1979_v30, %v1980_v32  ;;  %v2039_v30 = vrot.slane %v4132_v25, %v3948_v50 }
0x1464   :  { %v1974_v34 = vmax.f32 %v1972_v31, %v1973_v33 }
0x1466   :  { %v1983_v37 = vsel %vm1982_vm3, %v1974_v34, %v1981_v35  ;;  %v2204_v34 = vrot.slane %v4132_v25, %v3955_v12 }
0x1467   :  { %v1985_v40 = vsel %vm1984_vm4, %v1983_v37, 0.0 }
0x1468   :  { %1986 = vadd.xlane.f32.xlu0 %v1985_v40 }
0x14f1   :  { %v1987_v55 = vpop.xlane.xlu0 %1986 }
0x14f2   :  { %v1988_v41 = vmul.f32 0.03125, %v1987_v55 }
0x14f4   :  { %v1989_v42 = vsub.f32 %v1983_v37, %v1988_v41 }
0x14f6   :  { %v1990_v52 = vmul.f32 %v1989_v42, %v1989_v42 }
0x14f8   :  { %v1991_v62 = vsel %vm1984_vm4, %v1990_v52, 0.0 }
0x14f9   :  { %1992 = vadd.xlane.f32.xlu1 %v1991_v62 }
0x1582   :  { %v1993_v57 = vpop.xlane.xlu1 %1992 }
0x1583   :  { %v1994_v58 = vmul.f32 0.03125, %v1993_v57  ;;  %v2318_v57 = vld [vmem:[%s4726_s10 + $0xe8] sm:$0xff] }
0x1584   :  { %2427 = vmatprep.subr.mxu0 %v2318_v57  ;;  %v2359_v57 = vld [vmem:[%s4726_s10 + $0x230] sm:$0xff] }
0x1585   :  { %v1995_v59 = vadd.f32 1e-05, %v1994_v58  ;;  %v2382_v58 = vld [vmem:[%s4726_s10 + $0x2e8] sm:$0xff] }
0x1587   :  { %3472 = vrsqrt.f32 %v1995_v59  ;;  %v2317_v59 = vld [vmem:[%s4726_s10 + $0xe0] sm:$0xff] }
0x1588   :  { %2428 = vmatpush1.msra.mxu0 %v2317_v59  ;;  %v2358_v59 = vld [vmem:[%s4726_s10 + $0x228] sm:$0xff] }
0x1594   :  { %v3473_v0 = vpop.eup %3472 }
0x1595   :  { %v1997_v39 = vmul.f32 %v3473_v0, %v1989_v42  ;;  %v2316_v0 = vld [vmem:[%s4726_s10 + $0xd8] sm:$0xff] }
0x1596   :  { %2429 = vmatprep.subr.mxu0 %v2316_v0  ;;  %v2357_v0 = vld [vmem:[%s4726_s10 + $0x220] sm:$0xff] }
0x1597   :  { %v2002_v2 = vmul.f32 %v2001_v63, %v1997_v39  ;;  %v2381_v63 = vld [vmem:[%s4726_s10 + $0x2e0] sm:$0xff]  ;;  %v2380_v39 = vld [vmem:[%s4726_s10 + $0x2d8] sm:$0xff] }
0x1599   :  { %v2007_v3 = vadd.f32 %v2006_v1, %v2002_v2  ;;  %v2315_v1 = vld [vmem:[%s4726_s10 + $0xd0] sm:$0xff] }
0x159a   :  { %v2379_v2 = vld [vmem:[%s4726_s10 + $0x2d0] sm:$0xff]  ;;  %2430 = vmatpush1.msra.mxu0 %v2315_v1  ;;  %v2356_v1 = vld [vmem:[%s4726_s10 + $0x218] sm:$0xff] }
0x159b   :  { %3026 = vmatmul.mubr.msk.f32.vlgmr.msra.gmra.mxu1 %vm165_vm0, %v2007_v3 }
0x159c   :  { %2139 = vmatpush1.msra.mxu1 %v2022_v4  ;;  %2178 = vmatprep.mubr.f32.mxu1 %v3673_v54  ;;  %v2378_v4 = vld [vmem:[%s4726_s10 + $0x2c8] sm:$0xff] }
0x159d   :  { %2140 = vmatprep.subr.mxu1 %v2019_v5  ;;  %v2313_v5 = vld [vmem:[%s4726_s10 + $0xc0] sm:$0xff] }
0x159e   :  { %2141 = vmatpush1.msra.mxu1 %v2018_v6  ;;  %v2377_v6 = vld [vmem:[%s4726_s10 + $0x2c0] sm:$0xff] }
0x159f   :  { %2142 = vmatprep.subr.mxu1 %v2015_v7  ;;  %v2312_v7 = vld [vmem:[%s4726_s10 + $0xb8] sm:$0xff] }
0x15a0   :  { %2143 = vmatpush1.msra.mxu1 %v2014_v8  ;;  %v2376_v8 = vld [vmem:[%s4726_s10 + $0x2b8] sm:$0xff] }
0x15a1   :  { %2144 = vmatprep.subr.mxu1 %v2011_v9  ;;  %v2311_v9 = vld [vmem:[%s4726_s10 + $0xb0] sm:$0xff] }
0x15a2   :  { %2145 = vmatpush1.msra.mxu1 %v2010_v10  ;;  %v2375_v10 = vld [vmem:[%s4726_s10 + $0x2b0] sm:$0xff] }
0x15a3   :  { %3027 = vmatmul.mubr.msk.f32.vlgmr.msra.gmra.mxu1 %vm165_vm0, %v2007_v3  ;;  %2496 = vmatprep.subr.mxu1 %v2384_v49  ;;  %v2314_v3 = vld [vmem:[%s4726_s10 + $0xc8] sm:$0xff]  ;;  %v2296_v49 = vld [vmem:[%s4726_s10 + $0x38] sm:$0xff] }
0x15a4   :  { %2497 = vmatpush1.msra.mxu1 %v2383_v56  ;;  %2431 = vmatprep.subr.mxu0 %v2314_v3  ;;  %v2295_v56 = vld [vmem:[%s4726_s10 + $0x30] sm:$0xff] }
0x15a5   :  { %2498 = vmatprep.subr.mxu1 %v2382_v58  ;;  %2432 = vmatpush1.msra.mxu0 %v2313_v5  ;;  %v2294_v58 = vld [vmem:[%s4726_s10 + $0x28] sm:$0xff]  ;;  %v2355_v3 = vld [vmem:[%s4726_s10 + $0x210] sm:$0xff] }
0x15a6   :  { %2499 = vmatpush1.msra.mxu1 %v2381_v63  ;;  %2433 = vmatprep.subr.mxu0 %v2312_v7  ;;  %v2293_v63 = vld [vmem:[%s4726_s10 + $0x20] sm:$0xff]  ;;  %v2354_v5 = vld [vmem:[%s4726_s10 + $0x208] sm:$0xff] }
0x15a7   :  { %2500 = vmatprep.subr.mxu1 %v2380_v39  ;;  %2434 = vmatpush1.msra.mxu0 %v2311_v9  ;;  %v2292_v39 = vld [vmem:[%s4726_s10 + $0x18] sm:$0xff]  ;;  %v2353_v7 = vld [vmem:[%s4726_s10 + $0x200] sm:$0xff] }
0x15a8   :  { %2501 = vmatpush1.msra.mxu1 %v2379_v2  ;;  %v2291_v2 = vld [vmem:[%s4726_s10 + $0x10] sm:$0xff]  ;;  %v2416_v9 = vld [vmem:[%s4726_s10 + $0x3f8] sm:$0xff] }
0x15a9   :  { %2502 = vmatprep.subr.mxu1 %v2378_v4  ;;  %v2290_v4 = vld [vmem:[%s4726_s10 + $0x8] sm:$0xff] }
0x15aa   :  { %2503 = vmatpush1.msra.mxu1 %v2377_v6  ;;  %v2289_v6 = vld [vmem:[%s4726_s10] sm:$0xff] }
0x15ab   :  { %2504 = vmatprep.subr.mxu1 %v2376_v8  ;;  %v2352_v8 = vld [vmem:[%s4726_s10 + $0x1f8] sm:$0xff] }
0x15ac   :  { %2505 = vmatpush1.msra.mxu1 %v2375_v10  ;;  %v2351_v10 = vld [vmem:[%s4726_s10 + $0x1f0] sm:$0xff] }
0x165b   :  { %v2109_v38 = vpop.f32.mrf.mxu1 }
0x165c   :  { %v2110_v15 = vadd.f32 %v2109_v38, %v2027_v13  ;;  %v2310_v13 = vld [vmem:[%s4726_s10 + $0xa8] sm:$0xff]  ;;  %v2309_v38 = vld [vmem:[%s4726_s10 + $0xa0] sm:$0xff] }
0x165d   :  { %v2111_v17 = vpop.f32.mrf.mxu1  ;;  %2435 = vmatprep.subr.mxu0 %v2310_v13  ;;  %v2415_v13 = vld [vmem:[%s4726_s10 + $0x3f0] sm:$0xff] }
0x165e   :  { %v2112_v19 = vadd.f32 %v2111_v17, %v2031_v14  ;;  %v2205_v20 = vmul.f32 %v2192_v36, %v2110_v15  ;;  %vm2185_vm6 = vcmp.ge.f32.partialorder %v2110_v15, 0.0  ;;  %v2374_v14 = vld [vmem:[%s4726_s10 + $0x2a8] sm:$0xff]  ;;  %v2308_v36 = vld [vmem:[%s4726_s10 + $0x98] sm:$0xff]  ;;  %v2307_v17 = vld [vmem:[%s4726_s10 + $0x90] sm:$0xff]  ;;  %2436 = vmatpush1.msra.mxu0 %v2309_v38 }
0x165f   :  { %2506 = vmatprep.subr.mxu1 %v2374_v14  ;;  %2437 = vmatprep.subr.mxu0 %v2308_v36  ;;  %v2350_v14 = vld [vmem:[%s4726_s10 + $0x1e8] sm:$0xff]  ;;  %v2413_v36 = vld [vmem:[%s4726_s10 + $0x3e0] sm:$0xff] }
0x1660   :  { %vm2186_vm5 = vcmp.ge.f32.partialorder %v2112_v19, 0.0  ;;  %v2206_v21 = vmul.f32 %v2196_v16, %v2112_v19  ;;  %v4142_v32 = vsel %vm2185_vm6, %v2110_v15, %v2205_v20  ;;  %v2373_v15 = vld [vmem:[%s4726_s10 + $0x2a0] sm:$0xff]  ;;  %v2372_v16 = vld [vmem:[%s4726_s10 + $0x298] sm:$0xff]  ;;  %v2306_v20 = vld [vmem:[%s4726_s10 + $0x88] sm:$0xff]  ;;  %2438 = vmatpush1.msra.mxu0 %v2307_v17 }
0x1661   :  { %v2214_v41 = vsel %vm2213_vm7, %v4142_v32, 0.0  ;;  %2507 = vmatpush1.msra.mxu1 %v2373_v15  ;;  %2439 = vmatprep.subr.mxu0 %v2306_v20  ;;  %v2414_v38 = vld [vmem:[%s4726_s10 + $0x3e8] sm:$0xff]  ;;  %v2349_v15 = vld [vmem:[%s4726_s10 + $0x1e0] sm:$0xff]  ;;  %v2412_v17 = vld [vmem:[%s4726_s10 + $0x3d8] sm:$0xff] }
0x1662   :  { %v4136_v23 = vsel %vm2186_vm5, %v2112_v19, %v2206_v21  ;;  %v2371_v19 = vld [vmem:[%s4726_s10 + $0x290] sm:$0xff]  ;;  %v2370_v21 = vld [vmem:[%s4726_s10 + $0x288] sm:$0xff]  ;;  %2508 = vmatprep.subr.mxu1 %v2372_v16  ;;  %v2348_v16 = vld [vmem:[%s4726_s10 + $0x1d8] sm:$0xff] }
0x1663   :  { %v2180_v31 = vpop.f32.mrf.mxu1  ;;  %v2215_v35 = vsel %vm2213_vm7, %v4136_v23, 0.0  ;;  %2509 = vmatpush1.msra.mxu1 %v2371_v19  ;;  %v2347_v19 = vld [vmem:[%s4726_s10 + $0x1d0] sm:$0xff] }
0x1664   :  { %v2181_v33 = vadd.f32 %v2180_v31, %v2035_v22  ;;  %v2216_v62 = vadd.f32 %v2215_v35, %v2214_v41  ;;  %v2305_v22 = vld [vmem:[%s4726_s10 + $0x80] sm:$0xff]  ;;  %v2368_v31 = vld [vmem:[%s4726_s10 + $0x278] sm:$0xff]  ;;  %2510 = vmatprep.subr.mxu1 %v2370_v21  ;;  %v2302_v35 = vld [vmem:[%s4726_s10 + $0x68] sm:$0xff] }
0x1665   :  { %v2182_v37 = vpop.f32.mrf.mxu1  ;;  %2440 = vmatpush1.msra.mxu0 %v2305_v22  ;;  %v2300_v41 = vld [vmem:[%s4726_s10 + $0x58] sm:$0xff]  ;;  %v2411_v20 = vld [vmem:[%s4726_s10 + $0x3d0] sm:$0xff]  ;;  %v2346_v21 = vld [vmem:[%s4726_s10 + $0x1c8] sm:$0xff] }
0x1666   :  { %vm2187_vm8 = vcmp.ge.f32.partialorder %v2181_v33, 0.0  ;;  %v2207_v40 = vmul.f32 %v2200_v29, %v2181_v33  ;;  %v2183_v55 = vadd.f32 %v2182_v37, %v2039_v30  ;;  %v2369_v29 = vld [vmem:[%s4726_s10 + $0x280] sm:$0xff]  ;;  %v2304_v30 = vld [vmem:[%s4726_s10 + $0x78] sm:$0xff]  ;;  %v2366_v37 = vld [vmem:[%s4726_s10 + $0x268] sm:$0xff] }
0x1667   :  { %2511 = vmatpush1.msra.mxu1 %v2369_v29  ;;  %2441 = vmatprep.subr.mxu0 %v2304_v30  ;;  %v2410_v22 = vld [vmem:[%s4726_s10 + $0x3c8] sm:$0xff] }
0x1668   :  { %v4150_v42 = vsel %vm2187_vm8, %v2181_v33, %v2207_v40  ;;  %vm2188_vm9 = vcmp.ge.f32.partialorder %v2183_v55, 0.0  ;;  %v2208_v52 = vmul.f32 %v2204_v34, %v2183_v55  ;;  %v2303_v33 = vld [vmem:[%s4726_s10 + $0x70] sm:$0xff]  ;;  %2512 = vmatprep.subr.mxu1 %v2368_v31  ;;  %v2301_v40 = vld [vmem:[%s4726_s10 + $0x60] sm:$0xff] }
0x1669   :  { %v2217_v43 = vsel %vm2213_vm7, %v4150_v42, 0.0  ;;  %v2367_v34 = vld [vmem:[%s4726_s10 + $0x270] sm:$0xff]  ;;  %2442 = vmatpush1.msra.mxu0 %v2303_v33 }
0x166a   :  { %v4154_v61 = vsel %vm2188_vm9, %v2183_v55, %v2208_v52  ;;  %v2218_v44 = vadd.f32 %v2217_v43, %v2216_v62  ;;  %v2365_v55 = vld [vmem:[%s4726_s10 + $0x260] sm:$0xff]  ;;  %2513 = vmatpush1.msra.mxu1 %v2367_v34  ;;  %v2364_v52 = vld [vmem:[%s4726_s10 + $0x258] sm:$0xff]  ;;  %2443 = vmatprep.subr.mxu0 %v2302_v35  ;;  %v2299_v62 = vld [vmem:[%s4726_s10 + $0x50] sm:$0xff] }
0x166b   :  { %v2219_v45 = vsel %vm2213_vm7, %v4154_v61, 0.0  ;;  %2514 = vmatprep.subr.mxu1 %v2366_v37  ;;  %v2363_v43 = vld [vmem:[%s4726_s10 + $0x250] sm:$0xff]  ;;  %2444 = vmatpush1.msra.mxu0 %v2301_v40 }
0x166c   :  { %v2220_v46 = vadd.f32 %v2219_v45, %v2218_v44  ;;  %2515 = vmatpush1.msra.mxu1 %v2365_v55  ;;  %v2298_v44 = vld [vmem:[%s4726_s10 + $0x48] sm:$0xff]  ;;  %2445 = vmatprep.subr.mxu0 %v2300_v41 }
0x166d   :  { %v2362_v45 = vld [vmem:[%s4726_s10 + $0x248] sm:$0xff]  ;;  %2516 = vmatprep.subr.mxu1 %v2364_v52  ;;  %2446 = vmatpush1.msra.mxu0 %v2299_v62 }
0x166e   :  { %2221 = vadd.xlane.f32.xlu0 %v2220_v46  ;;  %v2297_v46 = vld [vmem:[%s4726_s10 + $0x40] sm:$0xff]  ;;  %2517 = vmatpush1.msra.mxu1 %v2363_v43 }
0x166f   :  { %2447 = vmatprep.subr.mxu0 %v2298_v44  ;;  %2518 = vmatprep.subr.mxu1 %v2362_v45  ;;  %v2345_v44 = vld [vmem:[%s4726_s10 + $0x1c0] sm:$0xff] }
0x1670   :  { %2448 = vmatpush1.msra.mxu0 %v2297_v46  ;;  %2519 = vmatpush1.msra.mxu1 %v2361_v47  ;;  %v2409_v45 = vld [vmem:[%s4726_s10 + $0x3c0] sm:$0xff]  ;;  %v2344_v46 = vld [vmem:[%s4726_s10 + $0x1b8] sm:$0xff] }
0x1671   :  { %2449 = vmatprep.subr.mxu0 %v2296_v49  ;;  %2520 = vmatprep.subr.mxu1 %v2360_v51  ;;  %v2408_v47 = vld [vmem:[%s4726_s10 + $0x3b8] sm:$0xff]  ;;  %v2343_v49 = vld [vmem:[%s4726_s10 + $0x1b0] sm:$0xff] }
0x1672   :  { %2450 = vmatpush1.msra.mxu0 %v2295_v56  ;;  %2521 = vmatpush1.msra.mxu1 %v2359_v57  ;;  %v2407_v51 = vld [vmem:[%s4726_s10 + $0x3b0] sm:$0xff]  ;;  %v2342_v56 = vld [vmem:[%s4726_s10 + $0x1a8] sm:$0xff] }
0x1673   :  { %2451 = vmatprep.subr.mxu0 %v2294_v58  ;;  %2522 = vmatprep.subr.mxu1 %v2358_v59  ;;  %v2406_v57 = vld [vmem:[%s4726_s10 + $0x3a8] sm:$0xff]  ;;  %v2341_v58 = vld [vmem:[%s4726_s10 + $0x1a0] sm:$0xff] }
0x1674   :  { %2452 = vmatpush1.msra.mxu0 %v2293_v63  ;;  %2523 = vmatpush1.msra.mxu1 %v2357_v0  ;;  %v2405_v59 = vld [vmem:[%s4726_s10 + $0x3a0] sm:$0xff]  ;;  %v2340_v63 = vld [vmem:[%s4726_s10 + $0x198] sm:$0xff] }
0x1675   :  { %2453 = vmatprep.subr.mxu0 %v2292_v39  ;;  %2524 = vmatprep.subr.mxu1 %v2356_v1  ;;  %v2404_v0 = vld [vmem:[%s4726_s10 + $0x398] sm:$0xff]  ;;  %v2339_v39 = vld [vmem:[%s4726_s10 + $0x190] sm:$0xff] }
0x1676   :  { %2454 = vmatpush1.msra.mxu0 %v2291_v2  ;;  %2525 = vmatpush1.msra.mxu1 %v2355_v3  ;;  %v2403_v1 = vld [vmem:[%s4726_s10 + $0x390] sm:$0xff]  ;;  %v2338_v2 = vld [vmem:[%s4726_s10 + $0x188] sm:$0xff] }
0x1677   :  { %2455 = vmatprep.subr.mxu0 %v2290_v4  ;;  %2526 = vmatprep.subr.mxu1 %v2354_v5  ;;  %v2402_v3 = vld [vmem:[%s4726_s10 + $0x388] sm:$0xff]  ;;  %v2337_v4 = vld [vmem:[%s4726_s10 + $0x180] sm:$0xff] }
0x1678   :  { %2456 = vmatpush1.msra.mxu0 %v2289_v6  ;;  %2527 = vmatpush1.msra.mxu1 %v2353_v7  ;;  %v2401_v5 = vld [vmem:[%s4726_s10 + $0x380] sm:$0xff]  ;;  %v2336_v6 = vld [vmem:[%s4726_s10 + $0x178] sm:$0xff] }
0x1679   :  { %2457 = vmatprep.subr.mxu0 %v2352_v8  ;;  %2528 = vmatprep.subr.mxu1 %v2416_v9  ;;  %v2400_v7 = vld [vmem:[%s4726_s10 + $0x378] sm:$0xff]  ;;  %v2335_v8 = vld [vmem:[%s4726_s10 + $0x170] sm:$0xff] }
0x167a   :  { %2458 = vmatpush2.msra.mxu0 %v2351_v10  ;;  %2529 = vmatpush2.msra.mxu1 %v2415_v13  ;;  %v2399_v9 = vld [vmem:[%s4726_s10 + $0x370] sm:$0xff]  ;;  %v2334_v10 = vld [vmem:[%s4726_s10 + $0x168] sm:$0xff] }
0x167b   :  { %2459 = vmatprep.subr.mxu0 %v2350_v14  ;;  %2530 = vmatprep.subr.mxu1 %v2414_v38  ;;  %v2398_v13 = vld [vmem:[%s4726_s10 + $0x368] sm:$0xff]  ;;  %v2333_v14 = vld [vmem:[%s4726_s10 + $0x160] sm:$0xff] }
0x167c   :  { %2460 = vmatpush2.msra.mxu0 %v2349_v15  ;;  %2531 = vmatpush2.msra.mxu1 %v2413_v36  ;;  %v2397_v38 = vld [vmem:[%s4726_s10 + $0x360] sm:$0xff]  ;;  %v2332_v15 = vld [vmem:[%s4726_s10 + $0x158] sm:$0xff] }
0x167d   :  { %2461 = vmatprep.subr.mxu0 %v2348_v16  ;;  %2532 = vmatprep.subr.mxu1 %v2412_v17  ;;  %v2396_v36 = vld [vmem:[%s4726_s10 + $0x358] sm:$0xff]  ;;  %v2331_v16 = vld [vmem:[%s4726_s10 + $0x150] sm:$0xff] }
0x167e   :  { %2462 = vmatpush2.msra.mxu0 %v2347_v19  ;;  %2533 = vmatpush2.msra.mxu1 %v2411_v20  ;;  %v2395_v17 = vld [vmem:[%s4726_s10 + $0x350] sm:$0xff]  ;;  %v2330_v19 = vld [vmem:[%s4726_s10 + $0x148] sm:$0xff] }
0x167f   :  { %2463 = vmatprep.subr.mxu0 %v2346_v21  ;;  %2534 = vmatprep.subr.mxu1 %v2410_v22  ;;  %v2394_v20 = vld [vmem:[%s4726_s10 + $0x348] sm:$0xff]  ;;  %v2329_v21 = vld [vmem:[%s4726_s10 + $0x140] sm:$0xff] }
0x1680   :  { %2464 = vmatpush2.msra.mxu0 %v2345_v44  ;;  %2535 = vmatpush2.msra.mxu1 %v2409_v45  ;;  %v2393_v22 = vld [vmem:[%s4726_s10 + $0x340] sm:$0xff]  ;;  %v2386_v44 = vld [vmem:[%s4726_s10 + $0x308] sm:$0xff] }
0x1681   :  { %2465 = vmatprep.subr.mxu0 %v2344_v46  ;;  %2536 = vmatprep.subr.mxu1 %v2408_v47  ;;  %v2321_v45 = vld [vmem:[%s4726_s10 + $0x100] sm:$0xff] }
0x1682   :  { %2466 = vmatpush2.msra.mxu0 %v2343_v49  ;;  %2537 = vmatpush2.msra.mxu1 %v2407_v51  ;;  %v2385_v46 = vld [vmem:[%s4726_s10 + $0x300] sm:$0xff] }
0x1683   :  { %2467 = vmatprep.subr.mxu0 %v2342_v56  ;;  %2538 = vmatprep.subr.mxu1 %v2406_v57  ;;  %v2260_v56 = vrot.slane %v4130_v18, %v3965_v48  ;;  %v2256_v57 = vrot.slane %v4120_v11, %v3965_v48 }
0x1684   :  { %2468 = vmatpush2.msra.mxu0 %v2341_v58  ;;  %2539 = vmatpush2.msra.mxu1 %v2405_v59  ;;  %v2264_v58 = vrot.slane %v4132_v25, %v3965_v48  ;;  %v2252_v59 = vrot.slane %v4111_v60, %v3965_v48 }
0x1685   :  { %2469 = vmatprep.subr.mxu0 %v2340_v63  ;;  %2540 = vmatprep.subr.mxu1 %v2404_v0  ;;  %v2276_v0 = vrot.slane %v4120_v11, %v3970_v53 }
0x1686   :  { %2470 = vmatpush2.msra.mxu0 %v2339_v39  ;;  %2541 = vmatpush2.msra.mxu1 %v2403_v1  ;;  %v2284_v39 = vrot.slane %v4132_v25, %v3970_v53  ;;  %v2272_v1 = vrot.slane %v4111_v60, %v3970_v53  ;;  %v4587_v60 = vld [vmem:[#allocation9 + $0x20] sm:$0xff] }
0x1687   :  { %2471 = vmatprep.subr.mxu0 %v2338_v2  ;;  %2542 = vmatprep.subr.mxu1 %v2402_v3  ;;  %v2280_v2 = vrot.slane %v4130_v18, %v3970_v53  ;;  %v4589_v18 = vld [vmem:[#allocation9 + $0x28] sm:$0xff] }
0x1688   :  { %2472 = vmatpush2.msra.mxu0 %v2337_v4  ;;  %2543 = vmatpush2.msra.mxu1 %v2401_v5 }
0x1689   :  { %2473 = vmatprep.subr.mxu0 %v2336_v6  ;;  %2544 = vmatprep.subr.mxu1 %v2400_v7 }
0x168a   :  { %2474 = vmatpush2.msra.mxu0 %v2335_v8  ;;  %2545 = vmatpush2.msra.mxu1 %v2399_v9 }
0x168b   :  { %2475 = vmatprep.subr.mxu0 %v2334_v10  ;;  %2546 = vmatprep.subr.mxu1 %v2398_v13 }
0x168c   :  { %2476 = vmatpush2.msra.mxu0 %v2333_v14  ;;  %2547 = vmatpush2.msra.mxu1 %v2397_v38 }
0x168d   :  { %2477 = vmatprep.subr.mxu0 %v2332_v15  ;;  %2548 = vmatprep.subr.mxu1 %v2396_v36  ;;  %v2572_v15 = vrot.slane %v4587_v60, %v3814_v28 }
0x168e   :  { %2478 = vmatpush2.msra.mxu0 %v2331_v16  ;;  %2549 = vmatpush2.msra.mxu1 %v2395_v17 }
0x168f   :  { %2479 = vmatprep.subr.mxu0 %v2330_v19  ;;  %2550 = vmatprep.subr.mxu1 %v2394_v20  ;;  %v2576_v19 = vrot.slane %v4589_v18, %v3814_v28 }
0x1690   :  { %2480 = vmatpush2.msra.mxu0 %v2329_v21  ;;  %2551 = vmatpush2.msra.mxu1 %v2393_v22 }
0x16f7   :  { %v2222_v29 = vpop.xlane.xlu0 %2221 }
0x16f8   :  { %v2224_v30 = vmul.f32 0.001953125, %v2222_v29  ;;  %v2328_v29 = vld [vmem:[%s4726_s10 + $0x138] sm:$0xff] }
0x16f9   :  { %2481 = vmatprep.subr.mxu0 %v2328_v29 }
0x16fa   :  { %v4393_v31 = vsub.f32 %v4142_v32, %v2224_v30  ;;  %v4396_v33 = vsub.f32 %v4136_v23, %v2224_v30  ;;  %v4399_v34 = vsub.f32 %v4150_v42, %v2224_v30  ;;  %v4402_v35 = vsub.f32 %v4154_v61, %v2224_v30  ;;  %v2392_v30 = vld [vmem:[%s4726_s10 + $0x338] sm:$0xff] }
0x16fb   :  { %2552 = vmatprep.subr.mxu1 %v2392_v30 }
0x16fc   :  { %v2229_v37 = vmul.f32 %v4393_v31, %v4393_v31  ;;  %v2230_v40 = vmul.f32 %v4396_v33, %v4396_v33  ;;  %v2231_v55 = vmul.f32 %v4399_v34, %v4399_v34  ;;  %v2232_v32 = vmul.f32 %v4402_v35, %v4402_v35 }
0x16fe   :  { %v2233_v23 = vsel %vm2213_vm7, %v2229_v37, 0.0  ;;  %v2234_v42 = vsel %vm2213_vm7, %v2230_v40, 0.0  ;;  %v2236_v61 = vsel %vm2213_vm7, %v2231_v55, 0.0  ;;  %v2238_v62 = vsel %vm2213_vm7, %v2232_v32, 0.0  ;;  %v2327_v37 = vld [vmem:[%s4726_s10 + $0x130] sm:$0xff]  ;;  %v2326_v55 = vld [vmem:[%s4726_s10 + $0x128] sm:$0xff] }
0x16ff   :  { %v2235_v41 = vadd.f32 %v2234_v42, %v2233_v23  ;;  %v2391_v40 = vld [vmem:[%s4726_s10 + $0x330] sm:$0xff]  ;;  %v2390_v32 = vld [vmem:[%s4726_s10 + $0x328] sm:$0xff]  ;;  %v2325_v23 = vld [vmem:[%s4726_s10 + $0x120] sm:$0xff]  ;;  %2482 = vmatpush2.msra.mxu0 %v2327_v37 }
0x1700   :  { %v2389_v42 = vld [vmem:[%s4726_s10 + $0x320] sm:$0xff]  ;;  %2553 = vmatpush2.msra.mxu1 %v2391_v40  ;;  %2483 = vmatprep.subr.mxu0 %v2326_v55 }
0x1701   :  { %v2237_v52 = vadd.f32 %v2236_v61, %v2235_v41  ;;  %v2324_v41 = vld [vmem:[%s4726_s10 + $0x118] sm:$0xff]  ;;  %2554 = vmatprep.subr.mxu1 %v2390_v32  ;;  %2484 = vmatpush2.msra.mxu0 %v2325_v23  ;;  %v2653_v23 = vld [vmem:[#allocation12 + $0xf8] sm:$0xff] }
0x1702   :  { %v2388_v61 = vld [vmem:[%s4726_s10 + $0x318] sm:$0xff]  ;;  %2555 = vmatpush2.msra.mxu1 %v2389_v42  ;;  %2485 = vmatprep.subr.mxu0 %v2324_v41  ;;  %v2637_v42 = vld [vmem:[#allocation12 + $0x78] sm:$0xff]  ;;  %v2652_v41 = vld [vmem:[#allocation12 + $0xf0] sm:$0xff] }
0x1703   :  { %v2239_v43 = vadd.f32 %v2238_v62, %v2237_v52  ;;  %v2323_v52 = vld [vmem:[%s4726_s10 + $0x110] sm:$0xff]  ;;  %2556 = vmatprep.subr.mxu1 %v2388_v61  ;;  %v2636_v61 = vld [vmem:[#allocation12 + $0x70] sm:$0xff] }
0x1704   :  { %v2387_v62 = vld [vmem:[%s4726_s10 + $0x310] sm:$0xff]  ;;  %2486 = vmatpush2.msra.mxu0 %v2323_v52  ;;  %v2651_v52 = vld [vmem:[#allocation12 + $0xe8] sm:$0xff] }
0x1705   :  { %2240 = vadd.xlane.f32.xlu1 %v2239_v43  ;;  %v2322_v43 = vld [vmem:[%s4726_s10 + $0x108] sm:$0xff]  ;;  %2557 = vmatpush2.msra.mxu1 %v2387_v62  ;;  %v2635_v62 = vld [vmem:[#allocation12 + $0x68] sm:$0xff] }
0x1706   :  { %2487 = vmatprep.subr.mxu0 %v2322_v43  ;;  %2558 = vmatprep.subr.mxu1 %v2386_v44  ;;  %v2650_v43 = vld [vmem:[#allocation12 + $0xe0] sm:$0xff] }
0x1707   :  { %2488 = vmatpush2.msra.mxu0 %v2321_v45  ;;  %2559 = vmatpush2.msra.mxu1 %v2385_v46 }
0x1708   :  { %3338 = vmatprep.subr.mxu1 %v3673_v54  ;;  %3117 = vmatprep.subr.mxu0 %v2653_v23 }
0x178e   :  { %v2241_v47 = vpop.xlane.xlu1 %2240 }
0x178f   :  { %v2242_v49 = vmul.f32 0.001953125, %v2241_v47 }
0x1791   :  { %v2243_v51 = vadd.f32 1e-05, %v2242_v49 }
0x1793   :  { %3474 = vrsqrt.f32 %v2243_v51 }
0x17a0   :  { %v3475_v63 = vpop.eup %3474 }
0x17a1   :  { %v2246_v3 = vmul.f32 %v3475_v63, %v4396_v33  ;;  %v2248_v4 = vmul.f32 %v3475_v63, %v4402_v35  ;;  %v2245_v5 = vmul.f32 %v3475_v63, %v4393_v31  ;;  %v2247_v6 = vmul.f32 %v3475_v63, %v4399_v34  ;;  %v2649_v63 = vld [vmem:[#allocation12 + $0xd8] sm:$0xff] }
0x17a2   :  { %v2420_v31 = vrot.slane %v4587_v60, %v3811_v26  ;;  %v2424_v33 = vrot.slane %v4589_v18, %v3811_v26 }
0x17a3   :  { %v2266_v7 = vmul.f32 %v2256_v57, %v2246_v3  ;;  %v2268_v8 = vmul.f32 %v2264_v58, %v2248_v4  ;;  %v2265_v11 = vmul.f32 %v2252_v59, %v2245_v5  ;;  %v2267_v9 = vmul.f32 %v2260_v56, %v2247_v6  ;;  %v2634_v59 = vld [vmem:[#allocation12 + $0x60] sm:$0xff]  ;;  %v2631_v3 = vld [vmem:[#allocation12 + $0x48] sm:$0xff]  ;;  %v2645_v6 = vld [vmem:[#allocation12 + $0xb8] sm:$0xff] }
0x17a4   :  { %v2646_v4 = vld [vmem:[#allocation12 + $0xc0] sm:$0xff] }
0x17a5   :  { %v2286_v10 = vadd.f32 %v2276_v0, %v2266_v7  ;;  %v2288_v25 = vadd.f32 %v2284_v39, %v2268_v8  ;;  %v2285_v13 = vadd.f32 %v2272_v1, %v2265_v11  ;;  %v2287_v14 = vadd.f32 %v2280_v2, %v2267_v9  ;;  %v2633_v0 = vld [vmem:[#allocation12 + $0x58] sm:$0xff]  ;;  %v2648_v39 = vld [vmem:[#allocation12 + $0xd0] sm:$0xff]  ;;  %v2647_v2 = vld [vmem:[#allocation12 + $0xc8] sm:$0xff] }
0x17a6   :  { %v2632_v1 = vld [vmem:[#allocation12 + $0x50] sm:$0xff]  ;;  %v2630_v5 = vld [vmem:[#allocation12 + $0x40] sm:$0xff]  ;;  %v2629_v7 = vld [vmem:[#allocation12 + $0x38] sm:$0xff] }
0x17a7   :  { %2489 = vmatprep.mubr.f32.mxu0 %v2286_v10  ;;  %2560 = vmatprep.mubr.f32.mxu1 %v2288_v25  ;;  %v2644_v8 = vld [vmem:[#allocation12 + $0xb0] sm:$0xff]  ;;  %v2643_v9 = vld [vmem:[#allocation12 + $0xa8] sm:$0xff]  ;;  %v2642_v25 = vld [vmem:[#allocation12 + $0xa0] sm:$0xff] }
0x17a8   :  { %2490 = vmatmul.mubr.f32.vlgmr.msra.gmra.mxu0 %v2285_v13  ;;  %2561 = vmatmul.mubr.f32.vlgmr.msra.gmra.mxu1 %v2287_v14  ;;  %v2628_v11 = vld [vmem:[#allocation12 + $0x30] sm:$0xff]  ;;  %v2627_v10 = vld [vmem:[#allocation12 + $0x28] sm:$0xff]  ;;  %v2626_v13 = vld [vmem:[#allocation12 + $0x20] sm:$0xff] }
0x17a9   :  { %3118 = vmatpush3.msra.mxu0 %v2637_v42  ;;  %v2641_v14 = vld [vmem:[#allocation12 + $0x98] sm:$0xff]  ;;  %3370 = vmatprep.mubr.msk.f32.mxu1 %vm3674_vm13, %v3673_v54 }
0x17aa   :  { %3119 = vmatprep.subr.mxu0 %v2652_v41 }
0x17ab   :  { %3120 = vmatpush3.msra.mxu0 %v2636_v61  ;;  %v2657_v61 = vrot.slane %v4587_v60, %v3948_v50  ;;  %v2773_v50 = vld [vmem:[%s4728_s12 + $0x70] sm:$0xff] }
0x17ac   :  { %3121 = vmatprep.subr.mxu0 %v2651_v52 }
0x17ad   :  { %3122 = vmatpush3.msra.mxu0 %v2635_v62 }
0x17ae   :  { %3123 = vmatprep.subr.mxu0 %v2650_v43 }
0x17af   :  { %3124 = vmatpush3.msra.mxu0 %v2634_v59 }
0x17b0   :  { %3125 = vmatprep.subr.mxu0 %v2649_v63  ;;  %v2770_v63 = vld [vmem:[%s4728_s12 + $0x58] sm:$0xff] }
0x17b1   :  { %3126 = vmatpush3.msra.mxu0 %v2633_v0  ;;  %v2769_v0 = vld [vmem:[%s4728_s12 + $0x50] sm:$0xff] }
0x17b2   :  { %3127 = vmatprep.subr.mxu0 %v2648_v39  ;;  %v2768_v39 = vld [vmem:[%s4728_s12 + $0x48] sm:$0xff] }
0x17b3   :  { %3128 = vmatpush3.msra.mxu0 %v2632_v1  ;;  %v2767_v1 = vld [vmem:[%s4728_s12 + $0x40] sm:$0xff] }
0x17b4   :  { %3129 = vmatprep.subr.mxu0 %v2647_v2  ;;  %v2766_v2 = vld [vmem:[%s4728_s12 + $0x38] sm:$0xff] }
0x17b5   :  { %3130 = vmatpush3.msra.mxu0 %v2631_v3  ;;  %v2765_v3 = vld [vmem:[%s4728_s12 + $0x30] sm:$0xff] }
0x17b6   :  { %3131 = vmatprep.subr.mxu0 %v2646_v4  ;;  %v2764_v4 = vld [vmem:[%s4728_s12 + $0x28] sm:$0xff] }
0x17b7   :  { %3132 = vmatpush3.msra.mxu0 %v2630_v5  ;;  %v2763_v5 = vld [vmem:[%s4728_s12 + $0x20] sm:$0xff] }
0x17b8   :  { %3133 = vmatprep.subr.mxu0 %v2645_v6  ;;  %v2762_v6 = vld [vmem:[%s4728_s12 + $0x18] sm:$0xff] }
0x17b9   :  { %3134 = vmatpush3.msra.mxu0 %v2629_v7  ;;  %v2761_v7 = vld [vmem:[%s4728_s12 + $0x10] sm:$0xff] }
0x17ba   :  { %3135 = vmatprep.subr.mxu0 %v2644_v8  ;;  %v2760_v8 = vld [vmem:[%s4728_s12 + $0x8] sm:$0xff] }
0x17bb   :  { %3136 = vmatpush3.msra.mxu0 %v2628_v11  ;;  %v2759_v11 = vld [vmem:[%s4728_s12] sm:$0xff] }
0x17bc   :  { %3137 = vmatprep.subr.mxu0 %v2643_v9 }
0x17bd   :  { %3138 = vmatpush3.msra.mxu0 %v2627_v10 }
0x17be   :  { %3139 = vmatprep.subr.mxu0 %v2642_v25 }
0x17bf   :  { %3140 = vmatpush3.msra.mxu0 %v2626_v13  ;;  %v2752_v13 = vrot.slane %v4587_v60, %v3965_v48 }
0x17c0   :  { %3141 = vmatprep.subr.mxu0 %v2641_v14 }
0x1868   :  { %v2491_v34 = vpop.f32.mrf.mxu0  ;;  %v2562_v35 = vpop.f32.mrf.mxu1 }
0x1869   :  { %v2492_v38 = vadd.f32 %v2491_v34, %v2420_v31  ;;  %v2625_v31 = vld [vmem:[#allocation12 + $0x18] sm:$0xff]  ;;  %v2624_v34 = vld [vmem:[#allocation12 + $0x10] sm:$0xff] }
0x186a   :  { %v2493_v36 = vpop.f32.mrf.mxu0  ;;  %v2564_v20 = vpop.f32.mrf.mxu1  ;;  %3142 = vmatpush3.msra.mxu0 %v2625_v31 }
0x186b   :  { %v2563_v16 = vadd.f32 %v2562_v35, %v2492_v38  ;;  %v2494_v17 = vadd.f32 %v2493_v36, %v2424_v33  ;;  %v2640_v33 = vld [vmem:[#allocation12 + $0x90] sm:$0xff]  ;;  %v2639_v35 = vld [vmem:[#allocation12 + $0x88] sm:$0xff]  ;;  %v2622_v36 = vld [vmem:[#allocation12] sm:$0xff] }
0x186c   :  { %3143 = vmatprep.subr.mxu0 %v2640_v33  ;;  %v2623_v38 = vld [vmem:[#allocation12 + $0x8] sm:$0xff]  ;;  %v2757_v33 = vrot.slane %v4587_v60, %v3970_v53  ;;  %v2871_v53 = vld [vmem:[#allocation13 + $0x38] sm:$0xff] }
0x186d   :  { %vm2567_vm10 = vcmp.ge.f32.partialorder %v2563_v16, 0.0  ;;  %v2577_v21 = vmul.f32 %v2572_v15, %v2563_v16  ;;  %v2565_v22 = vadd.f32 %v2564_v20, %v2494_v17  ;;  %3144 = vmatpush3.msra.mxu0 %v2624_v34  ;;  %v2638_v15 = vld [vmem:[#allocation12 + $0x80] sm:$0xff]  ;;  %v2609_v20 = vrot.slane %v4589_v18, %v3909_v24 }
0x186e   :  { %3145 = vmatprep.subr.mxu0 %v2639_v35 }
0x186f   :  { %vm2568_vm11 = vcmp.ge.f32.partialorder %v2565_v22, 0.0  ;;  %v2578_v29 = vmul.f32 %v2576_v19, %v2565_v22  ;;  %v2579_v30 = vsel %vm2567_vm10, %v2563_v16, %v2577_v21  ;;  %3146 = vmatpush3.msra.mxu0 %v2623_v38  ;;  %v2605_v21 = vrot.slane %v4587_v60, %v3909_v24  ;;  %v162_v38 = vld [vmem:[#allocation9 + $0x40] sm:$0xf] }
0x1870   :  { %v2581_v40 = vsel %vm2213_vm7, %v2579_v30, 0.0  ;;  %3147 = vmatprep.subr.mxu0 %v2638_v15  ;;  %v2778_v15 = vrot.slane %v162_v38, %v3811_v26  ;;  %v2868_v26 = vld [vmem:[#allocation13 + $0x20] sm:$0xff] }
0x1871   :  { %v2580_v37 = vsel %vm2568_vm11, %v2565_v22, %v2578_v29  ;;  %3148 = vmatpush3.msra.mxu0 %v2622_v36  ;;  %v2853_v36 = vrot.slane %v162_v38, %v3814_v28  ;;  %v2867_v28 = vld [vmem:[#allocation13 + $0x18] sm:$0xff] }
0x1872   :  { %v2582_v55 = vsel %vm2213_vm7, %v2580_v37, 0.0  ;;  %3373 = vmatprep.subr.mxu0 %v3673_v54 }
0x1873   :  { %v2583_v32 = vadd.f32 %v2582_v55, %v2581_v40  ;;  %v2615_v40 = vrot.slane %v4587_v60, %v3912_v27 }
0x1875   :  { %2584 = vadd.xlane.f32.xlu0 %v2583_v32 }
0x18fe   :  { %v2585_v44 = vpop.xlane.xlu0 %2584 }
0x18ff   :  { %v2587_v45 = vmul.f32 0.00390625, %v2585_v44 }
0x1901   :  { %v4601_v46 = vsub.f32 %v2579_v30, %v2587_v45  ;;  %v4603_v47 = vsub.f32 %v2580_v37, %v2587_v45  ;;  %v2619_v30 = vrot.slane %v4589_v18, %v3912_v27  ;;  %v2732_v18 = vrot.slane %v4587_v60, %v3955_v12  ;;  %v2772_v12 = vld [vmem:[%s4728_s12 + $0x68] sm:$0xff]  ;;  %v2870_v60 = vld [vmem:[#allocation13 + $0x30] sm:$0xff] }
0x1903   :  { %v2590_v49 = vmul.f32 %v4601_v46, %v4601_v46  ;;  %v2591_v51 = vmul.f32 %v4603_v47, %v4603_v47 }
0x1905   :  { %v2592_v56 = vsel %vm2213_vm7, %v2590_v49, 0.0  ;;  %v2593_v57 = vsel %vm2213_vm7, %v2591_v51, 0.0  ;;  %v2771_v49 = vld [vmem:[%s4728_s12 + $0x60] sm:$0xff] }
0x1906   :  { %v2594_v58 = vadd.f32 %v2593_v57, %v2592_v56 }
0x1908   :  { %2595 = vadd.xlane.f32.xlu1 %v2594_v58 }
0x1991   :  { %v2596_v16 = vpop.xlane.xlu1 %2595 }
0x1992   :  { %v2597_v17 = vmul.f32 0.00390625, %v2596_v16 }
0x1994   :  { %v2598_v19 = vadd.f32 1e-05, %v2597_v17 }
0x1996   :  { %3476 = vrsqrt.f32 %v2598_v19 }
0x19a3   :  { %v3477_v22 = vpop.eup %3476 }
0x19a4   :  { %v2601_v29 = vmul.f32 %v3477_v22, %v4603_v47  ;;  %v2600_v37 = vmul.f32 %v3477_v22, %v4601_v46  ;;  %v2774_v47 = vld [vmem:[%s4728_s12 + $0x78] sm:$0xff] }
0x19a5   :  { %3339 = vmatpush3.msra.mxu1 %v2774_v47 }
0x19a6   :  { %v2611_v55 = vmul.f32 %v2609_v20, %v2601_v29  ;;  %v2610_v32 = vmul.f32 %v2605_v21, %v2600_v37  ;;  %3340 = vmatprep.subr.mxu1 %v3673_v54  ;;  %v2869_v29 = vld [vmem:[#allocation13 + $0x28] sm:$0xff] }
0x19a7   :  { %3341 = vmatpush3.msra.mxu1 %v2773_v50  ;;  %v2865_v37 = vld [vmem:[#allocation13 + $0x8] sm:$0xff] }
0x19a8   :  { %v2621_v23 = vadd.f32 %v2619_v30, %v2611_v55  ;;  %v2620_v42 = vadd.f32 %v2615_v40, %v2610_v32  ;;  %3342 = vmatprep.subr.mxu1 %v3673_v54  ;;  %v2866_v30 = vld [vmem:[#allocation13 + $0x10] sm:$0xff]  ;;  %v2864_v40 = vld [vmem:[#allocation13] sm:$0xff] }
0x19a9   :  { %3343 = vmatpush3.msra.mxu1 %v2772_v12 }
0x19aa   :  { %2722 = vmatprep.mubr.f32.mxu0 %v2621_v23  ;;  %3344 = vmatprep.subr.mxu1 %v3673_v54 }
0x19ab   :  { %2723 = vmatmul.mubr.f32.vlgmr.msra.gmra.mxu0 %v2620_v42  ;;  %3345 = vmatpush3.msra.mxu1 %v2771_v49 }
0x19ac   :  { %3346 = vmatprep.subr.mxu1 %v3673_v54  ;;  %3389 = vmatprep.mubr.msk.f32.mxu0 %vm3674_vm13, %v3673_v54 }
0x19ad   :  { %3347 = vmatpush3.msra.mxu1 %v2770_v63  ;;  %3374 = vmatpush3.msra.mxu0 %v2871_v53 }
0x19ae   :  { %3348 = vmatprep.subr.mxu1 %v3673_v54  ;;  %3375 = vmatprep.subr.mxu0 %v3673_v54 }
0x19af   :  { %3349 = vmatpush3.msra.mxu1 %v2769_v0  ;;  %3376 = vmatpush3.msra.mxu0 %v2870_v60 }
0x19b0   :  { %3350 = vmatprep.subr.mxu1 %v3673_v54  ;;  %3377 = vmatprep.subr.mxu0 %v3673_v54 }
0x19b1   :  { %3351 = vmatpush3.msra.mxu1 %v2768_v39  ;;  %3378 = vmatpush3.msra.mxu0 %v2869_v29 }
0x19b2   :  { %3352 = vmatprep.subr.mxu1 %v3673_v54  ;;  %3379 = vmatprep.subr.mxu0 %v3673_v54 }
0x19b3   :  { %3353 = vmatpush3.msra.mxu1 %v2767_v1  ;;  %3380 = vmatpush3.msra.mxu0 %v2868_v26 }
0x19b4   :  { %3354 = vmatprep.subr.mxu1 %v3673_v54  ;;  %3381 = vmatprep.subr.mxu0 %v3673_v54 }
0x19b5   :  { %3355 = vmatpush3.msra.mxu1 %v2766_v2  ;;  %3382 = vmatpush3.msra.mxu0 %v2867_v28 }
0x19b6   :  { %3356 = vmatprep.subr.mxu1 %v3673_v54  ;;  %3383 = vmatprep.subr.mxu0 %v3673_v54 }
0x19b7   :  { %3357 = vmatpush3.msra.mxu1 %v2765_v3  ;;  %3384 = vmatpush3.msra.mxu0 %v2866_v30 }
0x19b8   :  { %3358 = vmatprep.subr.mxu1 %v3673_v54  ;;  %3385 = vmatprep.subr.mxu0 %v3673_v54 }
0x19b9   :  { %3359 = vmatpush3.msra.mxu1 %v2764_v4  ;;  %3386 = vmatpush3.msra.mxu0 %v2865_v37 }
0x19ba   :  { %3360 = vmatprep.subr.mxu1 %v3673_v54  ;;  %3387 = vmatprep.subr.mxu0 %v3673_v54 }
0x19bb   :  { %3361 = vmatpush3.msra.mxu1 %v2763_v5  ;;  %3388 = vmatpush3.msra.mxu0 %v2864_v40 }
0x19bc   :  { %3362 = vmatprep.subr.mxu1 %v3673_v54 }
0x19bd   :  { %3363 = vmatpush3.msra.mxu1 %v2762_v6 }
0x19be   :  { %3364 = vmatprep.subr.mxu1 %v3673_v54 }
0x19bf   :  { %3365 = vmatpush3.msra.mxu1 %v2761_v7 }
0x19c0   :  { %3366 = vmatprep.subr.mxu1 %v3673_v54 }
0x19c1   :  { %3367 = vmatpush3.msra.mxu1 %v2760_v8 }
0x19c2   :  { %3368 = vmatprep.subr.mxu1 %v3673_v54 }
0x19c3   :  { %3369 = vmatpush3.msra.mxu1 %v2759_v11 }
0x1a6b   :  { %v3149_v41 = vpop.f32.mrf.mxu0 }
0x1a6d   :  { %v3150_v52 = vpop.f32.mrf.mxu0 }
0x1a6e   :  { %v3151_v62 = vadd.f32 %v3150_v52, %v3149_v41  ;;  %v2875_v41 = vrot.slane %v162_v38, %v3909_v24 }
0x1a70   :  { %v2725_v43 = vadd.f32 %v3151_v62, %v2657_v61  ;;  %v2953_v61 = vrot.slane %v162_v38, %v3912_v27 }
0x1a72   :  { %vm2728_vm12 = vcmp.ge.f32.partialorder %v2725_v43, 0.0  ;;  %v2733_v44 = vmul.f32 %v2732_v18, %v2725_v43 }
0x1a74   :  { %v2734_v45 = vsel %vm2728_vm12, %v2725_v43, %v2733_v44 }
0x1a75   :  { %v2735_v46 = vsel %vm2213_vm7, %v2734_v45, 0.0 }
0x1a76   :  { %2736 = vadd.xlane.f32.xlu0 %v2735_v46 }
0x1aff   :  { %v2737_v51 = vpop.xlane.xlu0 %2736 }
0x1b00   :  { %v2739_v56 = vmul.f32 0.0078125, %v2737_v51 }
0x1b02   :  { %v2740_v57 = vsub.f32 %v2734_v45, %v2739_v56 }
0x1b04   :  { %v2741_v58 = vmul.f32 %v2740_v57, %v2740_v57 }
0x1b06   :  { %v2742_v59 = vsel %vm2213_vm7, %v2741_v58, 0.0 }
0x1b07   :  { %2743 = vadd.xlane.f32.xlu1 %v2742_v59 }
0x1b90   :  { %v2744_v9 = vpop.xlane.xlu1 %2743 }
0x1b91   :  { %v2745_v10 = vmul.f32 0.0078125, %v2744_v9 }
0x1b93   :  { %v2746_v25 = vadd.f32 1e-05, %v2745_v10 }
0x1b95   :  { %3478 = vrsqrt.f32 %v2746_v25 }
0x1ba2   :  { %v3479_v14 = vpop.eup %3478 }
0x1ba3   :  { %v2748_v31 = vmul.f32 %v3479_v14, %v2740_v57 }
0x1ba5   :  { %v2753_v34 = vmul.f32 %v2752_v13, %v2748_v31 }
0x1ba7   :  { %v2758_v35 = vadd.f32 %v2757_v33, %v2753_v34 }
0x1ba9   :  { %3371 = vmatmul.mubr.f32.vlgmr.msra.gmra.mxu1 %v2758_v35 }
0x1c69   :  { %v2845_v16 = vpop.f32.mrf.mxu1 }
0x1c6a   :  { %v2846_v17 = vadd.f32 %v2845_v16, %v2778_v15 }
0x1c6b   :  { %v3372_v19 = vpop.f32.mrf.mxu1 }
0x1c6c   :  { %vm2849_vm14 = vcmp.ge.f32.partialorder %v2846_v17, 0.0  ;;  %v2854_v20 = vmul.f32 %v2853_v36, %v2846_v17 }
0x1c6e   :  { %v2855_v21 = vsel %vm2849_vm14, %v2846_v17, %v2854_v20 }
0x1c6f   :  { %v2856_v48 = vmul.f32 %v2855_v21, %v2855_v21 }
0x1c71   :  { %v2858_v22 = vsel %vm2857_vm15, %v2856_v48, 0.0 }
0x1c72   :  { %2859 = vadd.xlane.f32.xlu0 %v2858_v22 }
0x1cfb   :  { %v2860_v55 = vpop.xlane.xlu0 %2859 }
0x1cfc   :  { %v2861_v32 = vmax.f32 %v2860_v55, 1e-24 }
0x1cfe   :  { %3480 = vrsqrt.f32 %v2861_v32 }
0x1d0b   :  { %v3481_v23 = vpop.eup %3480 }
0x1d0c   :  { %v2863_v42 = vmul.f32 %v3481_v23, %v2855_v21 }
0x1d0e   :  { %3390 = vmatmul.mubr.msk.f32.vlgmr.msra.gmra.mxu0 %vm962_vm2, %v2863_v42 }
0x1dce   :  { %v2945_v52 = vpop.f32.mrf.mxu0 }
0x1dcf   :  { %v2946_v62 = vadd.f32 %v2945_v52, %v2875_v41 }
0x1dd0   :  { %v3391_v18 = vpop.f32.mrf.mxu0 }
0x1dd1   :  { %vm2949_vm0 = vcmp.ge.f32.partialorder %v2946_v62, 0.0  ;;  %v2954_v43 = vmul.f32 %v2953_v61, %v2946_v62 }
0x1dd3   :  { %v2955_v44 = vsel %vm2949_vm0, %v2946_v62, %v2954_v43 }
0x1dd4   :  { %v2956_v45 = vmul.f32 %v2955_v44, %v2955_v44 }
0x1dd6   :  { %v2957_v54 = vsel %vm2857_vm15, %v2956_v45, 0.0 }
0x1dd7   :  { %2958 = vadd.xlane.f32.xlu1 %v2957_v54 }
0x1e60   :  { %v2959_v46 = vpop.xlane.xlu1 %2958 }
0x1e61   :  { %v2960_v47 = vmax.f32 %v2959_v46, 1e-24 }
0x1e63   :  { %3482 = vrsqrt.f32 %v2960_v47 }
0x1e70   :  { %v3483_v50 = vpop.eup %3482 }
0x1e71   :  { %v2962_v12 = vmul.f32 %v3483_v50, %v2955_v44 }
0x1e73   :  { %2964 = vrot.lane.b32.xlu0 %v2962_v12, %s3670_s1 }
0x1ee5   :  { %v2965_v24 = vpop.permute.xlu0 %2964 }
0x1ee6   :  { %v2967_v27 = vsel %vm962_vm2, %v2863_v42, %v2965_v24 }
0x1ee7   :  { %2968 = vst [vmem:[%s4730_s14] sm:$0x3] %v2967_v27 }
0x1ee8   :  { %2973 = vsyncpa [#allocation3], 1 }
0x1ee9   :  { %2974 = vsyncpa [#allocation5], 1 }
0x1eea   :  { %2975 = vsyncpa [#allocation8], 1 }
0x1eeb   :  { %2976 = vsyncpa [#allocation11], 1 }
0x1eec   :  { %2977 = vsyncpa [#allocation14], 1 }

</bundles_post_ra>
